<compile_context>
chip_gen: v5e
topology: v5e:2x2
jax: 0.10.0
libtpu: 0.0.40
codegen_flags: <defaults>
</compile_context>

<pallas_src>
import functools
import math

import jax
import jax.numpy as jnp
from jax.experimental import pallas as pl
from jax.experimental.pallas import tpu as pltpu


# ----------------------------------------------------------------------------
# small BERT config (synthetic)
# ----------------------------------------------------------------------------
VOCAB = 99
HIDDEN = 32
NUM_LAYERS = 2
NUM_HEADS = 4
HEAD_DIM = HIDDEN // NUM_HEADS
INTERMEDIATE = 64
MAX_POS = 16
TYPE_VOCAB = 2
LN_EPS = 1e-12

BATCH = 4   # must be even (adjacent-pair SimCSE labels)
SEQ = 8


# ----------------------------------------------------------------------------
# in-kernel helpers
# ----------------------------------------------------------------------------
def _erf(x):
    # Abramowitz & Stegun 7.1.26 polynomial erf (max abs err ~1.5e-7): used because
    # lax.erf has no guaranteed Mosaic lowering; numerically matches exact erf-gelu in f32.
    # TODO(synk): replace with lax.erf if/when Pallas-TPU gains a lowering for erf_p.
    a1, a2, a3, a4, a5 = (0.254829592, -0.284496736, 1.421413741,
                          -1.453152027, 1.061405429)
    p = 0.3275911
    ax = jnp.abs(x)
    t = 1.0 / (1.0 + p * ax)
    poly = ((((a5 * t + a4) * t + a3) * t + a2) * t + a1) * t
    y = 1.0 - poly * jnp.exp(-ax * ax)
    return jnp.where(x >= 0.0, y, -y)


def _gelu_exact(x):
    return 0.5 * x * (1.0 + _erf(x * (1.0 / math.sqrt(2.0))))


def _layernorm(x, g, b):
    mu = jnp.mean(x, axis=-1, keepdims=True)
    var = jnp.mean((x - mu) ** 2, axis=-1, keepdims=True)
    return (x - mu) * jax.lax.rsqrt(var + LN_EPS) * g + b


# ----------------------------------------------------------------------------
# fused whole-forward kernel
# ----------------------------------------------------------------------------
def _fused_forward_kernel(
    emb_ref, mask_ref,
    emb_g_ref, emb_b_ref,
    wqkv_ref, bqkv_ref,
    wao_ref, bao_ref,
    ln1g_ref, ln1b_ref,
    wi_ref, bi_ref,
    wo_ref, bo_ref,
    ln2g_ref, ln2b_ref,
    wp_ref, bp_ref,
    ypred_ref, prob_ref, loss_ref,
):
    B, S = mask_ref.shape
    H = emb_ref.shape[-1]
    nH = NUM_HEADS
    Dh = H // nH
    scale = 1.0 / math.sqrt(Dh)

    # ----- embedding layernorm (dropout = identity) -----
    x = _layernorm(emb_ref[...], emb_g_ref[...], emb_b_ref[...])        # (B*S, H)

    # additive attention mask bias: (1 - mask) * -10000, broadcast over query positions
    bias = ((1.0 - mask_ref[...]) * -10000.0)[:, None, :]               # (B, 1, S)

    # ----- transformer layers (statically unrolled) -----
    for li in range(NUM_LAYERS):
        # fused QKV projection: (B*S, H) @ (H, 3H)
        qkv = jnp.dot(x, wqkv_ref[li], preferred_element_type=jnp.float32) + bqkv_ref[li]
        q = qkv[:, 0:H].reshape(B, S, H)
        k = qkv[:, H:2 * H].reshape(B, S, H)
        v = qkv[:, 2 * H:3 * H].reshape(B, S, H)

        # per-head attention, all in VMEM (static head loop, no HBM transposes)
        ctx_heads = []
        for h in range(nH):
            lo, hi = h * Dh, (h + 1) * Dh
            qh = q[:, :, lo:hi]                                         # (B, S, Dh)
            kh = k[:, :, lo:hi]
            vh = v[:, :, lo:hi]
            s = jnp.einsum("bqd,bkd->bqk", qh, kh,
                           preferred_element_type=jnp.float32) * scale + bias
            s = s - jnp.max(s, axis=-1, keepdims=True)
            p = jnp.exp(s)
            p = p * pl.reciprocal(jnp.sum(p, axis=-1, keepdims=True), approx=True)
            ctx_heads.append(jnp.einsum("bqk,bkd->bqd", p, vh,
                                        preferred_element_type=jnp.float32))
        ctx = jnp.concatenate(ctx_heads, axis=-1).reshape(B * S, H)

        # attention output projection + residual + LN
        ao = jnp.dot(ctx, wao_ref[li], preferred_element_type=jnp.float32) + bao_ref[li]
        x = _layernorm(ao + x, ln1g_ref[li], ln1b_ref[li])

        # feed-forward: intermediate + exact gelu, output + residual + LN
        inter = jnp.dot(x, wi_ref[li], preferred_element_type=jnp.float32) + bi_ref[li]
        inter = _gelu_exact(inter)
        ffn = jnp.dot(inter, wo_ref[li], preferred_element_type=jnp.float32) + bo_ref[li]
        x = _layernorm(ffn + x, ln2g_ref[li], ln2b_ref[li])

    # ----- pooler: tanh(W * h[:, 0] + b) -----
    cls = x.reshape(B, S, H)[:, 0, :]                                   # (B, H)
    pooled = jnp.tanh(
        jnp.dot(cls, wp_ref[...], preferred_element_type=jnp.float32) + bp_ref[...]
    )

    # ----- SimCSE head (dropout = identity) -----
    norm = jnp.sqrt(jnp.sum(pooled * pooled, axis=1, keepdims=True)) + 1e-8
    yp = pooled / norm
    ypred_ref[...] = yp

    # probabilities = softmax(logits, dim=-1)   (logits == normalized pooled vector)
    z = yp - jnp.max(yp, axis=-1, keepdims=True)
    e = jnp.exp(z)
    prob_ref[...] = e / jnp.sum(e, axis=-1, keepdims=True)

    # similarities = (yp @ yp.T - eye * 1e12) * 20
    sim = jnp.dot(yp, yp.T, preferred_element_type=jnp.float32)
    rows = jax.lax.broadcasted_iota(jnp.int32, (B, B), 0)
    cols = jax.lax.broadcasted_iota(jnp.int32, (B, B), 1)
    eye = (rows == cols).astype(jnp.float32)
    pair = rows + 1 - (rows % 2) * 2                                    # idxs + 1 - idxs%2*2
    y_true = (cols == pair).astype(jnp.float32)
    sim = (sim - eye * 1e12) * 20.0

    # multilabel categorical crossentropy
    yp_ = (1.0 - 2.0 * y_true) * sim
    y_neg = yp_ - y_true * 1e12
    y_pos = yp_ - (1.0 - y_true) * 1e12

    def lse_with_zero(v):
        # logsumexp over last dim of [v, 0]
        m = jnp.maximum(jnp.max(v, axis=-1, keepdims=True), 0.0)
        return m + jnp.log(jnp.sum(jnp.exp(v - m), axis=-1, keepdims=True)
                           + jnp.exp(-m))

    loss = lse_with_zero(y_neg) + lse_with_zero(y_pos)                  # (B, 1)
    loss_ref[...] = jnp.mean(loss).reshape(1, 1)


# ----------------------------------------------------------------------------
# parameter init (deterministic, synthetic, pre-stacked per layer)
# ----------------------------------------------------------------------------
def init_params(key):
    L, H, I = NUM_LAYERS, HIDDEN, INTERMEDIATE
    ks = jax.random.split(key, 8)

    def w(k, shape):
        return 0.02 * jax.random.normal(k, shape, jnp.float32)

    return {
        "word_emb": w(ks[0], (VOCAB, H)),
        "pos_emb": w(ks[1], (MAX_POS, H)),
        "type_emb": w(ks[2], (TYPE_VOCAB, H)),
        "emb_ln_g": jnp.ones((1, H), jnp.float32),
        "emb_ln_b": jnp.zeros((1, H), jnp.float32),
        # per-layer weights, stacked along a leading layer axis
        "wqkv": w(ks[3], (L, H, 3 * H)),
        "bqkv": jnp.zeros((L, 1, 3 * H), jnp.float32),
        "wao": w(ks[4], (L, H, H)),
        "bao": jnp.zeros((L, 1, H), jnp.float32),
        "ln1_g": jnp.ones((L, 1, H), jnp.float32),
        "ln1_b": jnp.zeros((L, 1, H), jnp.float32),
        "wi": w(ks[5], (L, H, I)),
        "bi": jnp.zeros((L, 1, I), jnp.float32),
        "wo": w(ks[6], (L, I, H)),
        "bo": jnp.zeros((L, 1, H), jnp.float32),
        "ln2_g": jnp.ones((L, 1, H), jnp.float32),
        "ln2_b": jnp.zeros((L, 1, H), jnp.float32),
        # pooler
        "wp": w(ks[7], (H, H)),
        "bp": jnp.zeros((1, H), jnp.float32),
    }


# ----------------------------------------------------------------------------
# forward pass (BertModelTest.forward)
# ----------------------------------------------------------------------------
def bert_model_test_forward(params, batch_seqs, batch_seq_masks,
                            batch_seq_segments, labels):
    del labels  # accepted but unused by the SimBERT loss head (matches PyTorch code)
    B, S = batch_seqs.shape

    # ----- embedding lookups (gathers stay in XLA; everything else is in the kernel) -----
    pos_ids = jnp.arange(S, dtype=jnp.int32)
    emb = (jnp.take(params["word_emb"], batch_seqs, axis=0)
           + jnp.take(params["pos_emb"], pos_ids, axis=0)[None, :, :]
           + jnp.take(params["type_emb"], batch_seq_segments, axis=0))
    emb = emb.reshape(B * S, HIDDEN)
    mask = batch_seq_masks.astype(jnp.float32)

    operands = (
        emb, mask,
        params["emb_ln_g"], params["emb_ln_b"],
        params["wqkv"], params["bqkv"],
        params["wao"], params["bao"],
        params["ln1_g"], params["ln1_b"],
        params["wi"], params["bi"],
        params["wo"], params["bo"],
        params["ln2_g"], params["ln2_b"],
        params["wp"], params["bp"],
    )

    def vmem_spec():
        return pl.BlockSpec(memory_space=pltpu.MemorySpace.VMEM)

    y_pred, probabilities, loss = pl.pallas_call(
        _fused_forward_kernel,
        in_specs=[vmem_spec() for _ in operands],
        out_specs=(vmem_spec(), vmem_spec(), vmem_spec()),
        out_shape=(
            jax.ShapeDtypeStruct((B, HIDDEN), jnp.float32),   # y_pred (normalized pooled)
            jax.ShapeDtypeStruct((B, HIDDEN), jnp.float32),   # softmax(y_pred)
            jax.ShapeDtypeStruct((1, 1), jnp.float32),        # loss
        ),
    )(*operands)

    return loss[0, 0], y_pred, probabilities


# ----------------------------------------------------------------------------
# main
# ----------------------------------------------------------------------------
if __name__ == "__main__":
    key = jax.random.PRNGKey(0)
    pkey, dkey = jax.random.split(key)
    params = init_params(pkey)

    k1, k2, k3 = jax.random.split(dkey, 3)
    batch_seqs = jax.random.randint(k1, (BATCH, SEQ), 0, VOCAB, dtype=jnp.int32)
    batch_seq_masks = jnp.ones((BATCH, SEQ), dtype=jnp.float32).at[:, SEQ - 2:].set(
        jax.random.bernoulli(k2, 0.5, (BATCH, 2)).astype(jnp.float32))
    batch_seq_segments = jax.random.randint(k3, (BATCH, SEQ), 0, TYPE_VOCAB,
                                            dtype=jnp.int32)
    labels = jnp.zeros((BATCH,), dtype=jnp.int32)   # unused, kept for interface parity

    loss, logits, probabilities = jax.jit(
        functools.partial(bert_model_test_forward, params)
    )(batch_seqs, batch_seq_masks, batch_seq_segments, labels)

    jax.block_until_ready((loss, logits, probabilities))
    assert logits.shape == (BATCH, HIDDEN)
    assert probabilities.shape == (BATCH, HIDDEN)
    assert bool(jnp.isfinite(loss))
    print("KERNEL_OK")
</pallas_src>

<mosaic_0001>
module attributes {stable_mosaic.version = 11 : i64} {
  func.func @_fused_forward_kernel(%arg0: memref<32x32xf32, #tpu.memory_space<vmem>>, %arg1: memref<4x8xf32, #tpu.memory_space<vmem>>, %arg2: memref<1x32xf32, #tpu.memory_space<vmem>>, %arg3: memref<1x32xf32, #tpu.memory_space<vmem>>, %arg4: memref<2x32x96xf32, #tpu.memory_space<vmem>>, %arg5: memref<2x1x96xf32, #tpu.memory_space<vmem>>, %arg6: memref<2x32x32xf32, #tpu.memory_space<vmem>>, %arg7: memref<2x1x32xf32, #tpu.memory_space<vmem>>, %arg8: memref<2x1x32xf32, #tpu.memory_space<vmem>>, %arg9: memref<2x1x32xf32, #tpu.memory_space<vmem>>, %arg10: memref<2x32x64xf32, #tpu.memory_space<vmem>>, %arg11: memref<2x1x64xf32, #tpu.memory_space<vmem>>, %arg12: memref<2x64x32xf32, #tpu.memory_space<vmem>>, %arg13: memref<2x1x32xf32, #tpu.memory_space<vmem>>, %arg14: memref<2x1x32xf32, #tpu.memory_space<vmem>>, %arg15: memref<2x1x32xf32, #tpu.memory_space<vmem>>, %arg16: memref<32x32xf32, #tpu.memory_space<vmem>>, %arg17: memref<1x32xf32, #tpu.memory_space<vmem>>, %arg18: memref<4x32xf32, #tpu.memory_space<vmem>>, %arg19: memref<4x32xf32, #tpu.memory_space<vmem>>, %arg20: memref<1x1xf32, #tpu.memory_space<vmem>>) attributes {dimension_semantics = [], scalar_prefetch = 0 : i64, scratch_operands = 0 : i64, tpu.core_type = #tpu.core_type<tc>} {
    %c0 = arith.constant 0 : index
    %c0_0 = arith.constant 0 : index
    %0 = vector.load %arg0[%c0, %c0_0] : memref<32x32xf32, #tpu.memory_space<vmem>>, vector<32x32xf32>
    %c0_1 = arith.constant 0 : index
    %c0_2 = arith.constant 0 : index
    %1 = vector.load %arg2[%c0_1, %c0_2] : memref<1x32xf32, #tpu.memory_space<vmem>>, vector<1x32xf32>
    %c0_3 = arith.constant 0 : index
    %c0_4 = arith.constant 0 : index
    %2 = vector.load %arg3[%c0_3, %c0_4] : memref<1x32xf32, #tpu.memory_space<vmem>>, vector<1x32xf32>
    %cst = arith.constant dense<0.000000e+00> : vector<32xf32>
    %3 = vector.multi_reduction <add>, %0, %cst [1] : vector<32x32xf32> to vector<32xf32>
    %4 = vector.shape_cast %3 : vector<32xf32> to vector<32x1xf32>
    %cst_5 = arith.constant 3.200000e+01 : f32
    %5 = vector.broadcast %cst_5 : f32 to vector<32x1xf32>
    %6 = arith.divf %4, %5 : vector<32x1xf32>
    %7 = vector.broadcast %6 : vector<32x1xf32> to vector<32x32xf32>
    %8 = arith.subf %0, %7 : vector<32x32xf32>
    %9 = arith.mulf %8, %8 : vector<32x32xf32>
    %cst_6 = arith.constant dense<0.000000e+00> : vector<32xf32>
    %10 = vector.multi_reduction <add>, %9, %cst_6 [1] : vector<32x32xf32> to vector<32xf32>
    %11 = vector.shape_cast %10 : vector<32xf32> to vector<32x1xf32>
    %cst_7 = arith.constant 3.200000e+01 : f32
    %12 = vector.broadcast %cst_7 : f32 to vector<32x1xf32>
    %13 = arith.divf %11, %12 : vector<32x1xf32>
    %14 = vector.broadcast %6 : vector<32x1xf32> to vector<32x32xf32>
    %15 = arith.subf %0, %14 : vector<32x32xf32>
    %cst_8 = arith.constant 9.99999996E-13 : f32
    %16 = vector.broadcast %cst_8 : f32 to vector<32x1xf32>
    %17 = arith.addf %13, %16 : vector<32x1xf32>
    %18 = math.rsqrt %17 : vector<32x1xf32>
    %19 = vector.broadcast %18 : vector<32x1xf32> to vector<32x32xf32>
    %20 = arith.mulf %15, %19 : vector<32x32xf32>
    %21 = vector.broadcast %1 : vector<1x32xf32> to vector<32x32xf32>
    %22 = arith.mulf %20, %21 : vector<32x32xf32>
    %23 = vector.broadcast %2 : vector<1x32xf32> to vector<32x32xf32>
    %24 = arith.addf %22, %23 : vector<32x32xf32>
    %c0_9 = arith.constant 0 : index
    %c0_10 = arith.constant 0 : index
    %25 = vector.load %arg1[%c0_9, %c0_10] : memref<4x8xf32, #tpu.memory_space<vmem>>, vector<4x8xf32>
    %cst_11 = arith.constant 1.000000e+00 : f32
    %26 = vector.broadcast %cst_11 : f32 to vector<4x8xf32>
    %27 = arith.subf %26, %25 : vector<4x8xf32>
    %cst_12 = arith.constant -1.000000e+04 : f32
    %28 = vector.broadcast %cst_12 : f32 to vector<4x8xf32>
    %29 = arith.mulf %27, %28 : vector<4x8xf32>
    %30 = vector.shape_cast %29 : vector<4x8xf32> to vector<4x1x8xf32>
    %c0_13 = arith.constant 0 : index
    %c0_14 = arith.constant 0 : index
    %c0_15 = arith.constant 0 : index
    %31 = vector.load %arg4[%c0_13, %c0_14, %c0_15] : memref<2x32x96xf32, #tpu.memory_space<vmem>>, vector<1x32x96xf32>
    %32 = vector.shape_cast %31 : vector<1x32x96xf32> to vector<32x96xf32>
    %cst_16 = arith.constant dense<0.000000e+00> : vector<32x96xf32>
    %33 = tpu.matmul %24, %32, %cst_16 {dimension_numbers = #tpu.dot_dimension_numbers<[1], [0], [0], [1], [0, 0, 1, 1], [], []>} : vector<32x32xf32>, vector<32x96xf32>, vector<32x96xf32> -> vector<32x96xf32>
    %c0_17 = arith.constant 0 : index
    %c0_18 = arith.constant 0 : index
    %c0_19 = arith.constant 0 : index
    %34 = vector.load %arg5[%c0_17, %c0_18, %c0_19] : memref<2x1x96xf32, #tpu.memory_space<vmem>>, vector<1x1x96xf32>
    %35 = vector.shape_cast %34 : vector<1x1x96xf32> to vector<1x96xf32>
    %36 = vector.broadcast %35 : vector<1x96xf32> to vector<32x96xf32>
    %37 = arith.addf %33, %36 : vector<32x96xf32>
    %38 = vector.extract_strided_slice %37 {offsets = [0, 0], sizes = [32, 32], strides = [1, 1]} : vector<32x96xf32> to vector<32x32xf32>
    %39 = vector.shape_cast %38 : vector<32x32xf32> to vector<4x8x32xf32>
    %40 = vector.extract_strided_slice %37 {offsets = [0, 32], sizes = [32, 32], strides = [1, 1]} : vector<32x96xf32> to vector<32x32xf32>
    %41 = vector.shape_cast %40 : vector<32x32xf32> to vector<4x8x32xf32>
    %42 = vector.extract_strided_slice %37 {offsets = [0, 64], sizes = [32, 32], strides = [1, 1]} : vector<32x96xf32> to vector<32x32xf32>
    %43 = vector.shape_cast %42 : vector<32x32xf32> to vector<4x8x32xf32>
    %44 = vector.extract_strided_slice %39 {offsets = [0, 0, 0], sizes = [4, 8, 8], strides = [1, 1, 1]} : vector<4x8x32xf32> to vector<4x8x8xf32>
    %45 = vector.extract_strided_slice %41 {offsets = [0, 0, 0], sizes = [4, 8, 8], strides = [1, 1, 1]} : vector<4x8x32xf32> to vector<4x8x8xf32>
    %46 = vector.extract_strided_slice %43 {offsets = [0, 0, 0], sizes = [4, 8, 8], strides = [1, 1, 1]} : vector<4x8x32xf32> to vector<4x8x8xf32>
    "tpu.trace_start"() <{level = 10 : i32, message = "bqd,bkd->bqk"}> : () -> ()
    %cst_20 = arith.constant dense<0.000000e+00> : vector<4x8x8xf32>
    %47 = tpu.matmul %44, %45, %cst_20 {dimension_numbers = #tpu.dot_dimension_numbers<[2], [2], [1], [1], [0, 0, 0, 1, 1, 1], [0], [0]>} : vector<4x8x8xf32>, vector<4x8x8xf32>, vector<4x8x8xf32> -> vector<4x8x8xf32>
    "tpu.trace_stop"() : () -> ()
    %cst_21 = arith.constant 0.353553385 : f32
    %48 = vector.broadcast %cst_21 : f32 to vector<4x8x8xf32>
    %49 = arith.mulf %47, %48 : vector<4x8x8xf32>
    %50 = vector.broadcast %30 : vector<4x1x8xf32> to vector<4x8x8xf32>
    %51 = arith.addf %49, %50 : vector<4x8x8xf32>
    %cst_22 = arith.constant dense<0xFF800000> : vector<4x8xf32>
    %52 = vector.multi_reduction <maximumf>, %51, %cst_22 [2] : vector<4x8x8xf32> to vector<4x8xf32>
    %53 = vector.shape_cast %52 : vector<4x8xf32> to vector<4x8x1xf32>
    %54 = vector.broadcast %53 : vector<4x8x1xf32> to vector<4x8x8xf32>
    %55 = arith.subf %51, %54 : vector<4x8x8xf32>
    %56 = math.exp %55 : vector<4x8x8xf32>
    %cst_23 = arith.constant dense<0.000000e+00> : vector<4x8xf32>
    %57 = vector.multi_reduction <add>, %56, %cst_23 [2] : vector<4x8x8xf32> to vector<4x8xf32>
    %58 = vector.shape_cast %57 : vector<4x8xf32> to vector<4x8x1xf32>
    %59 = tpu.reciprocal %58 {approx = true} : vector<4x8x1xf32> -> vector<4x8x1xf32>
    %60 = vector.broadcast %59 : vector<4x8x1xf32> to vector<4x8x8xf32>
    %61 = arith.mulf %56, %60 : vector<4x8x8xf32>
    "tpu.trace_start"() <{level = 10 : i32, message = "bqk,bkd->bqd"}> : () -> ()
    %cst_24 = arith.constant dense<0.000000e+00> : vector<4x8x8xf32>
    %62 = tpu.matmul %61, %46, %cst_24 {dimension_numbers = #tpu.dot_dimension_numbers<[2], [1], [1], [2], [0, 0, 0, 1, 1, 2], [0], [0]>} : vector<4x8x8xf32>, vector<4x8x8xf32>, vector<4x8x8xf32> -> vector<4x8x8xf32>
    "tpu.trace_stop"() : () -> ()
    %63 = vector.extract_strided_slice %39 {offsets = [0, 0, 8], sizes = [4, 8, 8], strides = [1, 1, 1]} : vector<4x8x32xf32> to vector<4x8x8xf32>
    %64 = vector.extract_strided_slice %41 {offsets = [0, 0, 8], sizes = [4, 8, 8], strides = [1, 1, 1]} : vector<4x8x32xf32> to vector<4x8x8xf32>
    %65 = vector.extract_strided_slice %43 {offsets = [0, 0, 8], sizes = [4, 8, 8], strides = [1, 1, 1]} : vector<4x8x32xf32> to vector<4x8x8xf32>
    "tpu.trace_start"() <{level = 10 : i32, message = "bqd,bkd->bqk"}> : () -> ()
    %cst_25 = arith.constant dense<0.000000e+00> : vector<4x8x8xf32>
    %66 = tpu.matmul %63, %64, %cst_25 {dimension_numbers = #tpu.dot_dimension_numbers<[2], [2], [1], [1], [0, 0, 0, 1, 1, 1], [0], [0]>} : vector<4x8x8xf32>, vector<4x8x8xf32>, vector<4x8x8xf32> -> vector<4x8x8xf32>
    "tpu.trace_stop"() : () -> ()
    %cst_26 = arith.constant 0.353553385 : f32
    %67 = vector.broadcast %cst_26 : f32 to vector<4x8x8xf32>
    %68 = arith.mulf %66, %67 : vector<4x8x8xf32>
    %69 = vector.broadcast %30 : vector<4x1x8xf32> to vector<4x8x8xf32>
    %70 = arith.addf %68, %69 : vector<4x8x8xf32>
    %cst_27 = arith.constant dense<0xFF800000> : vector<4x8xf32>
    %71 = vector.multi_reduction <maximumf>, %70, %cst_27 [2] : vector<4x8x8xf32> to vector<4x8xf32>
    %72 = vector.shape_cast %71 : vector<4x8xf32> to vector<4x8x1xf32>
    %73 = vector.broadcast %72 : vector<4x8x1xf32> to vector<4x8x8xf32>
    %74 = arith.subf %70, %73 : vector<4x8x8xf32>
    %75 = math.exp %74 : vector<4x8x8xf32>
    %cst_28 = arith.constant dense<0.000000e+00> : vector<4x8xf32>
    %76 = vector.multi_reduction <add>, %75, %cst_28 [2] : vector<4x8x8xf32> to vector<4x8xf32>
    %77 = vector.shape_cast %76 : vector<4x8xf32> to vector<4x8x1xf32>
    %78 = tpu.reciprocal %77 {approx = true} : vector<4x8x1xf32> -> vector<4x8x1xf32>
    %79 = vector.broadcast %78 : vector<4x8x1xf32> to vector<4x8x8xf32>
    %80 = arith.mulf %75, %79 : vector<4x8x8xf32>
    "tpu.trace_start"() <{level = 10 : i32, message = "bqk,bkd->bqd"}> : () -> ()
    %cst_29 = arith.constant dense<0.000000e+00> : vector<4x8x8xf32>
    %81 = tpu.matmul %80, %65, %cst_29 {dimension_numbers = #tpu.dot_dimension_numbers<[2], [1], [1], [2], [0, 0, 0, 1, 1, 2], [0], [0]>} : vector<4x8x8xf32>, vector<4x8x8xf32>, vector<4x8x8xf32> -> vector<4x8x8xf32>
    "tpu.trace_stop"() : () -> ()
    %82 = vector.extract_strided_slice %39 {offsets = [0, 0, 16], sizes = [4, 8, 8], strides = [1, 1, 1]} : vector<4x8x32xf32> to vector<4x8x8xf32>
    %83 = vector.extract_strided_slice %41 {offsets = [0, 0, 16], sizes = [4, 8, 8], strides = [1, 1, 1]} : vector<4x8x32xf32> to vector<4x8x8xf32>
    %84 = vector.extract_strided_slice %43 {offsets = [0, 0, 16], sizes = [4, 8, 8], strides = [1, 1, 1]} : vector<4x8x32xf32> to vector<4x8x8xf32>
    "tpu.trace_start"() <{level = 10 : i32, message = "bqd,bkd->bqk"}> : () -> ()
    %cst_30 = arith.constant dense<0.000000e+00> : vector<4x8x8xf32>
    %85 = tpu.matmul %82, %83, %cst_30 {dimension_numbers = #tpu.dot_dimension_numbers<[2], [2], [1], [1], [0, 0, 0, 1, 1, 1], [0], [0]>} : vector<4x8x8xf32>, vector<4x8x8xf32>, vector<4x8x8xf32> -> vector<4x8x8xf32>
    "tpu.trace_stop"() : () -> ()
    %cst_31 = arith.constant 0.353553385 : f32
    %86 = vector.broadcast %cst_31 : f32 to vector<4x8x8xf32>
    %87 = arith.mulf %85, %86 : vector<4x8x8xf32>
    %88 = vector.broadcast %30 : vector<4x1x8xf32> to vector<4x8x8xf32>
    %89 = arith.addf %87, %88 : vector<4x8x8xf32>
    %cst_32 = arith.constant dense<0xFF800000> : vector<4x8xf32>
    %90 = vector.multi_reduction <maximumf>, %89, %cst_32 [2] : vector<4x8x8xf32> to vector<4x8xf32>
    %91 = vector.shape_cast %90 : vector<4x8xf32> to vector<4x8x1xf32>
    %92 = vector.broadcast %91 : vector<4x8x1xf32> to vector<4x8x8xf32>
    %93 = arith.subf %89, %92 : vector<4x8x8xf32>
    %94 = math.exp %93 : vector<4x8x8xf32>
    %cst_33 = arith.constant dense<0.000000e+00> : vector<4x8xf32>
    %95 = vector.multi_reduction <add>, %94, %cst_33 [2] : vector<4x8x8xf32> to vector<4x8xf32>
    %96 = vector.shape_cast %95 : vector<4x8xf32> to vector<4x8x1xf32>
    %97 = tpu.reciprocal %96 {approx = true} : vector<4x8x1xf32> -> vector<4x8x1xf32>
    %98 = vector.broadcast %97 : vector<4x8x1xf32> to vector<4x8x8xf32>
    %99 = arith.mulf %94, %98 : vector<4x8x8xf32>
    "tpu.trace_start"() <{level = 10 : i32, message = "bqk,bkd->bqd"}> : () -> ()
    %cst_34 = arith.constant dense<0.000000e+00> : vector<4x8x8xf32>
    %100 = tpu.matmul %99, %84, %cst_34 {dimension_numbers = #tpu.dot_dimension_numbers<[2], [1], [1], [2], [0, 0, 0, 1, 1, 2], [0], [0]>} : vector<4x8x8xf32>, vector<4x8x8xf32>, vector<4x8x8xf32> -> vector<4x8x8xf32>
    "tpu.trace_stop"() : () -> ()
    %101 = vector.extract_strided_slice %39 {offsets = [0, 0, 24], sizes = [4, 8, 8], strides = [1, 1, 1]} : vector<4x8x32xf32> to vector<4x8x8xf32>
    %102 = vector.extract_strided_slice %41 {offsets = [0, 0, 24], sizes = [4, 8, 8], strides = [1, 1, 1]} : vector<4x8x32xf32> to vector<4x8x8xf32>
    %103 = vector.extract_strided_slice %43 {offsets = [0, 0, 24], sizes = [4, 8, 8], strides = [1, 1, 1]} : vector<4x8x32xf32> to vector<4x8x8xf32>
    "tpu.trace_start"() <{level = 10 : i32, message = "bqd,bkd->bqk"}> : () -> ()
    %cst_35 = arith.constant dense<0.000000e+00> : vector<4x8x8xf32>
    %104 = tpu.matmul %101, %102, %cst_35 {dimension_numbers = #tpu.dot_dimension_numbers<[2], [2], [1], [1], [0, 0, 0, 1, 1, 1], [0], [0]>} : vector<4x8x8xf32>, vector<4x8x8xf32>, vector<4x8x8xf32> -> vector<4x8x8xf32>
    "tpu.trace_stop"() : () -> ()
    %cst_36 = arith.constant 0.353553385 : f32
    %105 = vector.broadcast %cst_36 : f32 to vector<4x8x8xf32>
    %106 = arith.mulf %104, %105 : vector<4x8x8xf32>
    %107 = vector.broadcast %30 : vector<4x1x8xf32> to vector<4x8x8xf32>
    %108 = arith.addf %106, %107 : vector<4x8x8xf32>
    %cst_37 = arith.constant dense<0xFF800000> : vector<4x8xf32>
    %109 = vector.multi_reduction <maximumf>, %108, %cst_37 [2] : vector<4x8x8xf32> to vector<4x8xf32>
    %110 = vector.shape_cast %109 : vector<4x8xf32> to vector<4x8x1xf32>
    %111 = vector.broadcast %110 : vector<4x8x1xf32> to vector<4x8x8xf32>
    %112 = arith.subf %108, %111 : vector<4x8x8xf32>
    %113 = math.exp %112 : vector<4x8x8xf32>
    %cst_38 = arith.constant dense<0.000000e+00> : vector<4x8xf32>
    %114 = vector.multi_reduction <add>, %113, %cst_38 [2] : vector<4x8x8xf32> to vector<4x8xf32>
    %115 = vector.shape_cast %114 : vector<4x8xf32> to vector<4x8x1xf32>
    %116 = tpu.reciprocal %115 {approx = true} : vector<4x8x1xf32> -> vector<4x8x1xf32>
    %117 = vector.broadcast %116 : vector<4x8x1xf32> to vector<4x8x8xf32>
    %118 = arith.mulf %113, %117 : vector<4x8x8xf32>
    "tpu.trace_start"() <{level = 10 : i32, message = "bqk,bkd->bqd"}> : () -> ()
    %cst_39 = arith.constant dense<0.000000e+00> : vector<4x8x8xf32>
    %119 = tpu.matmul %118, %103, %cst_39 {dimension_numbers = #tpu.dot_dimension_numbers<[2], [1], [1], [2], [0, 0, 0, 1, 1, 2], [0], [0]>} : vector<4x8x8xf32>, vector<4x8x8xf32>, vector<4x8x8xf32> -> vector<4x8x8xf32>
    "tpu.trace_stop"() : () -> ()
    %120 = tpu.concatenate %62, %81, %100, %119 in 2 : vector<4x8x8xf32>, vector<4x8x8xf32>, vector<4x8x8xf32>, vector<4x8x8xf32> -> vector<4x8x32xf32>
    %121 = vector.shape_cast %120 : vector<4x8x32xf32> to vector<32x32xf32>
    %c0_40 = arith.constant 0 : index
    %c0_41 = arith.constant 0 : index
    %c0_42 = arith.constant 0 : index
    %122 = vector.load %arg6[%c0_40, %c0_41, %c0_42] : memref<2x32x32xf32, #tpu.memory_space<vmem>>, vector<1x32x32xf32>
    %123 = vector.shape_cast %122 : vector<1x32x32xf32> to vector<32x32xf32>
    %cst_43 = arith.constant dense<0.000000e+00> : vector<32x32xf32>
    %124 = tpu.matmul %121, %123, %cst_43 {dimension_numbers = #tpu.dot_dimension_numbers<[1], [0], [0], [1], [0, 0, 1, 1], [], []>} : vector<32x32xf32>, vector<32x32xf32>, vector<32x32xf32> -> vector<32x32xf32>
    %c0_44 = arith.constant 0 : index
    %c0_45 = arith.constant 0 : index
    %c0_46 = arith.constant 0 : index
    %125 = vector.load %arg7[%c0_44, %c0_45, %c0_46] : memref<2x1x32xf32, #tpu.memory_space<vmem>>, vector<1x1x32xf32>
    %126 = vector.shape_cast %125 : vector<1x1x32xf32> to vector<1x32xf32>
    %127 = vector.broadcast %126 : vector<1x32xf32> to vector<32x32xf32>
    %128 = arith.addf %124, %127 : vector<32x32xf32>
    %129 = arith.addf %128, %24 : vector<32x32xf32>
    %c0_47 = arith.constant 0 : index
    %c0_48 = arith.constant 0 : index
    %c0_49 = arith.constant 0 : index
    %130 = vector.load %arg8[%c0_47, %c0_48, %c0_49] : memref<2x1x32xf32, #tpu.memory_space<vmem>>, vector<1x1x32xf32>
    %131 = vector.shape_cast %130 : vector<1x1x32xf32> to vector<1x32xf32>
    %c0_50 = arith.constant 0 : index
    %c0_51 = arith.constant 0 : index
    %c0_52 = arith.constant 0 : index
    %132 = vector.load %arg9[%c0_50, %c0_51, %c0_52] : memref<2x1x32xf32, #tpu.memory_space<vmem>>, vector<1x1x32xf32>
    %133 = vector.shape_cast %132 : vector<1x1x32xf32> to vector<1x32xf32>
    %cst_53 = arith.constant dense<0.000000e+00> : vector<32xf32>
    %134 = vector.multi_reduction <add>, %129, %cst_53 [1] : vector<32x32xf32> to vector<32xf32>
    %135 = vector.shape_cast %134 : vector<32xf32> to vector<32x1xf32>
    %cst_54 = arith.constant 3.200000e+01 : f32
    %136 = vector.broadcast %cst_54 : f32 to vector<32x1xf32>
    %137 = arith.divf %135, %136 : vector<32x1xf32>
    %138 = vector.broadcast %137 : vector<32x1xf32> to vector<32x32xf32>
    %139 = arith.subf %129, %138 : vector<32x32xf32>
    %140 = arith.mulf %139, %139 : vector<32x32xf32>
    %cst_55 = arith.constant dense<0.000000e+00> : vector<32xf32>
    %141 = vector.multi_reduction <add>, %140, %cst_55 [1] : vector<32x32xf32> to vector<32xf32>
    %142 = vector.shape_cast %141 : vector<32xf32> to vector<32x1xf32>
    %cst_56 = arith.constant 3.200000e+01 : f32
    %143 = vector.broadcast %cst_56 : f32 to vector<32x1xf32>
    %144 = arith.divf %142, %143 : vector<32x1xf32>
    %145 = vector.broadcast %137 : vector<32x1xf32> to vector<32x32xf32>
    %146 = arith.subf %129, %145 : vector<32x32xf32>
    %cst_57 = arith.constant 9.99999996E-13 : f32
    %147 = vector.broadcast %cst_57 : f32 to vector<32x1xf32>
    %148 = arith.addf %144, %147 : vector<32x1xf32>
    %149 = math.rsqrt %148 : vector<32x1xf32>
    %150 = vector.broadcast %149 : vector<32x1xf32> to vector<32x32xf32>
    %151 = arith.mulf %146, %150 : vector<32x32xf32>
    %152 = vector.broadcast %131 : vector<1x32xf32> to vector<32x32xf32>
    %153 = arith.mulf %151, %152 : vector<32x32xf32>
    %154 = vector.broadcast %133 : vector<1x32xf32> to vector<32x32xf32>
    %155 = arith.addf %153, %154 : vector<32x32xf32>
    %c0_58 = arith.constant 0 : index
    %c0_59 = arith.constant 0 : index
    %c0_60 = arith.constant 0 : index
    %156 = vector.load %arg10[%c0_58, %c0_59, %c0_60] : memref<2x32x64xf32, #tpu.memory_space<vmem>>, vector<1x32x64xf32>
    %157 = vector.shape_cast %156 : vector<1x32x64xf32> to vector<32x64xf32>
    %cst_61 = arith.constant dense<0.000000e+00> : vector<32x64xf32>
    %158 = tpu.matmul %155, %157, %cst_61 {dimension_numbers = #tpu.dot_dimension_numbers<[1], [0], [0], [1], [0, 0, 1, 1], [], []>} : vector<32x32xf32>, vector<32x64xf32>, vector<32x64xf32> -> vector<32x64xf32>
    %c0_62 = arith.constant 0 : index
    %c0_63 = arith.constant 0 : index
    %c0_64 = arith.constant 0 : index
    %159 = vector.load %arg11[%c0_62, %c0_63, %c0_64] : memref<2x1x64xf32, #tpu.memory_space<vmem>>, vector<1x1x64xf32>
    %160 = vector.shape_cast %159 : vector<1x1x64xf32> to vector<1x64xf32>
    %161 = vector.broadcast %160 : vector<1x64xf32> to vector<32x64xf32>
    %162 = arith.addf %158, %161 : vector<32x64xf32>
    %cst_65 = arith.constant 5.000000e-01 : f32
    %163 = vector.broadcast %cst_65 : f32 to vector<32x64xf32>
    %164 = arith.mulf %163, %162 : vector<32x64xf32>
    %cst_66 = arith.constant 0.707106769 : f32
    %165 = vector.broadcast %cst_66 : f32 to vector<32x64xf32>
    %166 = arith.mulf %162, %165 : vector<32x64xf32>
    %167 = math.absf %166 : vector<32x64xf32>
    %cst_67 = arith.constant 0.327591091 : f32
    %168 = vector.broadcast %cst_67 : f32 to vector<32x64xf32>
    %169 = arith.mulf %168, %167 : vector<32x64xf32>
    %cst_68 = arith.constant 1.000000e+00 : f32
    %170 = vector.broadcast %cst_68 : f32 to vector<32x64xf32>
    %171 = arith.addf %170, %169 : vector<32x64xf32>
    %cst_69 = arith.constant 1.000000e+00 : f32
    %172 = vector.broadcast %cst_69 : f32 to vector<32x64xf32>
    %173 = arith.divf %172, %171 : vector<32x64xf32>
    %cst_70 = arith.constant 1.06140542 : f32
    %174 = vector.broadcast %cst_70 : f32 to vector<32x64xf32>
    %175 = arith.mulf %174, %173 : vector<32x64xf32>
    %cst_71 = arith.constant -1.45315206 : f32
    %176 = vector.broadcast %cst_71 : f32 to vector<32x64xf32>
    %177 = arith.addf %175, %176 : vector<32x64xf32>
    %178 = arith.mulf %177, %173 : vector<32x64xf32>
    %cst_72 = arith.constant 1.42141378 : f32
    %179 = vector.broadcast %cst_72 : f32 to vector<32x64xf32>
    %180 = arith.addf %178, %179 : vector<32x64xf32>
    %181 = arith.mulf %180, %173 : vector<32x64xf32>
    %cst_73 = arith.constant -0.284496725 : f32
    %182 = vector.broadcast %cst_73 : f32 to vector<32x64xf32>
    %183 = arith.addf %181, %182 : vector<32x64xf32>
    %184 = arith.mulf %183, %173 : vector<32x64xf32>
    %cst_74 = arith.constant 0.254829586 : f32
    %185 = vector.broadcast %cst_74 : f32 to vector<32x64xf32>
    %186 = arith.addf %184, %185 : vector<32x64xf32>
    %187 = arith.mulf %186, %173 : vector<32x64xf32>
    %cst_75 = arith.constant 0.000000e+00 : f32
    %188 = vector.broadcast %cst_75 : f32 to vector<32x64xf32>
    %189 = arith.subf %188, %167 : vector<32x64xf32>
    %190 = arith.mulf %189, %167 : vector<32x64xf32>
    %191 = math.exp %190 : vector<32x64xf32>
    %192 = arith.mulf %187, %191 : vector<32x64xf32>
    %cst_76 = arith.constant 1.000000e+00 : f32
    %193 = vector.broadcast %cst_76 : f32 to vector<32x64xf32>
    %194 = arith.subf %193, %192 : vector<32x64xf32>
    %cst_77 = arith.constant 0.000000e+00 : f32
    %195 = vector.broadcast %cst_77 : f32 to vector<32x64xf32>
    %196 = arith.cmpf oge, %166, %195 : vector<32x64xf32>
    %cst_78 = arith.constant 0.000000e+00 : f32
    %197 = vector.broadcast %cst_78 : f32 to vector<32x64xf32>
    %198 = arith.subf %197, %194 : vector<32x64xf32>
    %199 = arith.select %196, %194, %198 : vector<32x64xi1>, vector<32x64xf32>
    %cst_79 = arith.constant 1.000000e+00 : f32
    %200 = vector.broadcast %cst_79 : f32 to vector<32x64xf32>
    %201 = arith.addf %200, %199 : vector<32x64xf32>
    %202 = arith.mulf %164, %201 : vector<32x64xf32>
    %c0_80 = arith.constant 0 : index
    %c0_81 = arith.constant 0 : index
    %c0_82 = arith.constant 0 : index
    %203 = vector.load %arg12[%c0_80, %c0_81, %c0_82] : memref<2x64x32xf32, #tpu.memory_space<vmem>>, vector<1x64x32xf32>
    %204 = vector.shape_cast %203 : vector<1x64x32xf32> to vector<64x32xf32>
    %cst_83 = arith.constant dense<0.000000e+00> : vector<32x32xf32>
    %205 = tpu.matmul %202, %204, %cst_83 {dimension_numbers = #tpu.dot_dimension_numbers<[1], [0], [0], [1], [0, 0, 1, 1], [], []>} : vector<32x64xf32>, vector<64x32xf32>, vector<32x32xf32> -> vector<32x32xf32>
    %c0_84 = arith.constant 0 : index
    %c0_85 = arith.constant 0 : index
    %c0_86 = arith.constant 0 : index
    %206 = vector.load %arg13[%c0_84, %c0_85, %c0_86] : memref<2x1x32xf32, #tpu.memory_space<vmem>>, vector<1x1x32xf32>
    %207 = vector.shape_cast %206 : vector<1x1x32xf32> to vector<1x32xf32>
    %208 = vector.broadcast %207 : vector<1x32xf32> to vector<32x32xf32>
    %209 = arith.addf %205, %208 : vector<32x32xf32>
    %210 = arith.addf %209, %155 : vector<32x32xf32>
    %c0_87 = arith.constant 0 : index
    %c0_88 = arith.constant 0 : index
    %c0_89 = arith.constant 0 : index
    %211 = vector.load %arg14[%c0_87, %c0_88, %c0_89] : memref<2x1x32xf32, #tpu.memory_space<vmem>>, vector<1x1x32xf32>
    %212 = vector.shape_cast %211 : vector<1x1x32xf32> to vector<1x32xf32>
    %c0_90 = arith.constant 0 : index
    %c0_91 = arith.constant 0 : index
    %c0_92 = arith.constant 0 : index
    %213 = vector.load %arg15[%c0_90, %c0_91, %c0_92] : memref<2x1x32xf32, #tpu.memory_space<vmem>>, vector<1x1x32xf32>
    %214 = vector.shape_cast %213 : vector<1x1x32xf32> to vector<1x32xf32>
    %cst_93 = arith.constant dense<0.000000e+00> : vector<32xf32>
    %215 = vector.multi_reduction <add>, %210, %cst_93 [1] : vector<32x32xf32> to vector<32xf32>
    %216 = vector.shape_cast %215 : vector<32xf32> to vector<32x1xf32>
    %cst_94 = arith.constant 3.200000e+01 : f32
    %217 = vector.broadcast %cst_94 : f32 to vector<32x1xf32>
    %218 = arith.divf %216, %217 : vector<32x1xf32>
    %219 = vector.broadcast %218 : vector<32x1xf32> to vector<32x32xf32>
    %220 = arith.subf %210, %219 : vector<32x32xf32>
    %221 = arith.mulf %220, %220 : vector<32x32xf32>
    %cst_95 = arith.constant dense<0.000000e+00> : vector<32xf32>
    %222 = vector.multi_reduction <add>, %221, %cst_95 [1] : vector<32x32xf32> to vector<32xf32>
    %223 = vector.shape_cast %222 : vector<32xf32> to vector<32x1xf32>
    %cst_96 = arith.constant 3.200000e+01 : f32
    %224 = vector.broadcast %cst_96 : f32 to vector<32x1xf32>
    %225 = arith.divf %223, %224 : vector<32x1xf32>
    %226 = vector.broadcast %218 : vector<32x1xf32> to vector<32x32xf32>
    %227 = arith.subf %210, %226 : vector<32x32xf32>
    %cst_97 = arith.constant 9.99999996E-13 : f32
    %228 = vector.broadcast %cst_97 : f32 to vector<32x1xf32>
    %229 = arith.addf %225, %228 : vector<32x1xf32>
    %230 = math.rsqrt %229 : vector<32x1xf32>
    %231 = vector.broadcast %230 : vector<32x1xf32> to vector<32x32xf32>
    %232 = arith.mulf %227, %231 : vector<32x32xf32>
    %233 = vector.broadcast %212 : vector<1x32xf32> to vector<32x32xf32>
    %234 = arith.mulf %232, %233 : vector<32x32xf32>
    %235 = vector.broadcast %214 : vector<1x32xf32> to vector<32x32xf32>
    %236 = arith.addf %234, %235 : vector<32x32xf32>
    %c1 = arith.constant 1 : index
    %c0_98 = arith.constant 0 : index
    %c0_99 = arith.constant 0 : index
    %237 = vector.load %arg4[%c1, %c0_98, %c0_99] : memref<2x32x96xf32, #tpu.memory_space<vmem>>, vector<1x32x96xf32>
    %238 = vector.shape_cast %237 : vector<1x32x96xf32> to vector<32x96xf32>
    %cst_100 = arith.constant dense<0.000000e+00> : vector<32x96xf32>
    %239 = tpu.matmul %236, %238, %cst_100 {dimension_numbers = #tpu.dot_dimension_numbers<[1], [0], [0], [1], [0, 0, 1, 1], [], []>} : vector<32x32xf32>, vector<32x96xf32>, vector<32x96xf32> -> vector<32x96xf32>
    %c1_101 = arith.constant 1 : index
    %c0_102 = arith.constant 0 : index
    %c0_103 = arith.constant 0 : index
    %240 = vector.load %arg5[%c1_101, %c0_102, %c0_103] : memref<2x1x96xf32, #tpu.memory_space<vmem>>, vector<1x1x96xf32>
    %241 = vector.shape_cast %240 : vector<1x1x96xf32> to vector<1x96xf32>
    %242 = vector.broadcast %241 : vector<1x96xf32> to vector<32x96xf32>
    %243 = arith.addf %239, %242 : vector<32x96xf32>
    %244 = vector.extract_strided_slice %243 {offsets = [0, 0], sizes = [32, 32], strides = [1, 1]} : vector<32x96xf32> to vector<32x32xf32>
    %245 = vector.shape_cast %244 : vector<32x32xf32> to vector<4x8x32xf32>
    %246 = vector.extract_strided_slice %243 {offsets = [0, 32], sizes = [32, 32], strides = [1, 1]} : vector<32x96xf32> to vector<32x32xf32>
    %247 = vector.shape_cast %246 : vector<32x32xf32> to vector<4x8x32xf32>
    %248 = vector.extract_strided_slice %243 {offsets = [0, 64], sizes = [32, 32], strides = [1, 1]} : vector<32x96xf32> to vector<32x32xf32>
    %249 = vector.shape_cast %248 : vector<32x32xf32> to vector<4x8x32xf32>
    %250 = vector.extract_strided_slice %245 {offsets = [0, 0, 0], sizes = [4, 8, 8], strides = [1, 1, 1]} : vector<4x8x32xf32> to vector<4x8x8xf32>
    %251 = vector.extract_strided_slice %247 {offsets = [0, 0, 0], sizes = [4, 8, 8], strides = [1, 1, 1]} : vector<4x8x32xf32> to vector<4x8x8xf32>
    %252 = vector.extract_strided_slice %249 {offsets = [0, 0, 0], sizes = [4, 8, 8], strides = [1, 1, 1]} : vector<4x8x32xf32> to vector<4x8x8xf32>
    "tpu.trace_start"() <{level = 10 : i32, message = "bqd,bkd->bqk"}> : () -> ()
    %cst_104 = arith.constant dense<0.000000e+00> : vector<4x8x8xf32>
    %253 = tpu.matmul %250, %251, %cst_104 {dimension_numbers = #tpu.dot_dimension_numbers<[2], [2], [1], [1], [0, 0, 0, 1, 1, 1], [0], [0]>} : vector<4x8x8xf32>, vector<4x8x8xf32>, vector<4x8x8xf32> -> vector<4x8x8xf32>
    "tpu.trace_stop"() : () -> ()
    %cst_105 = arith.constant 0.353553385 : f32
    %254 = vector.broadcast %cst_105 : f32 to vector<4x8x8xf32>
    %255 = arith.mulf %253, %254 : vector<4x8x8xf32>
    %256 = vector.broadcast %30 : vector<4x1x8xf32> to vector<4x8x8xf32>
    %257 = arith.addf %255, %256 : vector<4x8x8xf32>
    %cst_106 = arith.constant dense<0xFF800000> : vector<4x8xf32>
    %258 = vector.multi_reduction <maximumf>, %257, %cst_106 [2] : vector<4x8x8xf32> to vector<4x8xf32>
    %259 = vector.shape_cast %258 : vector<4x8xf32> to vector<4x8x1xf32>
    %260 = vector.broadcast %259 : vector<4x8x1xf32> to vector<4x8x8xf32>
    %261 = arith.subf %257, %260 : vector<4x8x8xf32>
    %262 = math.exp %261 : vector<4x8x8xf32>
    %cst_107 = arith.constant dense<0.000000e+00> : vector<4x8xf32>
    %263 = vector.multi_reduction <add>, %262, %cst_107 [2] : vector<4x8x8xf32> to vector<4x8xf32>
    %264 = vector.shape_cast %263 : vector<4x8xf32> to vector<4x8x1xf32>
    %265 = tpu.reciprocal %264 {approx = true} : vector<4x8x1xf32> -> vector<4x8x1xf32>
    %266 = vector.broadcast %265 : vector<4x8x1xf32> to vector<4x8x8xf32>
    %267 = arith.mulf %262, %266 : vector<4x8x8xf32>
    "tpu.trace_start"() <{level = 10 : i32, message = "bqk,bkd->bqd"}> : () -> ()
    %cst_108 = arith.constant dense<0.000000e+00> : vector<4x8x8xf32>
    %268 = tpu.matmul %267, %252, %cst_108 {dimension_numbers = #tpu.dot_dimension_numbers<[2], [1], [1], [2], [0, 0, 0, 1, 1, 2], [0], [0]>} : vector<4x8x8xf32>, vector<4x8x8xf32>, vector<4x8x8xf32> -> vector<4x8x8xf32>
    "tpu.trace_stop"() : () -> ()
    %269 = vector.extract_strided_slice %245 {offsets = [0, 0, 8], sizes = [4, 8, 8], strides = [1, 1, 1]} : vector<4x8x32xf32> to vector<4x8x8xf32>
    %270 = vector.extract_strided_slice %247 {offsets = [0, 0, 8], sizes = [4, 8, 8], strides = [1, 1, 1]} : vector<4x8x32xf32> to vector<4x8x8xf32>
    %271 = vector.extract_strided_slice %249 {offsets = [0, 0, 8], sizes = [4, 8, 8], strides = [1, 1, 1]} : vector<4x8x32xf32> to vector<4x8x8xf32>
    "tpu.trace_start"() <{level = 10 : i32, message = "bqd,bkd->bqk"}> : () -> ()
    %cst_109 = arith.constant dense<0.000000e+00> : vector<4x8x8xf32>
    %272 = tpu.matmul %269, %270, %cst_109 {dimension_numbers = #tpu.dot_dimension_numbers<[2], [2], [1], [1], [0, 0, 0, 1, 1, 1], [0], [0]>} : vector<4x8x8xf32>, vector<4x8x8xf32>, vector<4x8x8xf32> -> vector<4x8x8xf32>
    "tpu.trace_stop"() : () -> ()
    %cst_110 = arith.constant 0.353553385 : f32
    %273 = vector.broadcast %cst_110 : f32 to vector<4x8x8xf32>
    %274 = arith.mulf %272, %273 : vector<4x8x8xf32>
    %275 = vector.broadcast %30 : vector<4x1x8xf32> to vector<4x8x8xf32>
    %276 = arith.addf %274, %275 : vector<4x8x8xf32>
    %cst_111 = arith.constant dense<0xFF800000> : vector<4x8xf32>
    %277 = vector.multi_reduction <maximumf>, %276, %cst_111 [2] : vector<4x8x8xf32> to vector<4x8xf32>
    %278 = vector.shape_cast %277 : vector<4x8xf32> to vector<4x8x1xf32>
    %279 = vector.broadcast %278 : vector<4x8x1xf32> to vector<4x8x8xf32>
    %280 = arith.subf %276, %279 : vector<4x8x8xf32>
    %281 = math.exp %280 : vector<4x8x8xf32>
    %cst_112 = arith.constant dense<0.000000e+00> : vector<4x8xf32>
    %282 = vector.multi_reduction <add>, %281, %cst_112 [2] : vector<4x8x8xf32> to vector<4x8xf32>
    %283 = vector.shape_cast %282 : vector<4x8xf32> to vector<4x8x1xf32>
    %284 = tpu.reciprocal %283 {approx = true} : vector<4x8x1xf32> -> vector<4x8x1xf32>
    %285 = vector.broadcast %284 : vector<4x8x1xf32> to vector<4x8x8xf32>
    %286 = arith.mulf %281, %285 : vector<4x8x8xf32>
    "tpu.trace_start"() <{level = 10 : i32, message = "bqk,bkd->bqd"}> : () -> ()
    %cst_113 = arith.constant dense<0.000000e+00> : vector<4x8x8xf32>
    %287 = tpu.matmul %286, %271, %cst_113 {dimension_numbers = #tpu.dot_dimension_numbers<[2], [1], [1], [2], [0, 0, 0, 1, 1, 2], [0], [0]>} : vector<4x8x8xf32>, vector<4x8x8xf32>, vector<4x8x8xf32> -> vector<4x8x8xf32>
    "tpu.trace_stop"() : () -> ()
    %288 = vector.extract_strided_slice %245 {offsets = [0, 0, 16], sizes = [4, 8, 8], strides = [1, 1, 1]} : vector<4x8x32xf32> to vector<4x8x8xf32>
    %289 = vector.extract_strided_slice %247 {offsets = [0, 0, 16], sizes = [4, 8, 8], strides = [1, 1, 1]} : vector<4x8x32xf32> to vector<4x8x8xf32>
    %290 = vector.extract_strided_slice %249 {offsets = [0, 0, 16], sizes = [4, 8, 8], strides = [1, 1, 1]} : vector<4x8x32xf32> to vector<4x8x8xf32>
    "tpu.trace_start"() <{level = 10 : i32, message = "bqd,bkd->bqk"}> : () -> ()
    %cst_114 = arith.constant dense<0.000000e+00> : vector<4x8x8xf32>
    %291 = tpu.matmul %288, %289, %cst_114 {dimension_numbers = #tpu.dot_dimension_numbers<[2], [2], [1], [1], [0, 0, 0, 1, 1, 1], [0], [0]>} : vector<4x8x8xf32>, vector<4x8x8xf32>, vector<4x8x8xf32> -> vector<4x8x8xf32>
    "tpu.trace_stop"() : () -> ()
    %cst_115 = arith.constant 0.353553385 : f32
    %292 = vector.broadcast %cst_115 : f32 to vector<4x8x8xf32>
    %293 = arith.mulf %291, %292 : vector<4x8x8xf32>
    %294 = vector.broadcast %30 : vector<4x1x8xf32> to vector<4x8x8xf32>
    %295 = arith.addf %293, %294 : vector<4x8x8xf32>
    %cst_116 = arith.constant dense<0xFF800000> : vector<4x8xf32>
    %296 = vector.multi_reduction <maximumf>, %295, %cst_116 [2] : vector<4x8x8xf32> to vector<4x8xf32>
    %297 = vector.shape_cast %296 : vector<4x8xf32> to vector<4x8x1xf32>
    %298 = vector.broadcast %297 : vector<4x8x1xf32> to vector<4x8x8xf32>
    %299 = arith.subf %295, %298 : vector<4x8x8xf32>
    %300 = math.exp %299 : vector<4x8x8xf32>
    %cst_117 = arith.constant dense<0.000000e+00> : vector<4x8xf32>
    %301 = vector.multi_reduction <add>, %300, %cst_117 [2] : vector<4x8x8xf32> to vector<4x8xf32>
    %302 = vector.shape_cast %301 : vector<4x8xf32> to vector<4x8x1xf32>
    %303 = tpu.reciprocal %302 {approx = true} : vector<4x8x1xf32> -> vector<4x8x1xf32>
    %304 = vector.broadcast %303 : vector<4x8x1xf32> to vector<4x8x8xf32>
    %305 = arith.mulf %300, %304 : vector<4x8x8xf32>
    "tpu.trace_start"() <{level = 10 : i32, message = "bqk,bkd->bqd"}> : () -> ()
    %cst_118 = arith.constant dense<0.000000e+00> : vector<4x8x8xf32>
    %306 = tpu.matmul %305, %290, %cst_118 {dimension_numbers = #tpu.dot_dimension_numbers<[2], [1], [1], [2], [0, 0, 0, 1, 1, 2], [0], [0]>} : vector<4x8x8xf32>, vector<4x8x8xf32>, vector<4x8x8xf32> -> vector<4x8x8xf32>
    "tpu.trace_stop"() : () -> ()
    %307 = vector.extract_strided_slice %245 {offsets = [0, 0, 24], sizes = [4, 8, 8], strides = [1, 1, 1]} : vector<4x8x32xf32> to vector<4x8x8xf32>
    %308 = vector.extract_strided_slice %247 {offsets = [0, 0, 24], sizes = [4, 8, 8], strides = [1, 1, 1]} : vector<4x8x32xf32> to vector<4x8x8xf32>
    %309 = vector.extract_strided_slice %249 {offsets = [0, 0, 24], sizes = [4, 8, 8], strides = [1, 1, 1]} : vector<4x8x32xf32> to vector<4x8x8xf32>
    "tpu.trace_start"() <{level = 10 : i32, message = "bqd,bkd->bqk"}> : () -> ()
    %cst_119 = arith.constant dense<0.000000e+00> : vector<4x8x8xf32>
    %310 = tpu.matmul %307, %308, %cst_119 {dimension_numbers = #tpu.dot_dimension_numbers<[2], [2], [1], [1], [0, 0, 0, 1, 1, 1], [0], [0]>} : vector<4x8x8xf32>, vector<4x8x8xf32>, vector<4x8x8xf32> -> vector<4x8x8xf32>
    "tpu.trace_stop"() : () -> ()
    %cst_120 = arith.constant 0.353553385 : f32
    %311 = vector.broadcast %cst_120 : f32 to vector<4x8x8xf32>
    %312 = arith.mulf %310, %311 : vector<4x8x8xf32>
    %313 = vector.broadcast %30 : vector<4x1x8xf32> to vector<4x8x8xf32>
    %314 = arith.addf %312, %313 : vector<4x8x8xf32>
    %cst_121 = arith.constant dense<0xFF800000> : vector<4x8xf32>
    %315 = vector.multi_reduction <maximumf>, %314, %cst_121 [2] : vector<4x8x8xf32> to vector<4x8xf32>
    %316 = vector.shape_cast %315 : vector<4x8xf32> to vector<4x8x1xf32>
    %317 = vector.broadcast %316 : vector<4x8x1xf32> to vector<4x8x8xf32>
    %318 = arith.subf %314, %317 : vector<4x8x8xf32>
    %319 = math.exp %318 : vector<4x8x8xf32>
    %cst_122 = arith.constant dense<0.000000e+00> : vector<4x8xf32>
    %320 = vector.multi_reduction <add>, %319, %cst_122 [2] : vector<4x8x8xf32> to vector<4x8xf32>
    %321 = vector.shape_cast %320 : vector<4x8xf32> to vector<4x8x1xf32>
    %322 = tpu.reciprocal %321 {approx = true} : vector<4x8x1xf32> -> vector<4x8x1xf32>
    %323 = vector.broadcast %322 : vector<4x8x1xf32> to vector<4x8x8xf32>
    %324 = arith.mulf %319, %323 : vector<4x8x8xf32>
    "tpu.trace_start"() <{level = 10 : i32, message = "bqk,bkd->bqd"}> : () -> ()
    %cst_123 = arith.constant dense<0.000000e+00> : vector<4x8x8xf32>
    %325 = tpu.matmul %324, %309, %cst_123 {dimension_numbers = #tpu.dot_dimension_numbers<[2], [1], [1], [2], [0, 0, 0, 1, 1, 2], [0], [0]>} : vector<4x8x8xf32>, vector<4x8x8xf32>, vector<4x8x8xf32> -> vector<4x8x8xf32>
    "tpu.trace_stop"() : () -> ()
    %326 = tpu.concatenate %268, %287, %306, %325 in 2 : vector<4x8x8xf32>, vector<4x8x8xf32>, vector<4x8x8xf32>, vector<4x8x8xf32> -> vector<4x8x32xf32>
    %327 = vector.shape_cast %326 : vector<4x8x32xf32> to vector<32x32xf32>
    %c1_124 = arith.constant 1 : index
    %c0_125 = arith.constant 0 : index
    %c0_126 = arith.constant 0 : index
    %328 = vector.load %arg6[%c1_124, %c0_125, %c0_126] : memref<2x32x32xf32, #tpu.memory_space<vmem>>, vector<1x32x32xf32>
    %329 = vector.shape_cast %328 : vector<1x32x32xf32> to vector<32x32xf32>
    %cst_127 = arith.constant dense<0.000000e+00> : vector<32x32xf32>
    %330 = tpu.matmul %327, %329, %cst_127 {dimension_numbers = #tpu.dot_dimension_numbers<[1], [0], [0], [1], [0, 0, 1, 1], [], []>} : vector<32x32xf32>, vector<32x32xf32>, vector<32x32xf32> -> vector<32x32xf32>
    %c1_128 = arith.constant 1 : index
    %c0_129 = arith.constant 0 : index
    %c0_130 = arith.constant 0 : index
    %331 = vector.load %arg7[%c1_128, %c0_129, %c0_130] : memref<2x1x32xf32, #tpu.memory_space<vmem>>, vector<1x1x32xf32>
    %332 = vector.shape_cast %331 : vector<1x1x32xf32> to vector<1x32xf32>
    %333 = vector.broadcast %332 : vector<1x32xf32> to vector<32x32xf32>
    %334 = arith.addf %330, %333 : vector<32x32xf32>
    %335 = arith.addf %334, %236 : vector<32x32xf32>
    %c1_131 = arith.constant 1 : index
    %c0_132 = arith.constant 0 : index
    %c0_133 = arith.constant 0 : index
    %336 = vector.load %arg8[%c1_131, %c0_132, %c0_133] : memref<2x1x32xf32, #tpu.memory_space<vmem>>, vector<1x1x32xf32>
    %337 = vector.shape_cast %336 : vector<1x1x32xf32> to vector<1x32xf32>
    %c1_134 = arith.constant 1 : index
    %c0_135 = arith.constant 0 : index
    %c0_136 = arith.constant 0 : index
    %338 = vector.load %arg9[%c1_134, %c0_135, %c0_136] : memref<2x1x32xf32, #tpu.memory_space<vmem>>, vector<1x1x32xf32>
    %339 = vector.shape_cast %338 : vector<1x1x32xf32> to vector<1x32xf32>
    %cst_137 = arith.constant dense<0.000000e+00> : vector<32xf32>
    %340 = vector.multi_reduction <add>, %335, %cst_137 [1] : vector<32x32xf32> to vector<32xf32>
    %341 = vector.shape_cast %340 : vector<32xf32> to vector<32x1xf32>
    %cst_138 = arith.constant 3.200000e+01 : f32
    %342 = vector.broadcast %cst_138 : f32 to vector<32x1xf32>
    %343 = arith.divf %341, %342 : vector<32x1xf32>
    %344 = vector.broadcast %343 : vector<32x1xf32> to vector<32x32xf32>
    %345 = arith.subf %335, %344 : vector<32x32xf32>
    %346 = arith.mulf %345, %345 : vector<32x32xf32>
    %cst_139 = arith.constant dense<0.000000e+00> : vector<32xf32>
    %347 = vector.multi_reduction <add>, %346, %cst_139 [1] : vector<32x32xf32> to vector<32xf32>
    %348 = vector.shape_cast %347 : vector<32xf32> to vector<32x1xf32>
    %cst_140 = arith.constant 3.200000e+01 : f32
    %349 = vector.broadcast %cst_140 : f32 to vector<32x1xf32>
    %350 = arith.divf %348, %349 : vector<32x1xf32>
    %351 = vector.broadcast %343 : vector<32x1xf32> to vector<32x32xf32>
    %352 = arith.subf %335, %351 : vector<32x32xf32>
    %cst_141 = arith.constant 9.99999996E-13 : f32
    %353 = vector.broadcast %cst_141 : f32 to vector<32x1xf32>
    %354 = arith.addf %350, %353 : vector<32x1xf32>
    %355 = math.rsqrt %354 : vector<32x1xf32>
    %356 = vector.broadcast %355 : vector<32x1xf32> to vector<32x32xf32>
    %357 = arith.mulf %352, %356 : vector<32x32xf32>
    %358 = vector.broadcast %337 : vector<1x32xf32> to vector<32x32xf32>
    %359 = arith.mulf %357, %358 : vector<32x32xf32>
    %360 = vector.broadcast %339 : vector<1x32xf32> to vector<32x32xf32>
    %361 = arith.addf %359, %360 : vector<32x32xf32>
    %c1_142 = arith.constant 1 : index
    %c0_143 = arith.constant 0 : index
    %c0_144 = arith.constant 0 : index
    %362 = vector.load %arg10[%c1_142, %c0_143, %c0_144] : memref<2x32x64xf32, #tpu.memory_space<vmem>>, vector<1x32x64xf32>
    %363 = vector.shape_cast %362 : vector<1x32x64xf32> to vector<32x64xf32>
    %cst_145 = arith.constant dense<0.000000e+00> : vector<32x64xf32>
    %364 = tpu.matmul %361, %363, %cst_145 {dimension_numbers = #tpu.dot_dimension_numbers<[1], [0], [0], [1], [0, 0, 1, 1], [], []>} : vector<32x32xf32>, vector<32x64xf32>, vector<32x64xf32> -> vector<32x64xf32>
    %c1_146 = arith.constant 1 : index
    %c0_147 = arith.constant 0 : index
    %c0_148 = arith.constant 0 : index
    %365 = vector.load %arg11[%c1_146, %c0_147, %c0_148] : memref<2x1x64xf32, #tpu.memory_space<vmem>>, vector<1x1x64xf32>
    %366 = vector.shape_cast %365 : vector<1x1x64xf32> to vector<1x64xf32>
    %367 = vector.broadcast %366 : vector<1x64xf32> to vector<32x64xf32>
    %368 = arith.addf %364, %367 : vector<32x64xf32>
    %cst_149 = arith.constant 5.000000e-01 : f32
    %369 = vector.broadcast %cst_149 : f32 to vector<32x64xf32>
    %370 = arith.mulf %369, %368 : vector<32x64xf32>
    %cst_150 = arith.constant 0.707106769 : f32
    %371 = vector.broadcast %cst_150 : f32 to vector<32x64xf32>
    %372 = arith.mulf %368, %371 : vector<32x64xf32>
    %373 = math.absf %372 : vector<32x64xf32>
    %cst_151 = arith.constant 0.327591091 : f32
    %374 = vector.broadcast %cst_151 : f32 to vector<32x64xf32>
    %375 = arith.mulf %374, %373 : vector<32x64xf32>
    %cst_152 = arith.constant 1.000000e+00 : f32
    %376 = vector.broadcast %cst_152 : f32 to vector<32x64xf32>
    %377 = arith.addf %376, %375 : vector<32x64xf32>
    %cst_153 = arith.constant 1.000000e+00 : f32
    %378 = vector.broadcast %cst_153 : f32 to vector<32x64xf32>
    %379 = arith.divf %378, %377 : vector<32x64xf32>
    %cst_154 = arith.constant 1.06140542 : f32
    %380 = vector.broadcast %cst_154 : f32 to vector<32x64xf32>
    %381 = arith.mulf %380, %379 : vector<32x64xf32>
    %cst_155 = arith.constant -1.45315206 : f32
    %382 = vector.broadcast %cst_155 : f32 to vector<32x64xf32>
    %383 = arith.addf %381, %382 : vector<32x64xf32>
    %384 = arith.mulf %383, %379 : vector<32x64xf32>
    %cst_156 = arith.constant 1.42141378 : f32
    %385 = vector.broadcast %cst_156 : f32 to vector<32x64xf32>
    %386 = arith.addf %384, %385 : vector<32x64xf32>
    %387 = arith.mulf %386, %379 : vector<32x64xf32>
    %cst_157 = arith.constant -0.284496725 : f32
    %388 = vector.broadcast %cst_157 : f32 to vector<32x64xf32>
    %389 = arith.addf %387, %388 : vector<32x64xf32>
    %390 = arith.mulf %389, %379 : vector<32x64xf32>
    %cst_158 = arith.constant 0.254829586 : f32
    %391 = vector.broadcast %cst_158 : f32 to vector<32x64xf32>
    %392 = arith.addf %390, %391 : vector<32x64xf32>
    %393 = arith.mulf %392, %379 : vector<32x64xf32>
    %cst_159 = arith.constant 0.000000e+00 : f32
    %394 = vector.broadcast %cst_159 : f32 to vector<32x64xf32>
    %395 = arith.subf %394, %373 : vector<32x64xf32>
    %396 = arith.mulf %395, %373 : vector<32x64xf32>
    %397 = math.exp %396 : vector<32x64xf32>
    %398 = arith.mulf %393, %397 : vector<32x64xf32>
    %cst_160 = arith.constant 1.000000e+00 : f32
    %399 = vector.broadcast %cst_160 : f32 to vector<32x64xf32>
    %400 = arith.subf %399, %398 : vector<32x64xf32>
    %cst_161 = arith.constant 0.000000e+00 : f32
    %401 = vector.broadcast %cst_161 : f32 to vector<32x64xf32>
    %402 = arith.cmpf oge, %372, %401 : vector<32x64xf32>
    %cst_162 = arith.constant 0.000000e+00 : f32
    %403 = vector.broadcast %cst_162 : f32 to vector<32x64xf32>
    %404 = arith.subf %403, %400 : vector<32x64xf32>
    %405 = arith.select %402, %400, %404 : vector<32x64xi1>, vector<32x64xf32>
    %cst_163 = arith.constant 1.000000e+00 : f32
    %406 = vector.broadcast %cst_163 : f32 to vector<32x64xf32>
    %407 = arith.addf %406, %405 : vector<32x64xf32>
    %408 = arith.mulf %370, %407 : vector<32x64xf32>
    %c1_164 = arith.constant 1 : index
    %c0_165 = arith.constant 0 : index
    %c0_166 = arith.constant 0 : index
    %409 = vector.load %arg12[%c1_164, %c0_165, %c0_166] : memref<2x64x32xf32, #tpu.memory_space<vmem>>, vector<1x64x32xf32>
    %410 = vector.shape_cast %409 : vector<1x64x32xf32> to vector<64x32xf32>
    %cst_167 = arith.constant dense<0.000000e+00> : vector<32x32xf32>
    %411 = tpu.matmul %408, %410, %cst_167 {dimension_numbers = #tpu.dot_dimension_numbers<[1], [0], [0], [1], [0, 0, 1, 1], [], []>} : vector<32x64xf32>, vector<64x32xf32>, vector<32x32xf32> -> vector<32x32xf32>
    %c1_168 = arith.constant 1 : index
    %c0_169 = arith.constant 0 : index
    %c0_170 = arith.constant 0 : index
    %412 = vector.load %arg13[%c1_168, %c0_169, %c0_170] : memref<2x1x32xf32, #tpu.memory_space<vmem>>, vector<1x1x32xf32>
    %413 = vector.shape_cast %412 : vector<1x1x32xf32> to vector<1x32xf32>
    %414 = vector.broadcast %413 : vector<1x32xf32> to vector<32x32xf32>
    %415 = arith.addf %411, %414 : vector<32x32xf32>
    %416 = arith.addf %415, %361 : vector<32x32xf32>
    %c1_171 = arith.constant 1 : index
    %c0_172 = arith.constant 0 : index
    %c0_173 = arith.constant 0 : index
    %417 = vector.load %arg14[%c1_171, %c0_172, %c0_173] : memref<2x1x32xf32, #tpu.memory_space<vmem>>, vector<1x1x32xf32>
    %418 = vector.shape_cast %417 : vector<1x1x32xf32> to vector<1x32xf32>
    %c1_174 = arith.constant 1 : index
    %c0_175 = arith.constant 0 : index
    %c0_176 = arith.constant 0 : index
    %419 = vector.load %arg15[%c1_174, %c0_175, %c0_176] : memref<2x1x32xf32, #tpu.memory_space<vmem>>, vector<1x1x32xf32>
    %420 = vector.shape_cast %419 : vector<1x1x32xf32> to vector<1x32xf32>
    %cst_177 = arith.constant dense<0.000000e+00> : vector<32xf32>
    %421 = vector.multi_reduction <add>, %416, %cst_177 [1] : vector<32x32xf32> to vector<32xf32>
    %422 = vector.shape_cast %421 : vector<32xf32> to vector<32x1xf32>
    %cst_178 = arith.constant 3.200000e+01 : f32
    %423 = vector.broadcast %cst_178 : f32 to vector<32x1xf32>
    %424 = arith.divf %422, %423 : vector<32x1xf32>
    %425 = vector.broadcast %424 : vector<32x1xf32> to vector<32x32xf32>
    %426 = arith.subf %416, %425 : vector<32x32xf32>
    %427 = arith.mulf %426, %426 : vector<32x32xf32>
    %cst_179 = arith.constant dense<0.000000e+00> : vector<32xf32>
    %428 = vector.multi_reduction <add>, %427, %cst_179 [1] : vector<32x32xf32> to vector<32xf32>
    %429 = vector.shape_cast %428 : vector<32xf32> to vector<32x1xf32>
    %cst_180 = arith.constant 3.200000e+01 : f32
    %430 = vector.broadcast %cst_180 : f32 to vector<32x1xf32>
    %431 = arith.divf %429, %430 : vector<32x1xf32>
    %432 = vector.broadcast %424 : vector<32x1xf32> to vector<32x32xf32>
    %433 = arith.subf %416, %432 : vector<32x32xf32>
    %cst_181 = arith.constant 9.99999996E-13 : f32
    %434 = vector.broadcast %cst_181 : f32 to vector<32x1xf32>
    %435 = arith.addf %431, %434 : vector<32x1xf32>
    %436 = math.rsqrt %435 : vector<32x1xf32>
    %437 = vector.broadcast %436 : vector<32x1xf32> to vector<32x32xf32>
    %438 = arith.mulf %433, %437 : vector<32x32xf32>
    %439 = vector.broadcast %418 : vector<1x32xf32> to vector<32x32xf32>
    %440 = arith.mulf %438, %439 : vector<32x32xf32>
    %441 = vector.broadcast %420 : vector<1x32xf32> to vector<32x32xf32>
    %442 = arith.addf %440, %441 : vector<32x32xf32>
    %443 = vector.shape_cast %442 : vector<32x32xf32> to vector<4x8x32xf32>
    %444 = vector.extract_strided_slice %443 {offsets = [0, 0, 0], sizes = [4, 1, 32], strides = [1, 1, 1]} : vector<4x8x32xf32> to vector<4x1x32xf32>
    %445 = vector.shape_cast %444 : vector<4x1x32xf32> to vector<4x32xf32>
    %c0_182 = arith.constant 0 : index
    %c0_183 = arith.constant 0 : index
    %446 = vector.load %arg16[%c0_182, %c0_183] : memref<32x32xf32, #tpu.memory_space<vmem>>, vector<32x32xf32>
    %cst_184 = arith.constant dense<0.000000e+00> : vector<4x32xf32>
    %447 = tpu.matmul %445, %446, %cst_184 {dimension_numbers = #tpu.dot_dimension_numbers<[1], [0], [0], [1], [0, 0, 1, 1], [], []>} : vector<4x32xf32>, vector<32x32xf32>, vector<4x32xf32> -> vector<4x32xf32>
    %c0_185 = arith.constant 0 : index
    %c0_186 = arith.constant 0 : index
    %448 = vector.load %arg17[%c0_185, %c0_186] : memref<1x32xf32, #tpu.memory_space<vmem>>, vector<1x32xf32>
    %449 = vector.broadcast %448 : vector<1x32xf32> to vector<4x32xf32>
    %450 = arith.addf %447, %449 : vector<4x32xf32>
    %451 = math.tanh %450 : vector<4x32xf32>
    %452 = arith.mulf %451, %451 : vector<4x32xf32>
    %cst_187 = arith.constant dense<0.000000e+00> : vector<4xf32>
    %453 = vector.multi_reduction <add>, %452, %cst_187 [1] : vector<4x32xf32> to vector<4xf32>
    %454 = vector.shape_cast %453 : vector<4xf32> to vector<4x1xf32>
    %455 = math.sqrt %454 : vector<4x1xf32>
    %cst_188 = arith.constant 9.99999993E-9 : f32
    %456 = vector.broadcast %cst_188 : f32 to vector<4x1xf32>
    %457 = arith.addf %455, %456 : vector<4x1xf32>
    %458 = vector.broadcast %457 : vector<4x1xf32> to vector<4x32xf32>
    %459 = arith.divf %451, %458 : vector<4x32xf32>
    %c0_189 = arith.constant 0 : index
    %c0_190 = arith.constant 0 : index
    %460 = vector.load %arg18[%c0_189, %c0_190] : memref<4x32xf32, #tpu.memory_space<vmem>>, vector<4x32xf32>
    tpu.vector_store %arg18[%c0_189, %c0_190], %459 {strides = array<i32>} : memref<4x32xf32, #tpu.memory_space<vmem>>, vector<4x32xf32>,
    %cst_191 = arith.constant dense<0xFF800000> : vector<4xf32>
    %461 = vector.multi_reduction <maximumf>, %459, %cst_191 [1] : vector<4x32xf32> to vector<4xf32>
    %462 = vector.shape_cast %461 : vector<4xf32> to vector<4x1xf32>
    %463 = vector.broadcast %462 : vector<4x1xf32> to vector<4x32xf32>
    %464 = arith.subf %459, %463 : vector<4x32xf32>
    %465 = math.exp %464 : vector<4x32xf32>
    %cst_192 = arith.constant dense<0.000000e+00> : vector<4xf32>
    %466 = vector.multi_reduction <add>, %465, %cst_192 [1] : vector<4x32xf32> to vector<4xf32>
    %467 = vector.shape_cast %466 : vector<4xf32> to vector<4x1xf32>
    %468 = vector.broadcast %467 : vector<4x1xf32> to vector<4x32xf32>
    %469 = arith.divf %465, %468 : vector<4x32xf32>
    %c0_193 = arith.constant 0 : index
    %c0_194 = arith.constant 0 : index
    %470 = vector.load %arg19[%c0_193, %c0_194] : memref<4x32xf32, #tpu.memory_space<vmem>>, vector<4x32xf32>
    tpu.vector_store %arg19[%c0_193, %c0_194], %469 {strides = array<i32>} : memref<4x32xf32, #tpu.memory_space<vmem>>, vector<4x32xf32>,
    %471 = tpu.transpose %459, [1, 0] : vector<4x32xf32> -> vector<32x4xf32>
    %cst_195 = arith.constant dense<0.000000e+00> : vector<4x4xf32>
    %472 = tpu.matmul %459, %471, %cst_195 {dimension_numbers = #tpu.dot_dimension_numbers<[1], [0], [0], [1], [0, 0, 1, 1], [], []>} : vector<4x32xf32>, vector<32x4xf32>, vector<4x4xf32> -> vector<4x4xf32>
    %473 = tpu.iota {dimensions = array<i32: 0>} : vector<4x4xi32>
    %474 = tpu.iota {dimensions = array<i32: 1>} : vector<4x4xi32>
    %475 = arith.cmpi eq, %473, %474 : vector<4x4xi32>
    %476 = arith.extui %475 : vector<4x4xi1> to vector<4x4xi32>
    %477 = arith.sitofp %476 : vector<4x4xi32> to vector<4x4xf32>
    %c1_i32 = arith.constant 1 : i32
    %478 = vector.broadcast %c1_i32 : i32 to vector<4x4xi32>
    %479 = arith.addi %473, %478 : vector<4x4xi32>
    %c2_i32 = arith.constant 2 : i32
    %c0_i32 = arith.constant 0 : i32
    %480 = arith.cmpi eq, %c2_i32, %c0_i32 : i32
    %c1_i32_196 = arith.constant 1 : i32
    %481 = arith.select %480, %c1_i32_196, %c2_i32 : i32
    %482 = vector.broadcast %481 : i32 to vector<4x4xi32>
    %483 = arith.remsi %473, %482 : vector<4x4xi32>
    %c0_i32_197 = arith.constant 0 : i32
    %484 = vector.broadcast %c0_i32_197 : i32 to vector<4x4xi32>
    %485 = arith.cmpi ne, %483, %484 : vector<4x4xi32>
    %c0_i32_198 = arith.constant 0 : i32
    %486 = vector.broadcast %c0_i32_198 : i32 to vector<4x4xi32>
    %487 = arith.cmpi slt, %483, %486 : vector<4x4xi32>
    %c0_i32_199 = arith.constant 0 : i32
    %488 = arith.cmpi slt, %481, %c0_i32_199 : i32
    %489 = vector.broadcast %488 : i1 to vector<4x4xi1>
    %490 = vector.broadcast %489 : vector<4x4xi1> to vector<4x4xi1>
    %491 = arith.xori %487, %490 : vector<4x4xi1>
    %492 = arith.andi %491, %485 : vector<4x4xi1>
    %493 = vector.broadcast %481 : i32 to vector<4x4xi32>
    %494 = arith.addi %483, %493 : vector<4x4xi32>
    %495 = arith.select %492, %494, %483 : vector<4x4xi1>, vector<4x4xi32>
    %c2_i32_200 = arith.constant 2 : i32
    %496 = vector.broadcast %c2_i32_200 : i32 to vector<4x4xi32>
    %497 = arith.muli %495, %496 : vector<4x4xi32>
    %498 = arith.subi %479, %497 : vector<4x4xi32>
    %499 = arith.cmpi eq, %474, %498 : vector<4x4xi32>
    %500 = arith.extui %499 : vector<4x4xi1> to vector<4x4xi32>
    %501 = arith.sitofp %500 : vector<4x4xi32> to vector<4x4xf32>
    %cst_201 = arith.constant 9.99999995E+11 : f32
    %502 = vector.broadcast %cst_201 : f32 to vector<4x4xf32>
    %503 = arith.mulf %477, %502 : vector<4x4xf32>
    %504 = arith.subf %472, %503 : vector<4x4xf32>
    %cst_202 = arith.constant 2.000000e+01 : f32
    %505 = vector.broadcast %cst_202 : f32 to vector<4x4xf32>
    %506 = arith.mulf %504, %505 : vector<4x4xf32>
    %cst_203 = arith.constant 2.000000e+00 : f32
    %507 = vector.broadcast %cst_203 : f32 to vector<4x4xf32>
    %508 = arith.mulf %507, %501 : vector<4x4xf32>
    %cst_204 = arith.constant 1.000000e+00 : f32
    %509 = vector.broadcast %cst_204 : f32 to vector<4x4xf32>
    %510 = arith.subf %509, %508 : vector<4x4xf32>
    %511 = arith.mulf %510, %506 : vector<4x4xf32>
    %cst_205 = arith.constant 9.99999995E+11 : f32
    %512 = vector.broadcast %cst_205 : f32 to vector<4x4xf32>
    %513 = arith.mulf %501, %512 : vector<4x4xf32>
    %514 = arith.subf %511, %513 : vector<4x4xf32>
    %cst_206 = arith.constant 1.000000e+00 : f32
    %515 = vector.broadcast %cst_206 : f32 to vector<4x4xf32>
    %516 = arith.subf %515, %501 : vector<4x4xf32>
    %cst_207 = arith.constant 9.99999995E+11 : f32
    %517 = vector.broadcast %cst_207 : f32 to vector<4x4xf32>
    %518 = arith.mulf %516, %517 : vector<4x4xf32>
    %519 = arith.subf %511, %518 : vector<4x4xf32>
    %cst_208 = arith.constant dense<0xFF800000> : vector<4xf32>
    %520 = vector.multi_reduction <maximumf>, %514, %cst_208 [1] : vector<4x4xf32> to vector<4xf32>
    %521 = vector.shape_cast %520 : vector<4xf32> to vector<4x1xf32>
    %cst_209 = arith.constant 0.000000e+00 : f32
    %522 = vector.broadcast %cst_209 : f32 to vector<4x1xf32>
    %523 = arith.maximumf %521, %522 : vector<4x1xf32>
    %524 = vector.broadcast %523 : vector<4x1xf32> to vector<4x4xf32>
    %525 = arith.subf %514, %524 : vector<4x4xf32>
    %526 = math.exp %525 : vector<4x4xf32>
    %cst_210 = arith.constant dense<0.000000e+00> : vector<4xf32>
    %527 = vector.multi_reduction <add>, %526, %cst_210 [1] : vector<4x4xf32> to vector<4xf32>
    %528 = vector.shape_cast %527 : vector<4xf32> to vector<4x1xf32>
    %cst_211 = arith.constant 0.000000e+00 : f32
    %529 = vector.broadcast %cst_211 : f32 to vector<4x1xf32>
    %530 = arith.subf %529, %523 : vector<4x1xf32>
    %531 = math.exp %530 : vector<4x1xf32>
    %532 = arith.addf %528, %531 : vector<4x1xf32>
    %533 = math.log %532 : vector<4x1xf32>
    %534 = arith.addf %523, %533 : vector<4x1xf32>
    %cst_212 = arith.constant dense<0xFF800000> : vector<4xf32>
    %535 = vector.multi_reduction <maximumf>, %519, %cst_212 [1] : vector<4x4xf32> to vector<4xf32>
    %536 = vector.shape_cast %535 : vector<4xf32> to vector<4x1xf32>
    %cst_213 = arith.constant 0.000000e+00 : f32
    %537 = vector.broadcast %cst_213 : f32 to vector<4x1xf32>
    %538 = arith.maximumf %536, %537 : vector<4x1xf32>
    %539 = vector.broadcast %538 : vector<4x1xf32> to vector<4x4xf32>
    %540 = arith.subf %519, %539 : vector<4x4xf32>
    %541 = math.exp %540 : vector<4x4xf32>
    %cst_214 = arith.constant dense<0.000000e+00> : vector<4xf32>
    %542 = vector.multi_reduction <add>, %541, %cst_214 [1] : vector<4x4xf32> to vector<4xf32>
    %543 = vector.shape_cast %542 : vector<4xf32> to vector<4x1xf32>
    %cst_215 = arith.constant 0.000000e+00 : f32
    %544 = vector.broadcast %cst_215 : f32 to vector<4x1xf32>
    %545 = arith.subf %544, %538 : vector<4x1xf32>
    %546 = math.exp %545 : vector<4x1xf32>
    %547 = arith.addf %543, %546 : vector<4x1xf32>
    %548 = math.log %547 : vector<4x1xf32>
    %549 = arith.addf %538, %548 : vector<4x1xf32>
    %550 = arith.addf %534, %549 : vector<4x1xf32>
    %551 = vector.shape_cast %550 : vector<4x1xf32> to vector<1x4x1xf32>
    %cst_216 = arith.constant dense<0.000000e+00> : vector<1xf32>
    %552 = vector.multi_reduction <add>, %551, %cst_216 [1, 2] : vector<1x4x1xf32> to vector<1xf32>
    %553 = vector.shape_cast %552 : vector<1xf32> to vector<1x1x1xf32>
    %554 = vector.extract %553[0, 0, 0] : f32 from vector<1x1x1xf32>
    %cst_217 = arith.constant 4.000000e+00 : f32
    %555 = arith.divf %554, %cst_217 : f32
    %556 = vector.broadcast %555 : f32 to vector<1x1xf32>
    %c0_218 = arith.constant 0 : index
    %c0_219 = arith.constant 0 : index
    %557 = vector.load %arg20[%c0_218, %c0_219] : memref<1x1xf32, #tpu.memory_space<vmem>>, vector<1x1xf32>
    tpu.vector_store %arg20[%c0_218, %c0_219], %556 {strides = array<i32>} : memref<1x1xf32, #tpu.memory_space<vmem>>, vector<1x1xf32>,
    return
  }
}

</mosaic_0001>

<bundles_post_ra>
// kernel: bert_model_test_forward.1
= control target key start
LH: loop header
LB: loop body
LE: loop exit
PB: predicated region body
PF: predicated region fallthrough
CT: control target
= control target key end

     0   :  { %s5622_s0 = inlined_call_operand.vmem [shape: f32[32,32], index: 0, kind: input, shape index: {}]   ;;  %s5623_s1 = inlined_call_operand.vmem [shape: f32[4,8], index: 1, kind: input, shape index: {}]   ;;  %s5624_s2 = inlined_call_operand.vmem [shape: f32[1,32], index: 2, kind: input, shape index: {}]   ;;  %s5625_s3 = inlined_call_operand.vmem [shape: f32[1,32], index: 3, kind: input, shape index: {}, may-alias: {3,17}]   ;;  %s5626_s4 = inlined_call_operand.vmem [shape: f32[2,32,96], index: 4, kind: input, shape index: {}]   ;;  %s5627_s5 = inlined_call_operand.vmem [shape: f32[2,1,96], index: 5, kind: input, shape index: {}]   ;;  %s5628_s6 = inlined_call_operand.vmem [shape: f32[2,32,32], index: 6, kind: input, shape index: {}]   ;;  %s5629_s7 = inlined_call_operand.vmem [shape: f32[2,1,32], index: 7, kind: input, shape index: {}, may-alias: {7,9,13,15}]   ;;  %s5630_s8 = inlined_call_operand.vmem [shape: f32[2,1,32], index: 8, kind: input, shape index: {}, may-alias: {8,14}]   ;;  %s5631_s9 = inlined_call_operand.vmem [shape: f32[2,1,32], index: 9, kind: input, shape index: {}, may-alias: {7,9,13,15}]   ;;  %s5632_s10 = inlined_call_operand.vmem [shape: f32[2,32,64], index: 10, kind: input, shape index: {}]   ;;  %s5633_s11 = inlined_call_operand.vmem [shape: f32[2,1,64], index: 11, kind: input, shape index: {}]   ;;  %s5634_s12 = inlined_call_operand.vmem [shape: f32[2,64,32], index: 12, kind: input, shape index: {}]   ;;  %s5635_s13 = inlined_call_operand.vmem [shape: f32[2,1,32], index: 13, kind: input, shape index: {}, may-alias: {7,9,13,15}]   ;;  %s5636_s14 = inlined_call_operand.vmem [shape: f32[2,1,32], index: 14, kind: input, shape index: {}, may-alias: {8,14}]   ;;  %s5637_s15 = inlined_call_operand.vmem [shape: f32[2,1,32], index: 15, kind: input, shape index: {}, may-alias: {7,9,13,15}]   ;;  %s5638_s16 = inlined_call_operand.vmem [shape: f32[32,32], index: 16, kind: input, shape index: {}]   ;;  %s5639_s17 = inlined_call_operand.vmem [shape: f32[1,32], index: 17, kind: input, shape index: {}, may-alias: {3,17}]   ;;  %s5640_s18 = inlined_call_operand.hbm [shape: f32[4,32], index: 18, kind: output, shape index: {0}]   ;;  %s5641_s19 = inlined_call_operand.hbm [shape: f32[4,32], index: 19, kind: output, shape index: {1}]   ;;  %s5642_s20 = inlined_call_operand.hbm [shape: f32[1,1], index: 20, kind: output, shape index: {2}]  }
   0x1   :  { %5661 = sst [smem:[#allocation9_spill]] %s5622_s0 }
   0x2   :  { %5662 = sst [smem:[#allocation10_spill]] %s5623_s1 }
   0x3   :  { %5663 = sst [smem:[#allocation11_spill]] %s5624_s2 }
   0x4   :  { %5664 = sst [smem:[#allocation12_spill]] %s5625_s3 }
   0x5   :  { %5665 = sst [smem:[#allocation13_spill]] %s5626_s4 }
   0x6   :  { %26 = vsyncpa [#allocation3], 0  ;;  %s5666_s23 = sld [smem:[#allocation9_spill]]  ;;  %vm70_vm0 = vcmask 261120  }
   0xc   :  { %v66_v0 = vld [vmem:[%s5666_s23 + $0x10] sm:$0xff]  ;;  %v64_v1 = vld [vmem:[%s5666_s23] sm:$0xff]  ;;  %v67_v2 = vld [vmem:[%s5666_s23 + $0x18] sm:$0xff] }
   0xd   :  { %v77_v3 = vsel %vm70_vm0, %v66_v0, 0.0  ;;  %v71_v4 = vsel %vm70_vm0, %v64_v1, 0.0  ;;  %v80_v5 = vsel %vm70_vm0, %v67_v2, 0.0  ;;  %v65_v6 = vld [vmem:[%s5666_s23 + $0x8] sm:$0xff] }
   0xe   :  { %78 = vadd.xlane.f32.xlu1 %v77_v3  ;;  %72 = vadd.xlane.f32.xlu0 %v71_v4  ;;  %v74_v7 = vsel %vm70_vm0, %v65_v6, 0.0 }
   0xf   :  { %81 = vadd.xlane.f32.xlu2 %v80_v5 }
  0x10   :  { %27 = vsyncpa [#allocation5], 0  ;;  %v4427_v8 = vmov 32.0   ;;  %s5667_s29 = sld [smem:[#allocation13_spill]]  ;;  %s4428_s30 = smov 96   ;;  %vm239_vm14 = vcmask 64512  }
  0x11   :  { %4125 = vrcp.f32 %v4427_v8  ;;  %s5668_s25 = sld [smem:[#allocation11_spill]]  ;;  %s4429_s22 = smov 64   ;;  %vm1365_vm15 = vcmask 130048  }
  0x12   :  { %s5669_s27 = sld [smem:[#allocation12_spill]]  ;;  %s4430_s23 = smov 88  }
  0x13   :  { %s5670_s1 = sld [smem:[#allocation10_spill]]  ;;  %s4431_s24 = smov 120  }
  0x14   :  { %s5657_s2 = smov 56   ;;  %s5659_s3 = smov 80  }
  0x15   :  { %s5653_s26 = smov 48   ;;  %s5649_s28 = smov 104  }
  0x16   :  { %75 = vadd.xlane.f32.xlu0 %v74_v7  ;;  %v190_v35 = vld [vmem:[%s5667_s29 + $0x18] sm:$0xff]  ;;  %v189_v36 = vld [vmem:[%s5667_s29 + $0x10] sm:$0xff]  ;;  %v188_v37 = vld [vmem:[%s5667_s29 + $0x8] sm:$0xff]  ;;  %s5647_s4 = smov 40   ;;  %s4439_s0 = smov 16  }
  0x17   :  { %v4126_v9 = vpop.eup %4125  ;;  %219 = vmatpush.msra.mxu0 %v190_v35  ;;  %4048 = vmatpush.msra.mxu1 %v190_v35  ;;  %v187_v38 = vld [vmem:[%s5667_s29] sm:$0xff]  ;;  %s5645_s21 = smov 8  }
  0x18   :  { %v84_v10 = vmul.f32 32.0, %v4126_v9  ;;  %vm88_vm1 = vweird.f32 %v4126_v9 }
  0x19   :  { %220 = vmatpush.msra.mxu0 %v189_v36  ;;  %4049 = vmatpush.msra.mxu1 %v189_v36 }
  0x1a   :  { %v85_v11 = vsub.f32 1.0, %v84_v10 }
  0x1b   :  { %221 = vmatpush.msra.mxu0 %v188_v37  ;;  %4050 = vmatpush.msra.mxu1 %v188_v37 }
  0x1c   :  { %v86_v12 = vmul.f32 %v4126_v9, %v85_v11 }
  0x1d   :  { %222 = vmatpush.msra.mxu0 %v187_v38  ;;  %4051 = vmatpush.msra.mxu1 %v187_v38 }
  0x1e   :  { %v87_v13 = vadd.f32 %v4126_v9, %v86_v12 }
  0x20   :  { %v4568_v14 = vsel %vm88_vm1, %v4126_v9, %v87_v13  ;;  %vm1370_vm1 = vcmask 195584  }
  0x81   :  { %v79_v15 = vpop.xlane.xlu1 %78  ;;  %v73_v16 = vpop.xlane.xlu0 %72 }
  0x82   :  { %v92_v17 = vmul.f32 %v4568_v14, %v79_v15  ;;  %v90_v18 = vmul.f32 %v4568_v14, %v73_v16  ;;  %v82_v19 = vpop.xlane.xlu2 %81 }
  0x83   :  { %v93_v20 = vmul.f32 %v4568_v14, %v82_v19 }
  0x84   :  { %v4573_v21 = vsub.f32 %v66_v0, %v92_v17  ;;  %v4575_v22 = vsub.f32 %v64_v1, %v90_v18  ;;  %v4106_v1 = vld [vmem:[%s5668_s25] ss:$0 sm:$0xff]  ;;  %s5655_s25 = smov 112  }
  0x85   :  { %v4577_v23 = vsub.f32 %v67_v2, %v93_v20 }
  0x86   :  { %v100_v24 = vmul.f32 %v4573_v21, %v4573_v21  ;;  %v98_v25 = vmul.f32 %v4575_v22, %v4575_v22 }
  0x87   :  { %v101_v30 = vmul.f32 %v4577_v23, %v4577_v23 }
  0x88   :  { %v108_v26 = vsel %vm70_vm0, %v100_v24, 0.0  ;;  %v102_v27 = vsel %vm70_vm0, %v98_v25, 0.0 }
  0x89   :  { %109 = vadd.xlane.f32.xlu0 %v108_v26  ;;  %103 = vadd.xlane.f32.xlu1 %v102_v27  ;;  %v76_v28 = vpop.xlane.xlu0 %75  ;;  %v111_v32 = vsel %vm70_vm0, %v101_v30, 0.0 }
  0x8a   :  { %v91_v29 = vmul.f32 %v4568_v14, %v76_v28 }
  0x8c   :  { %v4588_v31 = vsub.f32 %v65_v6, %v91_v29  ;;  %v4107_v6 = vld [vmem:[%s5669_s27] ss:$0 sm:$0xff]  ;;  %s5651_s27 = smov 72  }
  0x8e   :  { %v99_v33 = vmul.f32 %v4588_v31, %v4588_v31 }
  0x90   :  { %v105_v34 = vsel %vm70_vm0, %v99_v33, 0.0 }
  0x91   :  { %112 = vadd.xlane.f32.xlu1 %v111_v32  ;;  %106 = vadd.xlane.f32.xlu2 %v105_v34 }
  0xfc   :  { %v104_v39 = vpop.xlane.xlu1 %103  ;;  %v110_v40 = vpop.xlane.xlu0 %109 }
  0xfd   :  { %v114_v41 = vmul.f32 %v104_v39, %v4568_v14  ;;  %v116_v42 = vmul.f32 %v110_v40, %v4568_v14 }
  0xff   :  { %v118_v43 = vadd.f32 1e-12, %v114_v41  ;;  %v120_v44 = vadd.f32 1e-12, %v116_v42 }
 0x101   :  { %4127 = vrsqrt.f32 %v118_v43  ;;  %vm128_vm3 = vweird.f32 %v118_v43  ;;  %vm148_vm7 = vweird.f32 %v120_v44 }
 0x102   :  { %4129 = vrsqrt.f32 %v120_v44 }
 0x104   :  { %v113_v45 = vpop.xlane.xlu1 %112  ;;  %v107_v46 = vpop.xlane.xlu2 %106 }
 0x105   :  { %v117_v47 = vmul.f32 %v113_v45, %v4568_v14  ;;  %v115_v48 = vmul.f32 %v107_v46, %v4568_v14 }
 0x107   :  { %v4128_v49 = vpop.eup %4127  ;;  %v121_v50 = vadd.f32 1e-12, %v117_v47  ;;  %v119_v51 = vadd.f32 1e-12, %v115_v48 }
 0x108   :  { %v4130_v52 = vpop.eup %4129  ;;  %v123_v53 = vmul.f32 %v4128_v49, %v118_v43  ;;  %vm129_vm2 = vweird.f32 %v4128_v49  ;;  %v180_v43 = vld [vmem:[%s5670_s1] sm:$0xf]  ;;  %s4441_s1 = smov 24  }
 0x109   :  { %v143_v54 = vmul.f32 %v4130_v52, %v120_v44  ;;  %4131 = vrsqrt.f32 %v121_v50  ;;  %vm130_vm4 = vmor %vm128_vm3, %vm129_vm2  ;;  %vm158_vm5 = vweird.f32 %v121_v50  ;;  %vm149_vm8 = vweird.f32 %v4130_v52 }
 0x10a   :  { %v124_v55 = vmul.f32 %v4128_v49, %v123_v53  ;;  %4133 = vrsqrt.f32 %v119_v51  ;;  %vm150_vm11 = vmor %vm148_vm7, %vm149_vm8  ;;  %vm138_vm12 = vweird.f32 %v119_v51  ;;  %v181_v44 = vsub.f32 1.0, %v180_v43 }
 0x10b   :  { %v144_v57 = vmul.f32 %v4130_v52, %v143_v54 }
 0x10c   :  { %v125_v56 = vmul.f32 0.5, %v124_v55  ;;  %v182_v45 = vmul.f32 -10000.0, %v181_v44 }
 0x10d   :  { %v145_v63 = vmul.f32 0.5, %v144_v57 }
 0x10e   :  { %v126_v58 = vsub.f32 1.5, %v125_v56  ;;  %v185_v46 = vrot.slane %v182_v45, 2  ;;  %v186_v55 = vrot.slane %v182_v45, 3 }
 0x10f   :  { %v4132_v59 = vpop.eup %4131  ;;  %v146_v8 = vsub.f32 1.5, %v145_v63 }
 0x110   :  { %v4134_v60 = vpop.eup %4133  ;;  %v127_v61 = vmul.f32 %v4128_v49, %v126_v58  ;;  %v153_v62 = vmul.f32 %v4132_v59, %v121_v50  ;;  %vm159_vm6 = vweird.f32 %v4132_v59  ;;  %v4670_v47 = vperm.slane %v185_v46, 0 }
 0x111   :  { %v133_v0 = vmul.f32 %v4134_v60, %v119_v51  ;;  %vm160_vm9 = vmor %vm158_vm5, %vm159_vm6  ;;  %vm139_vm10 = vweird.f32 %v4134_v60  ;;  %v147_v16 = vmul.f32 %v4130_v52, %v146_v8  ;;  %v4678_v58 = vperm.slane %v186_v55, 0 }
 0x112   :  { %v154_v2 = vmul.f32 %v4132_v59, %v153_v62  ;;  %v131_v3 = vsel %vm130_vm4, %v4128_v49, %v127_v61  ;;  %vm140_vm13 = vmor %vm138_vm12, %vm139_vm10  ;;  %v4672_v49 = vperm.slane %v182_v45, 0  ;;  %v184_v61 = vrot.slane %v182_v45, 1 }
 0x113   :  { %v134_v4 = vmul.f32 %v4134_v60, %v133_v0  ;;  %v162_v5 = vmul.f32 %v131_v3, %v4575_v22  ;;  %v151_v25 = vsel %vm150_vm11, %v4130_v52, %v147_v16 }
 0x114   :  { %v155_v7 = vmul.f32 0.5, %v154_v2  ;;  %v164_v29 = vmul.f32 %v151_v25, %v4573_v21  ;;  %v4682_v0 = vperm.slane %v184_v61, 0 }
 0x115   :  { %v135_v9 = vmul.f32 0.5, %v134_v4  ;;  %v169_v10 = vmul.f32 %v4106_v1, %v162_v5 }
 0x116   :  { %v156_v11 = vsub.f32 1.5, %v155_v7  ;;  %v171_v30 = vmul.f32 %v4106_v1, %v164_v29 }
 0x117   :  { %v136_v12 = vsub.f32 1.5, %v135_v9  ;;  %v4617_v13 = vadd.f32 %v4107_v6, %v169_v10 }
 0x118   :  { %v157_v15 = vmul.f32 %v4132_v59, %v156_v11  ;;  %v4632_v32 = vadd.f32 %v4107_v6, %v171_v30 }
 0x119   :  { %v137_v17 = vmul.f32 %v4134_v60, %v136_v12  ;;  %3887 = vmatmul.msk.f32.vlgmr.msra.gmra.mxu0 %vm70_vm0, %v4617_v13 }
 0x11a   :  { %v161_v18 = vsel %vm160_vm9, %v4132_v59, %v157_v15 }
 0x11b   :  { %v141_v19 = vsel %vm140_vm13, %v4134_v60, %v137_v17  ;;  %v165_v20 = vmul.f32 %v161_v18, %v4577_v23  ;;  %v4108_v23 = vld [vmem:[%s5627_s5] ss:$0 sm:$0xff] }
 0x11c   :  { %v163_v22 = vmul.f32 %v141_v19, %v4588_v31 }
 0x11d   :  { %v172_v24 = vmul.f32 %v4106_v1, %v165_v20 }
 0x11e   :  { %v170_v26 = vmul.f32 %v4106_v1, %v163_v22 }
 0x11f   :  { %v4623_v27 = vadd.f32 %v4107_v6, %v172_v24 }
 0x120   :  { %v4625_v28 = vadd.f32 %v4107_v6, %v170_v26 }
 0x121   :  { %3890 = vmatmul.msk.f32.vlgmr.msra.gmra.mxu1 %vm70_vm0, %v4623_v27 }
 0x122   :  { %3888 = vmatmul.msk.f32.gmra.mxu0 %vm70_vm0, %v4625_v28 }
 0x12a   :  { %3889 = vmatmul.msk.f32.gmra.mxu0 %vm70_vm0, %v4632_v32 }
 0x196   :  { %v224_v31 = vpop.f32.mrf.mxu0 }
 0x197   :  { %v4639_v33 = vadd.f32 %v4108_v23, %v224_v31 }
 0x199   :  { %237 = vrot.lane.b32.xlu1 %v4639_v33, %s4428_s30 }
 0x19e   :  { %v233_v37 = vpop.f32.mrf.mxu1 }
 0x19f   :  { %v227_v21 = vpop.f32.mrf.mxu0  ;;  %v4651_v38 = vadd.f32 %v4108_v23, %v233_v37 }
 0x1a0   :  { %v4643_v34 = vadd.f32 %v4108_v23, %v227_v21 }
 0x1a2   :  { %265 = vrot.lane.b32.xlu0 %v4643_v34, %s4428_s30 }
 0x1a7   :  { %v230_v35 = vpop.f32.mrf.mxu0 }
 0x1a8   :  { %v4647_v36 = vadd.f32 %v4108_v23, %v230_v35 }
 0x1aa   :  { %292 = vrot.lane.b32.xlu2 %v4647_v36, %s4428_s30  ;;  %v4076_v5 = vpack.i.bf16 %v4643_v34, %v4647_v36 }
 0x1b2   :  { %319 = vrot.lane.b32.xlu2 %v4651_v38, %s4428_s30 }
 0x204   :  { %v293_v39 = vpop.permute.xlu2 %292 }
 0x205   :  { %3895 = vmatpush.xpose.msk.msra.mxu3 %vm239_vm14, %v293_v39 }
 0x208   :  { %3896 = vmatmul.msk.f32.vlgmr.msra.gmra.mxu3 %vm239_vm14, %v4647_v36 }
 0x20b   :  { %v238_v40 = vpop.permute.xlu1 %237 }
 0x20c   :  { %v320_v41 = vpop.permute.xlu2 %319  ;;  %3891 = vmatpush.xpose.msk.msrb.mxu1 %vm239_vm14, %v238_v40 }
 0x20f   :  { %3892 = vmatmul.msk.f32.vlgmr.msrb.gmra.mxu1 %vm239_vm14, %v4639_v33 }
 0x210   :  { %3897 = vmatpush.xpose.msk.msra.mxu1 %vm239_vm14, %v320_v41 }
 0x214   :  { %v266_v42 = vpop.permute.xlu0 %265 }
 0x215   :  { %3893 = vmatpush.xpose.msk.msra.mxu2 %vm239_vm14, %v266_v42 }
 0x217   :  { %3898 = vmatmul.msk.f32.vlgmr.msra.gmra.mxu1 %vm239_vm14, %v4651_v38 }
 0x218   :  { %3894 = vmatmul.msk.f32.vlgmr.msra.gmra.mxu2 %vm239_vm14, %v4643_v34 }
 0x28b   :  { %v315_v48 = vpop.f32.mrf.mxu3 }
 0x28c   :  { %v347_v50 = vmul.f32 0.35355338, %v315_v48  ;;  %v261_v51 = vpop.f32.mrf.mxu1 }
 0x28d   :  { %v345_v52 = vmul.f32 0.35355338, %v261_v51 }
 0x28e   :  { %v359_v53 = vadd.f32 %v4670_v47, %v347_v50 }
 0x28f   :  { %v357_v54 = vadd.f32 %v4672_v49, %v345_v52 }
 0x290   :  { %v367_v56 = vsel %vm239_vm14, %v359_v53, -inf }
 0x291   :  { %368 = vmax.xlane.f32.xlu0 %v367_v56  ;;  %v361_v57 = vsel %vm239_vm14, %v357_v54, -inf }
 0x292   :  { %362 = vmax.xlane.f32.xlu1 %v361_v57 }
 0x294   :  { %v342_v59 = vpop.f32.mrf.mxu1 }
 0x295   :  { %v348_v60 = vmul.f32 0.35355338, %v342_v59 }
 0x297   :  { %v360_v62 = vadd.f32 %v4678_v58, %v348_v60 }
 0x299   :  { %v370_v63 = vsel %vm239_vm14, %v360_v62, -inf }
 0x29a   :  { %371 = vmax.xlane.f32.xlu0 %v370_v63 }
 0x29b   :  { %v288_v1 = vpop.f32.mrf.mxu2 }
 0x29c   :  { %v346_v2 = vmul.f32 0.35355338, %v288_v1 }
 0x29e   :  { %v358_v3 = vadd.f32 %v4682_v0, %v346_v2 }
 0x2a0   :  { %v364_v4 = vsel %vm239_vm14, %v358_v3, -inf }
 0x2a1   :  { %365 = vmax.xlane.f32.xlu2 %v364_v4 }
 0x2ae   :  { %4077 = vrot.lane.b32.xlu0 %v4076_v5, %s4429_s22 }
 0x2b6   :  { %511 = vrot.lane.b32.xlu0 %v4639_v33, %s4430_s23 }
 0x2b9   :  { %539 = vrot.lane.b32.xlu2 %v4643_v34, %s4430_s23 }
 0x2c1   :  { %509 = vrot.lane.b32.xlu2 %v4639_v33, %s4431_s24 }
 0x2c9   :  { %405 = vrot.lane.b32.xlu2 %v4639_v33, %s4429_s22 }
 0x304   :  { %v369_v6 = vpop.xlane.xlu0 %368 }
 0x305   :  { %v375_v7 = vsub.f32 %v359_v53, %v369_v6  ;;  %v363_v8 = vpop.xlane.xlu1 %362 }
 0x306   :  { %v373_v9 = vsub.f32 %v357_v54, %v363_v8 }
 0x307   :  { %v381_v10 = vmul.f32 1.442695, %v375_v7 }
 0x308   :  { %v377_v11 = vmul.f32 1.442695, %v373_v9 }
 0x309   :  { %4135 = vpow2.f32 %v381_v10 }
 0x30a   :  { %4137 = vpow2.f32 %v377_v11 }
 0x30d   :  { %v372_v22 = vpop.xlane.xlu0 %371 }
 0x30e   :  { %v376_v37 = vsub.f32 %v360_v62, %v372_v22 }
 0x30f   :  { %v4136_v12 = vpop.eup %4135 }
 0x310   :  { %v4138_v15 = vpop.eup %4137  ;;  %v391_v16 = vsel %vm239_vm14, %v4136_v12, 0.0  ;;  %v383_v39 = vmul.f32 1.442695, %v376_v37 }
 0x311   :  { %392 = vadd.xlane.f32.xlu2 %v391_v16  ;;  %v385_v17 = vsel %vm239_vm14, %v4138_v15, 0.0 }
 0x312   :  { %386 = vadd.xlane.f32.xlu0 %v385_v17 }
 0x314   :  { %v366_v18 = vpop.xlane.xlu2 %365 }
 0x315   :  { %v374_v19 = vsub.f32 %v358_v3, %v366_v18 }
 0x317   :  { %v379_v20 = vmul.f32 1.442695, %v374_v19 }
 0x319   :  { %4139 = vpow2.f32 %v379_v20 }
 0x31a   :  { %4141 = vpow2.f32 %v383_v39 }
 0x31c   :  { %v540_v24 = vpop.permute.xlu2 %539 }
 0x31f   :  { %v4140_v25 = vpop.eup %4139 }
 0x320   :  { %v388_v26 = vsel %vm239_vm14, %v4140_v25, 0.0  ;;  %v4078_v29 = vpop.permute.xlu0 %4077  ;;  %v4142_v40 = vpop.eup %4141 }
 0x321   :  { %389 = vadd.xlane.f32.xlu1 %v388_v26  ;;  %v4079_v30 = vunpack.i.l.bf16 %v4078_v29  ;;  %v4080_v23 = vunpack.i.h.bf16 %v4078_v29  ;;  %v394_v41 = vsel %vm239_vm14, %v4142_v40, 0.0 }
 0x323   :  { %452 = vmatpush.msrb.mxu3 %v4080_v23  ;;  %478 = vmatpush.msrb.mxu1 %v4079_v30 }
 0x324   :  { %v510_v31 = vpop.permute.xlu2 %509 }
 0x325   :  { %3905 = vmatpush.xpose.msk.msra.mxu1 %vm239_vm14, %v540_v24 }
 0x326   :  { %593 = vrot.lane.b32.xlu0 %v4651_v38, %s4431_s24 }
 0x328   :  { %v512_v21 = vpop.permute.xlu0 %511 }
 0x329   :  { %483 = vrot.lane.b32.xlu2 %v4651_v38, %s4429_s22  ;;  %3903 = vmatpush.xpose.msk.msra.mxu3 %vm239_vm14, %v512_v21 }
 0x32c   :  { %v406_v35 = vpop.permute.xlu2 %405 }
 0x32d   :  { %426 = vmatpush.msrb.mxu2 %v406_v35 }
 0x32e   :  { %699 = vrot.lane.b32.xlu0 %v4643_v34, %s5657_s2 }
 0x331   :  { %567 = vrot.lane.b32.xlu2 %v4647_v36, %s4430_s23 }
 0x339   :  { %565 = vrot.lane.b32.xlu2 %v4647_v36, %s4431_s24 }
 0x33a   :  { %537 = vrot.lane.b32.xlu1 %v4643_v34, %s4431_s24 }
 0x341   :  { %595 = vrot.lane.b32.xlu2 %v4651_v38, %s4430_s23 }
 0x364   :  { %395 = vadd.xlane.f32.xlu1 %v394_v41 }
 0x384   :  { %v393_v42 = vpop.xlane.xlu2 %392 }
 0x385   :  { %4143 = vrcp.f32 %v393_v42  ;;  %v387_v43 = vpop.xlane.xlu0 %386 }
 0x386   :  { %4145 = vrcp.f32 %v387_v43 }
 0x38b   :  { %v4144_v44 = vpop.eup %4143 }
 0x38c   :  { %v4146_v45 = vpop.eup %4145  ;;  %v403_v46 = vmul.f32 %v4144_v44, %v4136_v12  ;;  %v484_v48 = vpop.permute.xlu2 %483 }
 0x38d   :  { %504 = vmatpush.msra.mxu2 %v484_v48  ;;  %v401_v50 = vmul.f32 %v4146_v45, %v4138_v15 }
 0x38e   :  { %3901 = vmatmul.msk.f32.vlgmr.msrb.gmra.mxu1 %vm239_vm14, %v403_v46 }
 0x38f   :  { %3899 = vmatmul.msk.f32.vlgmr.msrb.gmra.mxu2 %vm239_vm14, %v401_v50 }
 0x394   :  { %v390_v51 = vpop.xlane.xlu1 %389  ;;  %v568_v52 = vpop.permute.xlu2 %567 }
 0x395   :  { %4147 = vrcp.f32 %v390_v51  ;;  %3907 = vmatpush.xpose.msk.msrb.mxu2 %vm239_vm14, %v568_v52 }
 0x398   :  { %v594_v59 = vpop.permute.xlu0 %593 }
 0x39b   :  { %v4148_v53 = vpop.eup %4147 }
 0x39c   :  { %v566_v54 = vpop.permute.xlu2 %565  ;;  %v402_v55 = vmul.f32 %v4148_v53, %v4140_v25 }
 0x39e   :  { %3900 = vmatmul.msk.f32.vlgmr.msrb.gmra.mxu3 %vm239_vm14, %v402_v55 }
 0x3a0   :  { %v700_v63 = vpop.permute.xlu0 %699 }
 0x3a4   :  { %v596_v56 = vpop.permute.xlu2 %595 }
 0x3a5   :  { %3909 = vmatpush.xpose.msk.msrb.mxu3 %vm239_vm14, %v596_v56 }
 0x3a6   :  { %3904 = vmatmul.msk.f32.vlgmr.msra.gmra.mxu3 %vm239_vm14, %v510_v31 }
 0x3ac   :  { %v538_v57 = vpop.permute.xlu1 %537 }
 0x3ad   :  { %3906 = vmatmul.msk.f32.vlgmr.msra.gmra.mxu1 %vm239_vm14, %v538_v57 }
 0x3ae   :  { %3910 = vmatmul.msk.f32.vlgmr.msrb.gmra.mxu3 %vm239_vm14, %v594_v59 }
 0x3d7   :  { %v396_v60 = vpop.xlane.xlu1 %395 }
 0x3d8   :  { %4149 = vrcp.f32 %v396_v60 }
 0x3de   :  { %v4150_v61 = vpop.eup %4149 }
 0x3df   :  { %v404_v62 = vmul.f32 %v4150_v61, %v4142_v40 }
 0x3e1   :  { %3902 = vmatmul.msk.f32.vlgmr.msra.gmra.mxu2 %vm239_vm14, %v404_v62 }
 0x3e2   :  { %720 = vmatpush.msra.mxu2 %v700_v63 }
 0x3e9   :  { %3908 = vmatmul.msk.f32.vlgmr.msrb.gmra.mxu2 %vm239_vm14, %v566_v54 }
 0x40b   :  { %v4758_v18 = vpop.f32.mrf.mxu1 }
 0x412   :  { %v4744_v10 = vpop.f32.mrf.mxu2 }
 0x421   :  { %v4727_v1 = vpop.f32.mrf.mxu3 }
 0x429   :  { %v534_v2 = vpop.f32.mrf.mxu3 }
 0x42a   :  { %v621_v3 = vmul.f32 0.35355338, %v534_v2  ;;  %v562_v20 = vpop.f32.mrf.mxu1 }
 0x42b   :  { %v622_v22 = vmul.f32 0.35355338, %v562_v20 }
 0x42c   :  { %v625_v4 = vadd.f32 %v621_v3, %v4672_v49 }
 0x42d   :  { %v626_v25 = vadd.f32 %v622_v22, %v4682_v0 }
 0x42e   :  { %v629_v5 = vsel %vm239_vm14, %v625_v4, -inf }
 0x42f   :  { %630 = vmax.xlane.f32.xlu2 %v629_v5  ;;  %v632_v26 = vsel %vm239_vm14, %v626_v25, -inf }
 0x431   :  { %v618_v6 = vpop.f32.mrf.mxu3 }
 0x432   :  { %v624_v7 = vmul.f32 0.35355338, %v618_v6 }
 0x434   :  { %v4732_v8 = vadd.f32 %v624_v7, %v4678_v58 }
 0x436   :  { %v638_v9 = vsel %vm239_vm14, %v4732_v8, -inf }
 0x437   :  { %639 = vmax.xlane.f32.xlu0 %v638_v9 }
 0x447   :  { %805 = vrot.lane.b32.xlu2 %v4643_v34, %s5655_s25 }
 0x44b   :  { %777 = vrot.lane.b32.xlu0 %v4639_v33, %s5655_s25 }
 0x453   :  { %833 = vrot.lane.b32.xlu0 %v4647_v36, %s5655_s25 }
 0x45b   :  { %751 = vrot.lane.b32.xlu0 %v4651_v38, %s5657_s2 }
 0x463   :  { %863 = vrot.lane.b32.xlu0 %v4651_v38, %s5659_s3 }
 0x464   :  { %v4748_v11 = vpop.f32.mrf.mxu2 }
 0x46c   :  { %v590_v12 = vpop.f32.mrf.mxu2 }
 0x46d   :  { %v623_v15 = vmul.f32 0.35355338, %v590_v12 }
 0x46f   :  { %v627_v16 = vadd.f32 %v623_v15, %v4670_v47 }
 0x471   :  { %v635_v17 = vsel %vm239_vm14, %v627_v16, -inf }
 0x472   :  { %636 = vmax.xlane.f32.xlu1 %v635_v17 }
 0x48b   :  { %807 = vrot.lane.b32.xlu1 %v4643_v34, %s5659_s3 }
 0x493   :  { %673 = vrot.lane.b32.xlu1 %v4639_v33, %s5657_s2 }
 0x49b   :  { %779 = vrot.lane.b32.xlu1 %v4639_v33, %s5659_s3 }
 0x4a2   :  { %v631_v40 = vpop.xlane.xlu2 %630 }
 0x4a3   :  { %v641_v41 = vsub.f32 %v625_v4, %v631_v40 }
 0x4a5   :  { %v645_v42 = vmul.f32 1.442695, %v641_v41 }
 0x4aa   :  { %v640_v19 = vpop.xlane.xlu0 %639  ;;  %v806_v56 = vpop.permute.xlu2 %805 }
 0x4ab   :  { %v644_v61 = vsub.f32 %v4732_v8, %v640_v19 }
 0x4ad   :  { %v651_v62 = vmul.f32 1.442695, %v644_v61 }
 0x4bd   :  { %v778_v24 = vpop.permute.xlu0 %777 }
 0x4c5   :  { %v4762_v29 = vpop.permute.xlu0 %833  ;;  %633 = vmax.xlane.f32.xlu1 %v632_v26  ;;  %v4081_v26 = vpack.i.bf16 %v4639_v33, %v4643_v34 }
 0x4cd   :  { %v752_v30 = vpop.permute.xlu0 %751 }
 0x4ce   :  { %772 = vmatpush.msrb.mxu0 %v752_v30 }
 0x4d5   :  { %v864_v23 = vpop.permute.xlu0 %863 }
 0x4d6   :  { %3921 = vmatpush.xpose.msk.msra.mxu0 %vm239_vm14, %v864_v23 }
 0x4de   :  { %725 = vrot.lane.b32.xlu1 %v4647_v36, %s5657_s2  ;;  %s5677_s2 = smov 40  }
 0x4e5   :  { %v637_v31 = vpop.xlane.xlu1 %636 }
 0x4e6   :  { %v643_v21 = vsub.f32 %v627_v16, %v637_v31 }
 0x4e8   :  { %v649_v35 = vmul.f32 1.442695, %v643_v21 }
 0x4ea   :  { %4151 = vpow2.f32 %v649_v35 }
 0x4eb   :  { %4153 = vpow2.f32 %v645_v42 }
 0x4f0   :  { %v4152_v37 = vpop.eup %4151 }
 0x4f1   :  { %v659_v39 = vsel %vm239_vm14, %v4152_v37, 0.0  ;;  %v4154_v44 = vpop.eup %4153 }
 0x4f2   :  { %660 = vadd.xlane.f32.xlu2 %v659_v39  ;;  %v653_v46 = vsel %vm239_vm14, %v4154_v44, 0.0 }
 0x4fd   :  { %v808_v43 = vpop.permute.xlu1 %807 }
 0x4fe   :  { %3917 = vmatpush.xpose.msk.msrb.mxu2 %vm239_vm14, %v808_v43 }
 0x505   :  { %v674_v45 = vpop.permute.xlu1 %673 }
 0x506   :  { %694 = vmatpush.msrb.mxu1 %v674_v45 }
 0x508   :  { %654 = vadd.xlane.f32.xlu1 %v653_v46 }
 0x50a   :  { %861 = vrot.lane.b32.xlu2 %v4651_v38, %s5655_s25  ;;  %s5678_s25 = smov 8  }
 0x50d   :  { %v780_v48 = vpop.permute.xlu1 %779 }
 0x50e   :  { %3915 = vmatpush.xpose.msk.msra.mxu1 %vm239_vm14, %v780_v48 }
 0x538   :  { %v634_v50 = vpop.xlane.xlu1 %633 }
 0x539   :  { %v642_v51 = vsub.f32 %v626_v25, %v634_v50 }
 0x53b   :  { %v647_v52 = vmul.f32 1.442695, %v642_v51 }
 0x53d   :  { %4155 = vpow2.f32 %v647_v52 }
 0x543   :  { %v4156_v53 = vpop.eup %4155 }
 0x544   :  { %v656_v54 = vsel %vm239_vm14, %v4156_v53, 0.0 }
 0x545   :  { %657 = vadd.xlane.f32.xlu1 %v656_v54 }
 0x550   :  { %v726_v55 = vpop.permute.xlu1 %725 }
 0x551   :  { %746 = vmatpush.msra.mxu3 %v726_v55 }
 0x55e   :  { %835 = vrot.lane.b32.xlu1 %v4647_v36, %s5659_s3 }
 0x565   :  { %v661_v57 = vpop.xlane.xlu2 %660 }
 0x566   :  { %4157 = vrcp.f32 %v661_v57 }
 0x56c   :  { %v4158_v59 = vpop.eup %4157 }
 0x56d   :  { %v671_v60 = vmul.f32 %v4158_v59, %v4152_v37  ;;  %v862_v22 = vpop.permute.xlu2 %861 }
 0x56f   :  { %3913 = vmatmul.msk.f32.vlgmr.msra.gmra.mxu3 %vm239_vm14, %v671_v60 }
 0x57b   :  { %v655_v63 = vpop.xlane.xlu1 %654 }
 0x57c   :  { %4159 = vrcp.f32 %v655_v63 }
 0x57d   :  { %4161 = vpow2.f32 %v651_v62 }
 0x582   :  { %v4160_v2 = vpop.eup %4159 }
 0x583   :  { %v669_v3 = vmul.f32 %v4160_v2, %v4154_v44  ;;  %v4162_v4 = vpop.eup %4161 }
 0x584   :  { %v662_v5 = vsel %vm239_vm14, %v4162_v4, 0.0 }
 0x585   :  { %3911 = vmatmul.msk.f32.vlgmr.msrb.gmra.mxu1 %vm239_vm14, %v669_v3 }
 0x588   :  { %663 = vadd.xlane.f32.xlu1 %v662_v5 }
 0x58d   :  { %3916 = vmatmul.msk.f32.vlgmr.msra.gmra.mxu1 %vm239_vm14, %v778_v24 }
 0x5b8   :  { %v658_v6 = vpop.xlane.xlu1 %657 }
 0x5b9   :  { %4163 = vrcp.f32 %v658_v6 }
 0x5bf   :  { %v4164_v7 = vpop.eup %4163 }
 0x5c0   :  { %v670_v9 = vmul.f32 %v4164_v7, %v4156_v53 }
 0x5c2   :  { %3912 = vmatmul.msk.f32.vlgmr.msra.gmra.mxu2 %vm239_vm14, %v670_v9 }
 0x5ca   :  { %3918 = vmatmul.msk.f32.vlgmr.msrb.gmra.mxu2 %vm239_vm14, %v806_v56 }
 0x5d0   :  { %v836_v8 = vpop.permute.xlu1 %835 }
 0x5d1   :  { %3919 = vmatpush.xpose.msk.msrb.mxu3 %vm239_vm14, %v836_v8 }
 0x5d4   :  { %3920 = vmatmul.msk.f32.vlgmr.msrb.gmra.mxu3 %vm239_vm14, %v4762_v29 }
 0x5f2   :  { %v4797_v31 = vpop.f32.mrf.mxu3 }
 0x5fb   :  { %v664_v12 = vpop.xlane.xlu1 %663 }
 0x5fc   :  { %4165 = vrcp.f32 %v664_v12 }
 0x602   :  { %v4166_v15 = vpop.eup %4165  ;;  %v4786_v16 = vpop.f32.mrf.mxu1 }
 0x603   :  { %v672_v17 = vmul.f32 %v4166_v15, %v4162_v4 }
 0x605   :  { %3914 = vmatmul.msk.f32.vlgmr.msrb.gmra.mxu0 %vm239_vm14, %v672_v17 }
 0x60a   :  { %v802_v19 = vpop.f32.mrf.mxu1 }
 0x60b   :  { %v889_v20 = vmul.f32 0.35355338, %v802_v19 }
 0x60d   :  { %3922 = vmatmul.msk.f32.vlgmr.msra.gmra.mxu0 %vm239_vm14, %v862_v22  ;;  %v893_v24 = vadd.f32 %v889_v20, %v4672_v49 }
 0x60f   :  { %v897_v25 = vsel %vm239_vm14, %v893_v24, -inf }
 0x610   :  { %898 = vmax.xlane.f32.xlu1 %v897_v25 }
 0x629   :  { %4082 = vrot.lane.b32.xlu1 %v4081_v26, %s5653_s26 }
 0x645   :  { %v4795_v29 = vpop.f32.mrf.mxu2 }
 0x64d   :  { %v830_v30 = vpop.f32.mrf.mxu2 }
 0x64e   :  { %v890_v23 = vmul.f32 0.35355338, %v830_v30 }
 0x650   :  { %v894_v21 = vadd.f32 %v890_v23, %v4682_v0 }
 0x652   :  { %v900_v35 = vsel %vm239_vm14, %v894_v21, -inf }
 0x653   :  { %901 = vmax.xlane.f32.xlu0 %v900_v35 }
 0x657   :  { %v858_v37 = vpop.f32.mrf.mxu3 }
 0x658   :  { %v891_v39 = vmul.f32 0.35355338, %v858_v37 }
 0x65a   :  { %v895_v40 = vadd.f32 %v891_v39, %v4670_v47 }
 0x65c   :  { %v903_v41 = vsel %vm239_vm14, %v895_v40, -inf }
 0x65d   :  { %904 = vmax.xlane.f32.xlu2 %v903_v41 }
 0x667   :  { %1075 = vrot.lane.b32.xlu0 %v4643_v34, %s5651_s27 }
 0x675   :  { %1073 = vrot.lane.b32.xlu2 %v4643_v34, %s5649_s28 }
 0x67d   :  { %1101 = vrot.lane.b32.xlu2 %v4647_v36, %s5649_s28 }
 0x682   :  { %v4809_v42 = vpop.f32.mrf.mxu0 }
 0x683   :  { %v899_v43 = vpop.xlane.xlu1 %898 }
 0x684   :  { %v909_v44 = vsub.f32 %v893_v24, %v899_v43 }
 0x685   :  { %1019 = vrot.lane.b32.xlu2 %v4651_v38, %s5653_s26 }
 0x686   :  { %v913_v45 = vmul.f32 1.442695, %v909_v44 }
 0x688   :  { %4167 = vpow2.f32 %v913_v45 }
 0x68a   :  { %v886_v46 = vpop.f32.mrf.mxu0 }
 0x68b   :  { %v892_v48 = vmul.f32 0.35355338, %v886_v46 }
 0x68d   :  { %1131 = vrot.lane.b32.xlu2 %v4651_v38, %s5651_s27  ;;  %v896_v50 = vadd.f32 %v892_v48, %v4678_v58 }
 0x68e   :  { %v4168_v51 = vpop.eup %4167 }
 0x68f   :  { %v921_v52 = vsel %vm239_vm14, %v4168_v51, 0.0  ;;  %v906_v53 = vsel %vm239_vm14, %v896_v50, -inf }
 0x690   :  { %922 = vadd.xlane.f32.xlu1 %v921_v52 }
 0x691   :  { %907 = vmax.xlane.f32.xlu0 %v906_v53 }
 0x695   :  { %1129 = vrot.lane.b32.xlu2 %v4651_v38, %s5649_s28 }
 0x69b   :  { %v4083_v54 = vpop.permute.xlu1 %4082 }
 0x69c   :  { %v4085_v55 = vunpack.i.h.bf16 %v4083_v54  ;;  %v4084_v56 = vunpack.i.l.bf16 %v4083_v54 }
 0x69e   :  { %962 = vmatpush.msrb.mxu1 %v4085_v55  ;;  %988 = vmatpush.msra.mxu2 %v4084_v56 }
 0x6a5   :  { %1045 = vrot.lane.b32.xlu0 %v4639_v33, %s5649_s28 }
 0x6ad   :  { %993 = vrot.lane.b32.xlu0 %v4647_v36, %s5653_s26 }
 0x6b5   :  { %1103 = vrot.lane.b32.xlu0 %v4647_v36, %s5651_s27 }
 0x6c6   :  { %v902_v57 = vpop.xlane.xlu0 %901 }
 0x6c7   :  { %v910_v59 = vsub.f32 %v894_v21, %v902_v57 }
 0x6c9   :  { %v915_v60 = vmul.f32 1.442695, %v910_v59 }
 0x6cb   :  { %4169 = vpow2.f32 %v915_v60 }
 0x6d0   :  { %v905_v61 = vpop.xlane.xlu2 %904 }
 0x6d1   :  { %v4170_v62 = vpop.eup %4169  ;;  %v911_v9 = vsub.f32 %v895_v40, %v905_v61 }
 0x6d2   :  { %v924_v63 = vsel %vm239_vm14, %v4170_v62, 0.0 }
 0x6d3   :  { %925 = vadd.xlane.f32.xlu1 %v924_v63  ;;  %v917_v17 = vmul.f32 1.442695, %v911_v9 }
 0x6d8   :  { %v1074_v2 = vpop.permute.xlu2 %1073 }
 0x6d9   :  { %v1076_v3 = vpop.permute.xlu0 %1075 }
 0x6da   :  { %3929 = vmatpush.xpose.msk.msrb.mxu2 %vm239_vm14, %v1076_v3 }
 0x6e0   :  { %v1102_v4 = vpop.permute.xlu2 %1101 }
 0x6e8   :  { %v1020_v5 = vpop.permute.xlu2 %1019 }
 0x6e9   :  { %1040 = vmatpush.msrb.mxu0 %v1020_v5 }
 0x6ec   :  { %1047 = vrot.lane.b32.xlu1 %v4639_v33, %s5651_s27 }
 0x6f0   :  { %v1132_v6 = vpop.permute.xlu2 %1131 }
 0x6f1   :  { %3933 = vmatpush.xpose.msk.msra.mxu0 %vm239_vm14, %v1132_v6 }
 0x703   :  { %v923_v7 = vpop.xlane.xlu1 %922 }
 0x704   :  { %4171 = vrcp.f32 %v923_v7  ;;  %v908_v8 = vpop.xlane.xlu0 %907 }
 0x705   :  { %v912_v12 = vsub.f32 %v896_v50, %v908_v8  ;;  %v1130_v50 = vpop.permute.xlu2 %1129 }
 0x707   :  { %v919_v15 = vmul.f32 1.442695, %v912_v12  ;;  %v4086_v12 = vpack.i.bf16 %v4643_v34, %v4639_v33 }
 0x709   :  { %4173 = vpow2.f32 %v919_v15 }
 0x70a   :  { %v4172_v19 = vpop.eup %4171  ;;  %4175 = vpow2.f32 %v917_v17 }
 0x70b   :  { %v937_v20 = vmul.f32 %v4172_v19, %v4168_v51 }
 0x70d   :  { %3923 = vmatmul.msk.f32.vlgmr.msrb.gmra.mxu1 %vm239_vm14, %v937_v20 }
 0x70f   :  { %v4174_v22 = vpop.eup %4173 }
 0x710   :  { %v930_v24 = vsel %vm239_vm14, %v4174_v22, 0.0  ;;  %v4176_v25 = vpop.eup %4175 }
 0x711   :  { %931 = vadd.xlane.f32.xlu0 %v930_v24  ;;  %v927_v26 = vsel %vm239_vm14, %v4176_v25, 0.0 }
 0x716   :  { %928 = vadd.xlane.f32.xlu1 %v927_v26 }
 0x717   :  { %v1046_v30 = vpop.permute.xlu0 %1045 }
 0x71f   :  { %v994_v23 = vpop.permute.xlu0 %993 }
 0x720   :  { %1014 = vmatpush.msra.mxu3 %v994_v23 }
 0x727   :  { %v1104_v21 = vpop.permute.xlu0 %1103 }
 0x728   :  { %3931 = vmatpush.xpose.msk.msrb.mxu3 %vm239_vm14, %v1104_v21 }
 0x746   :  { %v926_v35 = vpop.xlane.xlu1 %925 }
 0x747   :  { %4177 = vrcp.f32 %v926_v35 }
 0x74d   :  { %v4178_v37 = vpop.eup %4177 }
 0x74e   :  { %v938_v39 = vmul.f32 %v4178_v37, %v4170_v62 }
 0x750   :  { %3924 = vmatmul.msk.f32.vlgmr.msra.gmra.mxu2 %vm239_vm14, %v938_v39 }
 0x758   :  { %3930 = vmatmul.msk.f32.vlgmr.msrb.gmra.mxu2 %vm239_vm14, %v1074_v2 }
 0x75e   :  { %v1048_v40 = vpop.permute.xlu1 %1047 }
 0x75f   :  { %3927 = vmatpush.xpose.msk.msra.mxu1 %vm239_vm14, %v1048_v40 }
 0x762   :  { %3928 = vmatmul.msk.f32.vlgmr.msra.gmra.mxu1 %vm239_vm14, %v1046_v30 }
 0x784   :  { %v932_v41 = vpop.xlane.xlu0 %931 }
 0x785   :  { %4179 = vrcp.f32 %v932_v41 }
 0x789   :  { %v929_v43 = vpop.xlane.xlu1 %928 }
 0x78a   :  { %4181 = vrcp.f32 %v929_v43  ;;  %v964_v52 = vpop.f32.mrf.mxu1 }
 0x78b   :  { %v4180_v44 = vpop.eup %4179 }
 0x78c   :  { %v940_v45 = vmul.f32 %v4180_v44, %v4174_v22 }
 0x78e   :  { %3926 = vmatmul.msk.f32.vlgmr.msrb.gmra.mxu0 %vm239_vm14, %v940_v45 }
 0x790   :  { %v4182_v46 = vpop.eup %4181 }
 0x791   :  { %v939_v48 = vmul.f32 %v4182_v46, %v4176_v25 }
 0x793   :  { %3925 = vmatmul.msk.f32.vlgmr.msra.gmra.mxu3 %vm239_vm14, %v939_v48 }
 0x796   :  { %3934 = vmatmul.msk.f32.vlgmr.msra.gmra.mxu0 %vm239_vm14, %v1130_v50 }
 0x79b   :  { %3932 = vmatmul.msk.f32.vlgmr.msrb.gmra.mxu3 %vm239_vm14, %v1102_v4 }
 0x7d3   :  { %v4843_v51 = vpop.f32.mrf.mxu2 }
 0x7db   :  { %v1098_v53 = vpop.f32.mrf.mxu2 }
 0x7dc   :  { %v1158_v54 = vmul.f32 0.35355338, %v1098_v53 }
 0x7de   :  { %v1162_v55 = vadd.f32 %v1158_v54, %v4682_v0 }
 0x7df   :  { %v1070_v56 = vpop.f32.mrf.mxu1 }
 0x7e0   :  { %v1157_v57 = vmul.f32 0.35355338, %v1070_v56  ;;  %v1168_v59 = vsel %vm239_vm14, %v1162_v55, -inf }
 0x7e1   :  { %1169 = vmax.xlane.f32.xlu2 %v1168_v59 }
 0x7e2   :  { %v1161_v60 = vadd.f32 %v1157_v57, %v4672_v49 }
 0x7e4   :  { %v1165_v61 = vsel %vm239_vm14, %v1161_v60, -inf }
 0x7e5   :  { %1166 = vmax.xlane.f32.xlu1 %v1165_v61 }
 0x80b   :  { %v4849_v62 = vpop.f32.mrf.mxu0 }
 0x813   :  { %v1154_v63 = vpop.f32.mrf.mxu0 }
 0x814   :  { %v1160_v2 = vmul.f32 0.35355338, %v1154_v63  ;;  %v1378_v63 = vld [vmem:[%s5628_s6 + $0x18] sm:$0xff] }
 0x816   :  { %v4851_v3 = vpop.f32.mrf.mxu3  ;;  %v1164_v4 = vadd.f32 %v1160_v2, %v4678_v58  ;;  %v1377_v2 = vld [vmem:[%s5628_s6 + $0x10] sm:$0xff] }
 0x818   :  { %v1174_v5 = vsel %vm239_vm14, %v1164_v4, -inf }
 0x819   :  { %1175 = vmax.xlane.f32.xlu0 %v1174_v5 }
 0x81e   :  { %v1126_v6 = vpop.f32.mrf.mxu3 }
 0x81f   :  { %v1159_v7 = vmul.f32 0.35355338, %v1126_v6 }
 0x821   :  { %v1163_v9 = vadd.f32 %v1159_v7, %v4670_v47 }
 0x823   :  { %v1171_v8 = vsel %vm239_vm14, %v1163_v9, -inf }
 0x824   :  { %1172 = vmax.xlane.f32.xlu1 %v1171_v8 }
 0x82d   :  { %4087 = vrot.lane.b32.xlu0 %v4086_v12, %s5647_s4 }
 0x835   :  { %1287 = vrot.lane.b32.xlu0 %v4651_v38, %s5647_s4 }
 0x83d   :  { %1333 = vrot.lane.b32.xlu0 %v964_v52, %s4439_s0 }
 0x854   :  { %v1170_v15 = vpop.xlane.xlu2 %1169 }
 0x855   :  { %v1178_v20 = vsub.f32 %v1162_v55, %v1170_v15 }
 0x857   :  { %v1183_v24 = vmul.f32 1.442695, %v1178_v20 }
 0x858   :  { %v1167_v17 = vpop.xlane.xlu1 %1166 }
 0x859   :  { %v1177_v19 = vsub.f32 %v1161_v60, %v1167_v17 }
 0x85b   :  { %v1181_v22 = vmul.f32 1.442695, %v1177_v19 }
 0x85d   :  { %4183 = vpow2.f32 %v1181_v22 }
 0x85e   :  { %4185 = vpow2.f32 %v1183_v24 }
 0x863   :  { %v4184_v25 = vpop.eup %4183 }
 0x864   :  { %v1189_v33 = vsel %vm239_vm14, %v4184_v25, 0.0  ;;  %v4186_v34 = vpop.eup %4185 }
 0x865   :  { %1190 = vadd.xlane.f32.xlu1 %v1189_v33  ;;  %v1192_v26 = vsel %vm239_vm14, %v4186_v34, 0.0 }
 0x86d   :  { %1193 = vadd.xlane.f32.xlu1 %v1192_v26 }
 0x88c   :  { %v1176_v38 = vpop.xlane.xlu0 %1175 }
 0x88d   :  { %v1180_v30 = vsub.f32 %v1164_v4, %v1176_v38 }
 0x88f   :  { %v1187_v23 = vmul.f32 1.442695, %v1180_v30 }
 0x891   :  { %4187 = vpow2.f32 %v1187_v23 }
 0x897   :  { %v4188_v21 = vpop.eup %4187  ;;  %v1173_v35 = vpop.xlane.xlu1 %1172 }
 0x898   :  { %v1179_v37 = vsub.f32 %v1163_v9, %v1173_v35  ;;  %v1198_v39 = vsel %vm239_vm14, %v4188_v21, 0.0 }
 0x899   :  { %1199 = vadd.xlane.f32.xlu2 %v1198_v39 }
 0x89a   :  { %v1185_v40 = vmul.f32 1.442695, %v1179_v37 }
 0x89c   :  { %4189 = vpow2.f32 %v1185_v40 }
 0x89f   :  { %v4088_v41 = vpop.permute.xlu0 %4087 }
 0x8a0   :  { %v4090_v43 = vunpack.i.h.bf16 %v4088_v41  ;;  %v4089_v44 = vunpack.i.l.bf16 %v4088_v41 }
 0x8a2   :  { %v4190_v45 = vpop.eup %4189  ;;  %1230 = vmatpush.msrb.mxu1 %v4089_v44  ;;  %1256 = vmatpush.msra.mxu2 %v4090_v43 }
 0x8a3   :  { %v1195_v46 = vsel %vm239_vm14, %v4190_v45, 0.0 }
 0x8a4   :  { %1196 = vadd.xlane.f32.xlu1 %v1195_v46  ;;  %1407 = vmatpush.msra.mxu1 %v1378_v63 }
 0x8a6   :  { %1408 = vmatpush.msra.mxu1 %v1377_v2 }
 0x8a7   :  { %v1288_v48 = vpop.permute.xlu0 %1287 }
 0x8a8   :  { %1308 = vmatpush.msrb.mxu0 %v1288_v48 }
 0x8af   :  { %v1334_v5 = vpop.permute.xlu0 %1333 }
 0x8b1   :  { %1317 = vrot.lane.b32.xlu2 %v4786_v16, %s5645_s21 }
 0x8b9   :  { %1321 = vrot.lane.b32.xlu2 %v4797_v31, %s5645_s21 }
 0x8bd   :  { %1261 = vrot.lane.b32.xlu1 %v4647_v36, %s5647_s4 }
 0x8c1   :  { %1323 = vrot.lane.b32.xlu2 %v4809_v42, %s5645_s21 }
 0x8c5   :  { %1319 = vrot.lane.b32.xlu1 %v4795_v29, %s5645_s21  ;;  %s5676_s21 = smov 104  }
 0x8d8   :  { %v1191_v50 = vpop.xlane.xlu1 %1190 }
 0x8d9   :  { %4191 = vrcp.f32 %v1191_v50 }
 0x8df   :  { %v4192_v52 = vpop.eup %4191 }
 0x8e0   :  { %v1205_v53 = vmul.f32 %v4192_v52, %v4184_v25  ;;  %v1194_v54 = vpop.xlane.xlu1 %1193 }
 0x8e1   :  { %4193 = vrcp.f32 %v1194_v54 }
 0x8e2   :  { %3935 = vmatmul.msk.f32.vlgmr.msrb.gmra.mxu1 %vm239_vm14, %v1205_v53 }
 0x8e7   :  { %v4194_v16 = vpop.eup %4193 }
 0x8e8   :  { %v1206_v55 = vmul.f32 %v4194_v16, %v4186_v34 }
 0x8ea   :  { %3936 = vmatmul.msk.f32.vlgmr.msra.gmra.mxu2 %vm239_vm14, %v1206_v55 }
 0x90c   :  { %v1200_v31 = vpop.xlane.xlu2 %1199 }
 0x90d   :  { %4195 = vrcp.f32 %v1200_v31 }
 0x913   :  { %v4196_v36 = vpop.eup %4195 }
 0x914   :  { %v1208_v56 = vmul.f32 %v4196_v36, %v4188_v21  ;;  %v1318_v6 = vpop.permute.xlu2 %1317 }
 0x915   :  { %v1361_v7 = vsel %vm239_vm14, %v4744_v10, %v1318_v6 }
 0x916   :  { %3938 = vmatmul.msk.f32.vlgmr.msrb.gmra.mxu0 %vm239_vm14, %v1208_v56  ;;  %v1366_v8 = vsel %vm1365_vm15, %v1361_v7, %v1334_v5  ;;  %v1535_v7 = vld [vmem:[%s5632_s10 + $0x18] sm:$0xff] }
 0x917   :  { %v1197_v42 = vpop.xlane.xlu1 %1196  ;;  %1564 = vmatpush.msrb.mxu2 %v1535_v7 }
 0x918   :  { %4197 = vrcp.f32 %v1197_v42 }
 0x91c   :  { %v1322_v10 = vpop.permute.xlu2 %1321 }
 0x91d   :  { %v1363_v33 = vsel %vm239_vm14, %v4758_v18, %v1322_v10  ;;  %v4109_v18 = vld [vmem:[%s5629_s7] ss:$0 sm:$0xff] }
 0x91e   :  { %v4198_v29 = vpop.eup %4197 }
 0x91f   :  { %v1207_v57 = vmul.f32 %v4198_v29, %v4190_v45 }
 0x92f   :  { %v1262_v59 = vpop.permute.xlu1 %1261 }
 0x930   :  { %1282 = vmatpush.msra.mxu3 %v1262_v59 }
 0x931   :  { %3937 = vmatmul.msk.f32.vlgmr.msra.gmra.mxu3 %vm239_vm14, %v1207_v57 }
 0x937   :  { %v1320_v15 = vpop.permute.xlu1 %1319 }
 0x938   :  { %v1362_v19 = vsel %vm239_vm14, %v4727_v1, %v1320_v15  ;;  %v1324_v1 = vpop.permute.xlu2 %1323 }
 0x939   :  { %v1364_v23 = vsel %vm239_vm14, %v4748_v11, %v1324_v1  ;;  %v4110_v1 = vld [vmem:[%s5630_s8] ss:$0 sm:$0xff] }
 0x95f   :  { %v1232_v60 = vpop.f32.mrf.mxu1 }
 0x960   :  { %1349 = vrot.lane.b32.xlu0 %v1232_v60, %s4441_s1 }
 0x968   :  { %1335 = vrot.lane.b32.xlu0 %v4843_v51, %s4439_s0  ;;  %v1376_v51 = vld [vmem:[%s5628_s6 + $0x8] sm:$0xff] }
 0x969   :  { %1409 = vmatpush.msra.mxu1 %v1376_v51 }
 0x96d   :  { %v1258_v61 = vpop.f32.mrf.mxu2 }
 0x96e   :  { %1351 = vrot.lane.b32.xlu1 %v1258_v61, %s4441_s1 }
 0x970   :  { %1337 = vrot.lane.b32.xlu0 %v4851_v3, %s4439_s0  ;;  %v1375_v3 = vld [vmem:[%s5628_s6] sm:$0xff] }
 0x971   :  { %1410 = vmatpush.msra.mxu1 %v1375_v3 }
 0x978   :  { %1339 = vrot.lane.b32.xlu0 %v4849_v62, %s4439_s0 }
 0x993   :  { %v1310_v4 = vpop.f32.mrf.mxu0 }
 0x9b4   :  { %v1284_v62 = vpop.f32.mrf.mxu3 }
 0x9b5   :  { %1353 = vrot.lane.b32.xlu1 %v1284_v62, %s4441_s1 }
 0x9bd   :  { %1355 = vrot.lane.b32.xlu1 %v1310_v4, %s4441_s1 }
 0x9d2   :  { %v1350_v9 = vpop.permute.xlu0 %1349 }
 0x9d3   :  { %v1371_v12 = vsel %vm1370_vm1, %v1366_v8, %v1350_v9  ;;  %v1534_v9 = vld [vmem:[%s5632_s10 + $0x10] sm:$0xff]  ;;  %v1533_v8 = vld [vmem:[%s5632_s10 + $0x8] sm:$0xff] }
 0x9d4   :  { %3939 = vmatmul.msk.f32.vlgmr.msra.gmra.mxu1 %vm70_vm0, %v1371_v12  ;;  %1565 = vmatpush.msrb.mxu2 %v1534_v9  ;;  %v1532_v12 = vld [vmem:[%s5632_s10] sm:$0xff] }
 0x9d6   :  { %1566 = vmatpush.msrb.mxu2 %v1533_v8 }
 0x9d8   :  { %1567 = vmatpush.msrb.mxu2 %v1532_v12 }
 0x9da   :  { %v1336_v17 = vpop.permute.xlu0 %1335 }
 0x9db   :  { %v1367_v20 = vsel %vm1365_vm15, %v1362_v19, %v1336_v17 }
 0x9e0   :  { %v1352_v22 = vpop.permute.xlu1 %1351 }
 0x9e1   :  { %v1372_v24 = vsel %vm1370_vm1, %v1367_v20, %v1352_v22 }
 0x9e2   :  { %3940 = vmatmul.msk.f32.gmra.mxu1 %vm70_vm0, %v1372_v24  ;;  %v1338_v25 = vpop.permute.xlu0 %1337 }
 0x9e3   :  { %v1368_v34 = vsel %vm1365_vm15, %v1363_v33, %v1338_v25 }
 0x9ea   :  { %v1340_v30 = vpop.permute.xlu0 %1339 }
 0x9eb   :  { %v1369_v21 = vsel %vm1365_vm15, %v1364_v23, %v1340_v30 }
 0xa27   :  { %v1354_v26 = vpop.permute.xlu1 %1353 }
 0xa28   :  { %v1373_v38 = vsel %vm1370_vm1, %v1368_v34, %v1354_v26 }
 0xa29   :  { %3941 = vmatmul.msk.f32.gmra.mxu1 %vm70_vm0, %v1373_v38 }
 0xa2f   :  { %v1356_v35 = vpop.permute.xlu1 %1355 }
 0xa30   :  { %v1374_v37 = vsel %vm1370_vm1, %v1369_v21, %v1356_v35  ;;  %v4111_v21 = vld [vmem:[%s5631_s9] ss:$0 sm:$0xff] }
 0xa31   :  { %3942 = vmatmul.msk.f32.gmra.mxu1 %vm70_vm0, %v1374_v37 }
 0xa51   :  { %v1412_v39 = vpop.f32.mrf.mxu1 }
 0xa52   :  { %v1413_v40 = vadd.f32 %v4109_v18, %v1412_v39 }
 0xa54   :  { %v1424_v41 = vadd.f32 %v1413_v40, %v4617_v13 }
 0xa56   :  { %v1430_v43 = vsel %vm70_vm0, %v1424_v41, 0.0 }
 0xa57   :  { %1431 = vadd.xlane.f32.xlu2 %v1430_v43 }
 0xa5f   :  { %v1415_v44 = vpop.f32.mrf.mxu1 }
 0xa60   :  { %v1416_v11 = vadd.f32 %v4109_v18, %v1415_v44 }
 0xa62   :  { %v1425_v45 = vadd.f32 %v1416_v11, %v4625_v28 }
 0xa64   :  { %v1433_v46 = vsel %vm70_vm0, %v1425_v45, 0.0 }
 0xa65   :  { %1434 = vadd.xlane.f32.xlu0 %v1433_v46 }
 0xaa6   :  { %v1418_v48 = vpop.f32.mrf.mxu1 }
 0xaa7   :  { %v1419_v50 = vadd.f32 %v4109_v18, %v1418_v48 }
 0xaa9   :  { %v1426_v52 = vadd.f32 %v1419_v50, %v4632_v32 }
 0xaab   :  { %v1436_v53 = vsel %vm70_vm0, %v1426_v52, 0.0 }
 0xaac   :  { %1437 = vadd.xlane.f32.xlu1 %v1436_v53 }
 0xaae   :  { %v1421_v54 = vpop.f32.mrf.mxu1 }
 0xaaf   :  { %v1422_v16 = vadd.f32 %v4109_v18, %v1421_v54 }
 0xab1   :  { %v1427_v13 = vadd.f32 %v1422_v16, %v4623_v27 }
 0xab3   :  { %v1439_v55 = vsel %vm70_vm0, %v1427_v13, 0.0 }
 0xab4   :  { %1440 = vadd.xlane.f32.xlu0 %v1439_v55 }
 0xaca   :  { %v1432_v31 = vpop.xlane.xlu2 %1431 }
 0xacb   :  { %v1442_v28 = vmul.f32 %v1432_v31, %v4568_v14 }
 0xacd   :  { %v1446_v36 = vsub.f32 %v1424_v41, %v1442_v28 }
 0xacf   :  { %v1450_v56 = vmul.f32 %v1446_v36, %v1446_v36 }
 0xad1   :  { %v1454_v42 = vsel %vm70_vm0, %v1450_v56, 0.0 }
 0xad2   :  { %1455 = vadd.xlane.f32.xlu2 %v1454_v42 }
 0xad8   :  { %v1435_v29 = vpop.xlane.xlu0 %1434 }
 0xad9   :  { %v1443_v32 = vmul.f32 %v1435_v29, %v4568_v14 }
 0xadb   :  { %v1447_v57 = vsub.f32 %v1425_v45, %v1443_v32 }
 0xadd   :  { %v1451_v59 = vmul.f32 %v1447_v57, %v1447_v57 }
 0xadf   :  { %v1457_v60 = vsel %vm70_vm0, %v1451_v59, 0.0 }
 0xae0   :  { %1458 = vadd.xlane.f32.xlu2 %v1457_v60 }
 0xb1f   :  { %v1438_v27 = vpop.xlane.xlu1 %1437 }
 0xb20   :  { %v1444_v61 = vmul.f32 %v1438_v27, %v4568_v14 }
 0xb22   :  { %v4939_v63 = vsub.f32 %v1426_v52, %v1444_v61 }
 0xb24   :  { %v1452_v2 = vmul.f32 %v4939_v63, %v4939_v63 }
 0xb26   :  { %v1460_v51 = vsel %vm70_vm0, %v1452_v2, 0.0 }
 0xb27   :  { %1461 = vadd.xlane.f32.xlu1 %v1460_v51  ;;  %v1441_v3 = vpop.xlane.xlu0 %1440 }
 0xb28   :  { %v1445_v62 = vmul.f32 %v1441_v3, %v4568_v14 }
 0xb2a   :  { %v4945_v4 = vsub.f32 %v1427_v13, %v1445_v62 }
 0xb2c   :  { %v1453_v5 = vmul.f32 %v4945_v4, %v4945_v4 }
 0xb2e   :  { %v1463_v6 = vsel %vm70_vm0, %v1453_v5, 0.0 }
 0xb2f   :  { %1464 = vadd.xlane.f32.xlu0 %v1463_v6 }
 0xb45   :  { %v1456_v15 = vpop.xlane.xlu2 %1455 }
 0xb46   :  { %v1466_v17 = vmul.f32 %v1456_v15, %v4568_v14 }
 0xb48   :  { %v1470_v19 = vadd.f32 1e-12, %v1466_v17 }
 0xb4a   :  { %4199 = vrsqrt.f32 %v1470_v19  ;;  %vm1480_vm3 = vweird.f32 %v1470_v19 }
 0xb50   :  { %v4200_v20 = vpop.eup %4199 }
 0xb51   :  { %v1475_v22 = vmul.f32 %v4200_v20, %v1470_v19  ;;  %vm1481_vm2 = vweird.f32 %v4200_v20  ;;  %v1748_v19 = vld [vmem:[%s5634_s12 + $0x38] sm:$0xff] }
 0xb52   :  { %vm1482_vm4 = vmor %vm1480_vm3, %vm1481_vm2  ;;  %1774 = vmatpush.msrb.mxu3 %v1748_v19 }
 0xb53   :  { %v1476_v24 = vmul.f32 %v4200_v20, %v1475_v22  ;;  %v1459_v10 = vpop.xlane.xlu2 %1458 }
 0xb54   :  { %v1467_v25 = vmul.f32 %v1459_v10, %v4568_v14 }
 0xb55   :  { %v1477_v33 = vmul.f32 0.5, %v1476_v24  ;;  %v1746_v24 = vld [vmem:[%s5634_s12 + $0x28] sm:$0xff] }
 0xb56   :  { %v1471_v34 = vadd.f32 1e-12, %v1467_v25  ;;  %v1745_v25 = vld [vmem:[%s5634_s12 + $0x20] sm:$0xff] }
 0xb57   :  { %v1478_v26 = vsub.f32 1.5, %v1477_v33 }
 0xb58   :  { %4201 = vrsqrt.f32 %v1471_v34  ;;  %vm1490_vm6 = vweird.f32 %v1471_v34 }
 0xb59   :  { %v1479_v38 = vmul.f32 %v4200_v20, %v1478_v26 }
 0xb5b   :  { %v1483_v30 = vsel %vm1482_vm4, %v4200_v20, %v1479_v38  ;;  %v1747_v20 = vld [vmem:[%s5634_s12 + $0x30] sm:$0xff]  ;;  %v1744_v38 = vld [vmem:[%s5634_s12 + $0x18] sm:$0xff] }
 0xb5c   :  { %v1514_v23 = vmul.f32 %v1483_v30, %v1446_v36  ;;  %1775 = vmatpush.msrb.mxu3 %v1747_v20 }
 0xb5e   :  { %v4202_v35 = vpop.eup %4201  ;;  %v1521_v37 = vmul.f32 %v4110_v1, %v1514_v23  ;;  %1776 = vmatpush.msrb.mxu3 %v1746_v24  ;;  %v1743_v23 = vld [vmem:[%s5634_s12 + $0x10] sm:$0xff] }
 0xb5f   :  { %v1485_v18 = vmul.f32 %v4202_v35, %v1471_v34  ;;  %vm1491_vm5 = vweird.f32 %v4202_v35 }
 0xb60   :  { %v4970_v39 = vadd.f32 %v4111_v21, %v1521_v37  ;;  %vm1492_vm7 = vmor %vm1490_vm6, %vm1491_vm5  ;;  %1777 = vmatpush.msrb.mxu3 %v1745_v25 }
 0xb61   :  { %v1486_v40 = vmul.f32 %v4202_v35, %v1485_v18 }
 0xb62   :  { %3943 = vmatmul.msk.f32.vlgmr.msrb.gmra.mxu2 %vm70_vm0, %v4970_v39  ;;  %1778 = vmatpush.msrb.mxu3 %v1744_v38 }
 0xb63   :  { %v1487_v41 = vmul.f32 0.5, %v1486_v40  ;;  %v1742_v40 = vld [vmem:[%s5634_s12 + $0x8] sm:$0xff] }
 0xb64   :  { %1779 = vmatpush.msrb.mxu3 %v1743_v23 }
 0xb65   :  { %v1488_v43 = vsub.f32 1.5, %v1487_v41 }
 0xb66   :  { %1780 = vmatpush.msrb.mxu3 %v1742_v40 }
 0xb67   :  { %v1489_v44 = vmul.f32 %v4202_v35, %v1488_v43  ;;  %v1741_v43 = vld [vmem:[%s5634_s12] sm:$0xff] }
 0xb68   :  { %1781 = vmatpush.msrb.mxu3 %v1741_v43 }
 0xb69   :  { %v1493_v11 = vsel %vm1492_vm7, %v4202_v35, %v1489_v44 }
 0xb6a   :  { %v1515_v45 = vmul.f32 %v1493_v11, %v1447_v57 }
 0xb6c   :  { %v1522_v46 = vmul.f32 %v4110_v1, %v1515_v45 }
 0xb6e   :  { %v4974_v48 = vadd.f32 %v4111_v21, %v1522_v46 }
 0xb70   :  { %3944 = vmatmul.msk.f32.gmra.mxu2 %vm70_vm0, %v4974_v48 }
 0xb9a   :  { %v1462_v50 = vpop.xlane.xlu1 %1461 }
 0xb9b   :  { %v1468_v52 = vmul.f32 %v1462_v50, %v4568_v14 }
 0xb9d   :  { %v1472_v53 = vadd.f32 1e-12, %v1468_v52 }
 0xb9f   :  { %4203 = vrsqrt.f32 %v1472_v53  ;;  %vm1500_vm9 = vweird.f32 %v1472_v53 }
 0xba2   :  { %v1465_v54 = vpop.xlane.xlu0 %1464 }
 0xba3   :  { %v1469_v16 = vmul.f32 %v1465_v54, %v4568_v14 }
 0xba5   :  { %v4204_v13 = vpop.eup %4203  ;;  %v1473_v55 = vadd.f32 1e-12, %v1469_v16 }
 0xba6   :  { %v1495_v31 = vmul.f32 %v4204_v13, %v1472_v53  ;;  %vm1501_vm8 = vweird.f32 %v4204_v13 }
 0xba7   :  { %4205 = vrsqrt.f32 %v1473_v55  ;;  %vm1502_vm10 = vmor %vm1500_vm9, %vm1501_vm8  ;;  %vm1510_vm12 = vweird.f32 %v1473_v55 }
 0xba8   :  { %v1496_v28 = vmul.f32 %v4204_v13, %v1495_v31 }
 0xbaa   :  { %v1497_v36 = vmul.f32 0.5, %v1496_v28 }
 0xbac   :  { %v1498_v56 = vsub.f32 1.5, %v1497_v36 }
 0xbad   :  { %v4206_v42 = vpop.eup %4205 }
 0xbae   :  { %v1499_v29 = vmul.f32 %v4204_v13, %v1498_v56  ;;  %v1505_v32 = vmul.f32 %v4206_v42, %v1473_v55  ;;  %vm1511_vm11 = vweird.f32 %v4206_v42 }
 0xbaf   :  { %vm1512_vm13 = vmor %vm1510_vm12, %vm1511_vm11  ;;  %vm1753_vm11 = vcmask 523264  }
 0xbb0   :  { %v1503_v57 = vsel %vm1502_vm10, %v4204_v13, %v1499_v29  ;;  %v1506_v59 = vmul.f32 %v4206_v42, %v1505_v32 }
 0xbb1   :  { %v1516_v60 = vmul.f32 %v1503_v57, %v4939_v63  ;;  %v4993_v63 = vld [vmem:[%s5633_s11] ss:$0 sm:$0xff] }
 0xbb2   :  { %v1507_v27 = vmul.f32 0.5, %v1506_v59 }
 0xbb3   :  { %v1523_v61 = vmul.f32 %v4110_v1, %v1516_v60 }
 0xbb4   :  { %v1508_v2 = vsub.f32 1.5, %v1507_v27 }
 0xbb5   :  { %v4981_v51 = vadd.f32 %v4111_v21, %v1523_v61 }
 0xbb6   :  { %v1509_v3 = vmul.f32 %v4206_v42, %v1508_v2 }
 0xbb7   :  { %3945 = vmatmul.msk.f32.gmra.mxu2 %vm70_vm0, %v4981_v51 }
 0xbb8   :  { %v1513_v62 = vsel %vm1512_vm13, %v4206_v42, %v1509_v3 }
 0xbb9   :  { %v1517_v5 = vmul.f32 %v1513_v62, %v4945_v4 }
 0xbbb   :  { %v1524_v6 = vmul.f32 %v4110_v1, %v1517_v5 }
 0xbbd   :  { %v4986_v7 = vadd.f32 %v4111_v21, %v1524_v6 }
 0xbbf   :  { %3946 = vmatmul.msk.f32.gmra.mxu2 %vm70_vm0, %v4986_v7 }
 0xbe5   :  { %v1569_v9 = vpop.f32.mrf.mxu2 }
 0xbe6   :  { %v4996_v8 = vadd.f32 %v4993_v63, %v1569_v9 }
 0xbe8   :  { %v4999_v12 = vmul.f32 0.70710677, %v4996_v8 }
 0xbea   :  { %v1589_v4 = vand.u32 2147483647, %v4999_v12  ;;  %vm1721_vm10 = vcmp.ge.f32.partialorder %v4999_v12, 0.0 }
 0xbec   :  { %v1593_v15 = vmul.f32 0.3275911, %v1589_v4  ;;  %v1697_v50 = vsub.f32 0.0, %v1589_v4 }
 0xbee   :  { %v1597_v17 = vadd.f32 1.0, %v1593_v15  ;;  %v1701_v16 = vmul.f32 %v1697_v50, %v1589_v4 }
 0xbf0   :  { %4207 = vrcp.f32 %v1597_v17  ;;  %v1612_v21 = vand.u32 2147483648, %v1597_v17  ;;  %v1610_v18 = vand.u32 2147483647, %v1597_v17  ;;  %vm1606_vm3 = vweird.f32 %v1597_v17 }
 0xbf1   :  { %v1705_v36 = vmul.f32 1.442695, %v1701_v16 }
 0xbf2   :  { %v1613_v11 = vor.u32 1.1754944e-38, %v1612_v21  ;;  %vm1611_vm5 = vcmp.eq.f32.partialorder %v1610_v18, 8.507059e+37 }
 0xbf3   :  { %v1572_v22 = vpop.f32.mrf.mxu2 }
 0xbf4   :  { %v5012_v10 = vadd.f32 %v4993_v63, %v1572_v22 }
 0xbf6   :  { %v4208_v33 = vpop.eup %4207  ;;  %v5018_v34 = vmul.f32 0.70710677, %v5012_v10 }
 0xbf7   :  { %v1602_v26 = vmul.f32 %v4208_v33, %v1597_v17  ;;  %vm1607_vm2 = vweird.f32 %v4208_v33 }
 0xbf8   :  { %v1590_v1 = vand.u32 2147483647, %v5018_v34  ;;  %vm1608_vm4 = vmor %vm1606_vm3, %vm1607_vm2  ;;  %vm1722_vm12 = vcmp.ge.f32.partialorder %v5018_v34, 0.0 }
 0xbf9   :  { %v1603_v30 = vsub.f32 1.0, %v1602_v26 }
 0xbfa   :  { %v1594_v35 = vmul.f32 0.3275911, %v1590_v1  ;;  %v1698_v2 = vsub.f32 0.0, %v1590_v1 }
 0xbfb   :  { %v1604_v37 = vmul.f32 %v4208_v33, %v1603_v30  ;;  %v1581_v30 = vmul.f32 0.5, %v4996_v8 }
 0xbfc   :  { %v1598_v41 = vadd.f32 1.0, %v1594_v35  ;;  %v1702_v15 = vmul.f32 %v1698_v2, %v1590_v1 }
 0xbfd   :  { %v1605_v44 = vadd.f32 %v4208_v33, %v1604_v37 }
 0xbfe   :  { %4209 = vrcp.f32 %v1598_v41  ;;  %v1627_v56 = vand.u32 2147483648, %v1598_v41  ;;  %v1625_v32 = vand.u32 2147483647, %v1598_v41  ;;  %vm1621_vm7 = vweird.f32 %v1598_v41 }
 0xbff   :  { %v1609_v45 = vsel %vm1608_vm4, %v4208_v33, %v1605_v44  ;;  %4211 = vpow2.f32 %v1705_v36  ;;  %v1707_v24 = vmul.f32 1.442695, %v1702_v15  ;;  %v1582_v44 = vmul.f32 0.5, %v5012_v10 }
 0xc00   :  { %v1614_v46 = vsel %vm1611_vm5, %v1613_v11, %v1609_v45  ;;  %v1628_v60 = vor.u32 1.1754944e-38, %v1627_v56  ;;  %vm1626_vm9 = vcmp.eq.f32.partialorder %v1625_v32, 8.507059e+37 }
 0xc01   :  { %v1661_v52 = vmul.f32 1.0614054, %v1614_v46  ;;  %4213 = vpow2.f32 %v1707_v24 }
 0xc03   :  { %v1665_v53 = vadd.f32 -1.4531521, %v1661_v52 }
 0xc04   :  { %v4210_v54 = vpop.eup %4209 }
 0xc05   :  { %v1669_v13 = vmul.f32 %v1665_v53, %v1614_v46  ;;  %v1617_v55 = vmul.f32 %v4210_v54, %v1598_v41  ;;  %vm1622_vm6 = vweird.f32 %v4210_v54  ;;  %v4212_v4 = vpop.eup %4211 }
 0xc06   :  { %vm1623_vm8 = vmor %vm1621_vm7, %vm1622_vm6 }
 0xc07   :  { %v1673_v31 = vadd.f32 1.4214138, %v1669_v13  ;;  %v1618_v28 = vsub.f32 1.0, %v1617_v55  ;;  %v4214_v18 = vpop.eup %4213 }
 0xc09   :  { %v1677_v42 = vmul.f32 %v1673_v31, %v1614_v46  ;;  %v1619_v29 = vmul.f32 %v4210_v54, %v1618_v28 }
 0xc0b   :  { %v1681_v57 = vadd.f32 -0.28449672, %v1677_v42  ;;  %v1620_v59 = vadd.f32 %v4210_v54, %v1619_v29 }
 0xc0d   :  { %v1685_v27 = vmul.f32 %v1681_v57, %v1614_v46  ;;  %v1624_v61 = vsel %vm1623_vm8, %v4210_v54, %v1620_v59 }
 0xc0e   :  { %v1629_v3 = vsel %vm1626_vm9, %v1628_v60, %v1624_v61 }
 0xc0f   :  { %v1689_v62 = vadd.f32 0.2548296, %v1685_v27  ;;  %v1662_v5 = vmul.f32 1.0614054, %v1629_v3 }
 0xc11   :  { %v1693_v6 = vmul.f32 %v1689_v62, %v1614_v46  ;;  %v1666_v9 = vadd.f32 -1.4531521, %v1662_v5 }
 0xc13   :  { %v1713_v17 = vmul.f32 %v4212_v4, %v1693_v6  ;;  %v1670_v19 = vmul.f32 %v1666_v9, %v1629_v3 }
 0xc15   :  { %v1717_v20 = vsub.f32 1.0, %v1713_v17  ;;  %v1674_v22 = vadd.f32 1.4214138, %v1670_v19 }
 0xc17   :  { %v1725_v25 = vsub.f32 0.0, %v1717_v20  ;;  %v1678_v33 = vmul.f32 %v1674_v22, %v1629_v3 }
 0xc19   :  { %v1729_v26 = vsel %vm1721_vm10, %v1717_v20, %v1725_v25  ;;  %v1682_v38 = vadd.f32 -0.28449672, %v1678_v33 }
 0xc1a   :  { %v1733_v23 = vadd.f32 1.0, %v1729_v26 }
 0xc1b   :  { %v1686_v21 = vmul.f32 %v1682_v38, %v1629_v3 }
 0xc1c   :  { %v1737_v35 = vmul.f32 %v1733_v23, %v1581_v30 }
 0xc1d   :  { %v1690_v37 = vadd.f32 0.2548296, %v1686_v21 }
 0xc1e   :  { %3947 = vmatmul.msk.f32.vlgmr.msrb.gmra.mxu3 %vm1753_vm11, %v1737_v35 }
 0xc1f   :  { %v1694_v1 = vmul.f32 %v1690_v37, %v1629_v3 }
 0xc21   :  { %v1714_v40 = vmul.f32 %v4214_v18, %v1694_v1 }
 0xc23   :  { %v1718_v41 = vsub.f32 1.0, %v1714_v40 }
 0xc25   :  { %v1726_v43 = vsub.f32 0.0, %v1718_v41 }
 0xc27   :  { %v1730_v12 = vsel %vm1722_vm12, %v1718_v41, %v1726_v43 }
 0xc28   :  { %v1734_v11 = vadd.f32 1.0, %v1730_v12 }
 0xc2a   :  { %v1738_v8 = vmul.f32 %v1734_v11, %v1582_v44 }
 0xc2c   :  { %3948 = vmatmul.msk.f32.gmra.mxu3 %vm1753_vm11, %v1738_v8 }
 0xc3a   :  { %v1575_v45 = vpop.f32.mrf.mxu2 }
 0xc3b   :  { %v5040_v46 = vadd.f32 %v4993_v63, %v1575_v45 }
 0xc3d   :  { %v5043_v50 = vmul.f32 0.70710677, %v5040_v46 }
 0xc3f   :  { %v1591_v52 = vand.u32 2147483647, %v5043_v50  ;;  %vm1723_vm9 = vcmp.ge.f32.partialorder %v5043_v50, 0.0 }
 0xc41   :  { %v1595_v53 = vmul.f32 0.3275911, %v1591_v52  ;;  %v1699_v27 = vsub.f32 0.0, %v1591_v52 }
 0xc42   :  { %v1578_v54 = vpop.f32.mrf.mxu2 }
 0xc43   :  { %v1599_v16 = vadd.f32 1.0, %v1595_v53  ;;  %v5047_v34 = vadd.f32 %v4993_v63, %v1578_v54  ;;  %v1703_v9 = vmul.f32 %v1699_v27, %v1591_v52 }
 0xc45   :  { %4215 = vrcp.f32 %v1599_v16  ;;  %v5050_v10 = vmul.f32 0.70710677, %v5047_v34  ;;  %v1642_v42 = vand.u32 2147483648, %v1599_v16  ;;  %v1640_v32 = vand.u32 2147483647, %v1599_v16 }
 0xc46   :  { %vm1636_vm2 = vweird.f32 %v1599_v16  ;;  %v1709_v24 = vmul.f32 1.442695, %v1703_v9 }
 0xc47   :  { %v1592_v13 = vand.u32 2147483647, %v5050_v10  ;;  %v1643_v63 = vor.u32 1.1754944e-38, %v1642_v42  ;;  %vm1641_vm4 = vcmp.eq.f32.partialorder %v1640_v32, 8.507059e+37  ;;  %vm1724_vm10 = vcmp.ge.f32.partialorder %v5050_v10, 0.0 }
 0xc49   :  { %v1596_v55 = vmul.f32 0.3275911, %v1592_v13  ;;  %v1700_v33 = vsub.f32 0.0, %v1592_v13 }
 0xc4b   :  { %v4216_v31 = vpop.eup %4215  ;;  %v1600_v36 = vadd.f32 1.0, %v1596_v55  ;;  %v1704_v35 = vmul.f32 %v1700_v33, %v1592_v13  ;;  %v1583_v13 = vmul.f32 0.5, %v5040_v46  ;;  %v4113_v46 = vld [vmem:[%s5635_s13] ss:$0 sm:$0xff] }
 0xc4c   :  { %v1632_v28 = vmul.f32 %v4216_v31, %v1599_v16  ;;  %vm1637_vm13 = vweird.f32 %v4216_v31 }
 0xc4d   :  { %4217 = vrcp.f32 %v1600_v36  ;;  %vm1638_vm3 = vmor %vm1636_vm2, %vm1637_vm13  ;;  %v1657_v5 = vand.u32 2147483648, %v1600_v36  ;;  %v1655_v15 = vand.u32 2147483647, %v1600_v36  ;;  %vm1651_vm6 = vweird.f32 %v1600_v36 }
 0xc4e   :  { %v1633_v56 = vsub.f32 1.0, %v1632_v28  ;;  %4219 = vpow2.f32 %v1709_v24  ;;  %v1711_v41 = vmul.f32 1.442695, %v1704_v35 }
 0xc4f   :  { %v1658_v20 = vor.u32 1.1754944e-38, %v1657_v5  ;;  %vm1656_vm8 = vcmp.eq.f32.partialorder %v1655_v15, 8.507059e+37 }
 0xc50   :  { %v1634_v29 = vmul.f32 %v4216_v31, %v1633_v56  ;;  %4221 = vpow2.f32 %v1711_v41 }
 0xc52   :  { %v1635_v57 = vadd.f32 %v4216_v31, %v1634_v29 }
 0xc53   :  { %v4218_v59 = vpop.eup %4217 }
 0xc54   :  { %v1639_v60 = vsel %vm1638_vm3, %v4216_v31, %v1635_v57  ;;  %v1647_v61 = vmul.f32 %v4218_v59, %v1600_v36  ;;  %vm1652_vm5 = vweird.f32 %v4218_v59  ;;  %v4220_v12 = vpop.eup %4219  ;;  %v1584_v57 = vmul.f32 0.5, %v5047_v34 }
 0xc55   :  { %v1644_v2 = vsel %vm1641_vm4, %v1643_v63, %v1639_v60  ;;  %vm1653_vm7 = vmor %vm1651_vm6, %vm1652_vm5 }
 0xc56   :  { %v1663_v3 = vmul.f32 1.0614054, %v1644_v2  ;;  %v1648_v62 = vsub.f32 1.0, %v1647_v61  ;;  %v4222_v28 = vpop.eup %4221 }
 0xc58   :  { %v1667_v6 = vadd.f32 -1.4531521, %v1663_v3  ;;  %v1649_v4 = vmul.f32 %v4218_v59, %v1648_v62 }
 0xc5a   :  { %v1671_v17 = vmul.f32 %v1667_v6, %v1644_v2  ;;  %v1650_v19 = vadd.f32 %v4218_v59, %v1649_v4 }
 0xc5c   :  { %v1675_v22 = vadd.f32 1.4214138, %v1671_v17  ;;  %v1654_v25 = vsel %vm1653_vm7, %v4218_v59, %v1650_v19 }
 0xc5d   :  { %v1659_v38 = vsel %vm1656_vm8, %v1658_v20, %v1654_v25 }
 0xc5e   :  { %v1679_v26 = vmul.f32 %v1675_v22, %v1644_v2  ;;  %v1664_v30 = vmul.f32 1.0614054, %v1659_v38 }
 0xc60   :  { %v1683_v23 = vadd.f32 -0.28449672, %v1679_v26  ;;  %v1668_v21 = vadd.f32 -1.4531521, %v1664_v30 }
 0xc62   :  { %v1687_v37 = vmul.f32 %v1683_v23, %v1644_v2  ;;  %v1672_v1 = vmul.f32 %v1668_v21, %v1659_v38 }
 0xc64   :  { %v1691_v18 = vadd.f32 0.2548296, %v1687_v37  ;;  %v1676_v40 = vadd.f32 1.4214138, %v1672_v1 }
 0xc66   :  { %v1695_v43 = vmul.f32 %v1691_v18, %v1644_v2  ;;  %v1680_v44 = vmul.f32 %v1676_v40, %v1659_v38 }
 0xc68   :  { %v1715_v11 = vmul.f32 %v4220_v12, %v1695_v43  ;;  %v1684_v8 = vadd.f32 -0.28449672, %v1680_v44  ;;  %v3954_v43 = vld [vmem:[%s5667_s29 + $0x38] sm:$0xff]  ;;  %v3953_v12 = vld [vmem:[%s5667_s29 + $0x30] sm:$0xff]  ;;  %v3952_v44 = vld [vmem:[%s5667_s29 + $0x28] sm:$0xff] }
 0xc69   :  { %1937 = vmatpush.msra.mxu0 %v3954_v43 }
 0xc6a   :  { %v1719_v45 = vsub.f32 1.0, %v1715_v11  ;;  %v1688_v52 = vmul.f32 %v1684_v8, %v1659_v38  ;;  %v3951_v11 = vld [vmem:[%s5667_s29 + $0x20] sm:$0xff] }
 0xc6b   :  { %1938 = vmatpush.msra.mxu0 %v3953_v12 }
 0xc6c   :  { %v1727_v53 = vsub.f32 0.0, %v1719_v45  ;;  %v1692_v54 = vadd.f32 0.2548296, %v1688_v52 }
 0xc6d   :  { %1939 = vmatpush.msra.mxu0 %v3952_v44 }
 0xc6e   :  { %v1731_v16 = vsel %vm1723_vm9, %v1719_v45, %v1727_v53  ;;  %v1696_v31 = vmul.f32 %v1692_v54, %v1659_v38 }
 0xc6f   :  { %v1735_v55 = vadd.f32 1.0, %v1731_v16  ;;  %1940 = vmatpush.msra.mxu0 %v3951_v11 }
 0xc70   :  { %v1716_v56 = vmul.f32 %v4222_v28, %v1696_v31 }
 0xc71   :  { %v1739_v36 = vmul.f32 %v1735_v55, %v1583_v13 }
 0xc72   :  { %v1720_v42 = vsub.f32 1.0, %v1716_v56 }
 0xc73   :  { %3949 = vmatmul.msk.f32.gmra.mxu3 %vm1753_vm11, %v1739_v36 }
 0xc74   :  { %v1728_v29 = vsub.f32 0.0, %v1720_v42 }
 0xc76   :  { %v1732_v32 = vsel %vm1724_vm10, %v1720_v42, %v1728_v29  ;;  %v4114_v42 = vld [vmem:[%s5636_s14] ss:$0 sm:$0xff] }
 0xc77   :  { %v1736_v63 = vadd.f32 1.0, %v1732_v32 }
 0xc79   :  { %v1740_v50 = vmul.f32 %v1736_v63, %v1584_v57  ;;  %v4115_v57 = vld [vmem:[%s5637_s15] ss:$0 sm:$0xff] }
 0xc7b   :  { %3950 = vmatmul.msk.f32.gmra.mxu3 %vm1753_vm11, %v1740_v50 }
 0xca1   :  { %v1783_v59 = vpop.f32.mrf.mxu3 }
 0xca2   :  { %v1784_v60 = vadd.f32 %v4113_v46, %v1783_v59 }
 0xca4   :  { %v1795_v27 = vadd.f32 %v1784_v60, %v4970_v39 }
 0xca6   :  { %v1801_v61 = vsel %vm70_vm0, %v1795_v27, 0.0 }
 0xca7   :  { %1802 = vadd.xlane.f32.xlu2 %v1801_v61 }
 0xcaf   :  { %v1786_v2 = vpop.f32.mrf.mxu3 }
 0xcb0   :  { %v1787_v10 = vadd.f32 %v4113_v46, %v1786_v2 }
 0xcb2   :  { %v1796_v3 = vadd.f32 %v1787_v10, %v4974_v48 }
 0xcb4   :  { %v1804_v34 = vsel %vm70_vm0, %v1796_v3, 0.0 }
 0xcb5   :  { %1805 = vadd.xlane.f32.xlu1 %v1804_v34 }
 0xcf6   :  { %v1789_v62 = vpop.f32.mrf.mxu3 }
 0xcf7   :  { %v1790_v5 = vadd.f32 %v4113_v46, %v1789_v62 }
 0xcf9   :  { %v1797_v6 = vadd.f32 %v1790_v5, %v4981_v51 }
 0xcfb   :  { %v1807_v9 = vsel %vm70_vm0, %v1797_v6, 0.0 }
 0xcfc   :  { %1808 = vadd.xlane.f32.xlu0 %v1807_v9 }
 0xcfe   :  { %v1792_v4 = vpop.f32.mrf.mxu3 }
 0xcff   :  { %v1793_v15 = vadd.f32 %v4113_v46, %v1792_v4 }
 0xd01   :  { %v1798_v39 = vadd.f32 %v1793_v15, %v4986_v7 }
 0xd03   :  { %v1810_v17 = vsel %vm70_vm0, %v1798_v39, 0.0 }
 0xd04   :  { %1811 = vadd.xlane.f32.xlu1 %v1810_v17 }
 0xd1a   :  { %v1803_v19 = vpop.xlane.xlu2 %1802 }
 0xd1b   :  { %v1813_v48 = vmul.f32 %v1803_v19, %v4568_v14 }
 0xd1d   :  { %v1817_v20 = vsub.f32 %v1795_v27, %v1813_v48 }
 0xd1f   :  { %v1821_v22 = vmul.f32 %v1817_v20, %v1817_v20 }
 0xd21   :  { %v1825_v24 = vsel %vm70_vm0, %v1821_v22, 0.0 }
 0xd22   :  { %1826 = vadd.xlane.f32.xlu2 %v1825_v24 }
 0xd28   :  { %v1806_v25 = vpop.xlane.xlu1 %1805 }
 0xd29   :  { %v1814_v51 = vmul.f32 %v1806_v25, %v4568_v14 }
 0xd2b   :  { %v1818_v33 = vsub.f32 %v1796_v3, %v1814_v51 }
 0xd2d   :  { %v1822_v26 = vmul.f32 %v1818_v33, %v1818_v33 }
 0xd2f   :  { %v1828_v38 = vsel %vm70_vm0, %v1822_v26, 0.0 }
 0xd30   :  { %1829 = vadd.xlane.f32.xlu0 %v1828_v38 }
 0xd6f   :  { %v1809_v7 = vpop.xlane.xlu0 %1808 }
 0xd70   :  { %v1815_v30 = vmul.f32 %v1809_v7, %v4568_v14 }
 0xd72   :  { %v5075_v23 = vsub.f32 %v1797_v6, %v1815_v30 }
 0xd74   :  { %v1823_v21 = vmul.f32 %v5075_v23, %v5075_v23 }
 0xd76   :  { %v1831_v35 = vsel %vm70_vm0, %v1823_v21, 0.0 }
 0xd77   :  { %1832 = vadd.xlane.f32.xlu2 %v1831_v35  ;;  %v1812_v37 = vpop.xlane.xlu1 %1811 }
 0xd78   :  { %v1816_v1 = vmul.f32 %v1812_v37, %v4568_v14 }
 0xd7a   :  { %v5081_v18 = vsub.f32 %v1798_v39, %v1816_v1 }
 0xd7c   :  { %v1824_v40 = vmul.f32 %v5081_v18, %v5081_v18 }
 0xd7e   :  { %v1834_v41 = vsel %vm70_vm0, %v1824_v40, 0.0 }
 0xd7f   :  { %1835 = vadd.xlane.f32.xlu1 %v1834_v41 }
 0xd95   :  { %v1827_v8 = vpop.xlane.xlu2 %1826 }
 0xd96   :  { %v1837_v45 = vmul.f32 %v1827_v8, %v4568_v14 }
 0xd98   :  { %v1841_v52 = vadd.f32 1e-12, %v1837_v45 }
 0xd9a   :  { %4223 = vrsqrt.f32 %v1841_v52  ;;  %vm1851_vm13 = vweird.f32 %v1841_v52 }
 0xda0   :  { %v4224_v53 = vpop.eup %4223 }
 0xda1   :  { %v1846_v54 = vmul.f32 %v4224_v53, %v1841_v52  ;;  %vm1852_vm12 = vweird.f32 %v4224_v53 }
 0xda2   :  { %vm1853_vm2 = vmor %vm1851_vm13, %vm1852_vm12 }
 0xda3   :  { %v1847_v16 = vmul.f32 %v4224_v53, %v1846_v54  ;;  %v1830_v13 = vpop.xlane.xlu0 %1829 }
 0xda4   :  { %v1838_v55 = vmul.f32 %v1830_v13, %v4568_v14 }
 0xda5   :  { %v1848_v31 = vmul.f32 0.5, %v1847_v16 }
 0xda6   :  { %v1842_v28 = vadd.f32 1e-12, %v1838_v55 }
 0xda7   :  { %v1849_v36 = vsub.f32 1.5, %v1848_v31 }
 0xda8   :  { %4225 = vrsqrt.f32 %v1842_v28  ;;  %vm1861_vm4 = vweird.f32 %v1842_v28 }
 0xda9   :  { %v1850_v56 = vmul.f32 %v4224_v53, %v1849_v36 }
 0xdab   :  { %v1854_v29 = vsel %vm1853_vm2, %v4224_v53, %v1850_v56 }
 0xdac   :  { %v1885_v32 = vmul.f32 %v1854_v29, %v1817_v20 }
 0xdae   :  { %v4226_v63 = vpop.eup %4225  ;;  %v1892_v50 = vmul.f32 %v4114_v42, %v1885_v32 }
 0xdaf   :  { %v1856_v46 = vmul.f32 %v4226_v63, %v1842_v28  ;;  %vm1862_vm3 = vweird.f32 %v4226_v63 }
 0xdb0   :  { %v5106_v59 = vadd.f32 %v4115_v57, %v1892_v50  ;;  %vm1863_vm5 = vmor %vm1861_vm4, %vm1862_vm3 }
 0xdb1   :  { %v1857_v60 = vmul.f32 %v4226_v63, %v1856_v46 }
 0xdb2   :  { %3956 = vmatmul.msk.f32.vlgmr.msra.gmra.mxu0 %vm70_vm0, %v5106_v59 }
 0xdb3   :  { %v1858_v27 = vmul.f32 0.5, %v1857_v60 }
 0xdb5   :  { %v1859_v61 = vsub.f32 1.5, %v1858_v27 }
 0xdb7   :  { %v1860_v2 = vmul.f32 %v4226_v63, %v1859_v61 }
 0xdb9   :  { %v1864_v10 = vsel %vm1863_vm5, %v4226_v63, %v1860_v2 }
 0xdba   :  { %v1886_v3 = vmul.f32 %v1864_v10, %v1818_v33 }
 0xdbc   :  { %v1893_v34 = vmul.f32 %v4114_v42, %v1886_v3 }
 0xdbe   :  { %v5110_v62 = vadd.f32 %v4115_v57, %v1893_v34 }
 0xdc0   :  { %3957 = vmatmul.msk.f32.gmra.mxu0 %vm70_vm0, %v5110_v62 }
 0xdea   :  { %v1833_v5 = vpop.xlane.xlu2 %1832 }
 0xdeb   :  { %v1839_v6 = vmul.f32 %v1833_v5, %v4568_v14 }
 0xded   :  { %v1843_v9 = vadd.f32 1e-12, %v1839_v6 }
 0xdef   :  { %4227 = vrsqrt.f32 %v1843_v9  ;;  %vm1871_vm7 = vweird.f32 %v1843_v9 }
 0xdf2   :  { %v1836_v4 = vpop.xlane.xlu1 %1835 }
 0xdf3   :  { %v1840_v15 = vmul.f32 %v1836_v4, %v4568_v14 }
 0xdf5   :  { %v4228_v39 = vpop.eup %4227  ;;  %v1844_v19 = vadd.f32 1e-12, %v1840_v15 }
 0xdf6   :  { %v1866_v17 = vmul.f32 %v4228_v39, %v1843_v9  ;;  %vm1872_vm6 = vweird.f32 %v4228_v39 }
 0xdf7   :  { %4229 = vrsqrt.f32 %v1844_v19  ;;  %vm1873_vm8 = vmor %vm1871_vm7, %vm1872_vm6  ;;  %vm1881_vm10 = vweird.f32 %v1844_v19 }
 0xdf8   :  { %v1867_v48 = vmul.f32 %v4228_v39, %v1866_v17 }
 0xdfa   :  { %v1868_v20 = vmul.f32 0.5, %v1867_v48 }
 0xdfc   :  { %v1869_v22 = vsub.f32 1.5, %v1868_v20 }
 0xdfd   :  { %v4230_v24 = vpop.eup %4229 }
 0xdfe   :  { %v1870_v25 = vmul.f32 %v4228_v39, %v1869_v22  ;;  %v1876_v51 = vmul.f32 %v4230_v24, %v1844_v19  ;;  %vm1882_vm9 = vweird.f32 %v4230_v24 }
 0xdff   :  { %vm1883_vm12 = vmor %vm1881_vm10, %vm1882_vm9 }
 0xe00   :  { %v1874_v33 = vsel %vm1873_vm8, %v4228_v39, %v1870_v25  ;;  %v1877_v26 = vmul.f32 %v4230_v24, %v1876_v51 }
 0xe01   :  { %v1887_v38 = vmul.f32 %v1874_v33, %v5075_v23  ;;  %v4116_v23 = vld [vmem:[%s5627_s5 + $0x1] ss:$0 sm:$0xff]  ;;  %s5671_s5 = smov 80  }
 0xe02   :  { %v1878_v7 = vmul.f32 0.5, %v1877_v26 }
 0xe03   :  { %v1894_v30 = vmul.f32 %v4114_v42, %v1887_v38 }
 0xe04   :  { %v1879_v21 = vsub.f32 1.5, %v1878_v7 }
 0xe05   :  { %v5117_v35 = vadd.f32 %v4115_v57, %v1894_v30 }
 0xe06   :  { %v1880_v37 = vmul.f32 %v4230_v24, %v1879_v21 }
 0xe07   :  { %3958 = vmatmul.msk.f32.gmra.mxu0 %vm70_vm0, %v5117_v35 }
 0xe08   :  { %v1884_v1 = vsel %vm1883_vm12, %v4230_v24, %v1880_v37 }
 0xe09   :  { %v1888_v40 = vmul.f32 %v1884_v1, %v5081_v18 }
 0xe0b   :  { %v1895_v41 = vmul.f32 %v4114_v42, %v1888_v40 }
 0xe0d   :  { %v5122_v43 = vadd.f32 %v4115_v57, %v1895_v41 }
 0xe0f   :  { %3959 = vmatmul.msk.f32.gmra.mxu0 %vm70_vm0, %v5122_v43 }
 0xe2f   :  { %v1942_v12 = vpop.f32.mrf.mxu0 }
 0xe30   :  { %v5129_v44 = vadd.f32 %v4116_v23, %v1942_v12 }
 0xe32   :  { %1955 = vrot.lane.b32.xlu0 %v5129_v44, %s4428_s30 }
 0xe3d   :  { %v1945_v11 = vpop.f32.mrf.mxu0 }
 0xe3e   :  { %v5133_v8 = vadd.f32 %v4116_v23, %v1945_v11 }
 0xe40   :  { %1982 = vrot.lane.b32.xlu2 %v5133_v8, %s4428_s30  ;;  %v5199_v41 = vpack.i.bf16 %v5133_v8, %v5129_v44 }
 0xe84   :  { %v1948_v18 = vpop.f32.mrf.mxu0 }
 0xe85   :  { %v5137_v45 = vadd.f32 %v4116_v23, %v1948_v18 }
 0xe87   :  { %2009 = vrot.lane.b32.xlu1 %v5137_v45, %s4428_s30 }
 0xe8c   :  { %v1951_v52 = vpop.f32.mrf.mxu0 }
 0xe8d   :  { %v5141_v53 = vadd.f32 %v4116_v23, %v1951_v52 }
 0xe8f   :  { %2140 = vrot.lane.b32.xlu1 %v5133_v8, %s4429_s22  ;;  %2036 = vrot.lane.b32.xlu0 %v5141_v53, %s4428_s30  ;;  %s5672_s30 = smov 56  }
 0xe97   :  { %2220 = vrot.lane.b32.xlu0 %v5129_v44, %s4430_s23 }
 0xe9a   :  { %v1983_v54 = vpop.permute.xlu2 %1982 }
 0xe9b   :  { %3962 = vmatpush.xpose.msk.msra.mxu2 %vm239_vm14, %v1983_v54 }
 0xe9e   :  { %3963 = vmatmul.msk.f32.vlgmr.msra.gmra.mxu2 %vm239_vm14, %v5133_v8 }
 0xea4   :  { %v1956_v16 = vpop.permute.xlu0 %1955 }
 0xea5   :  { %3960 = vmatpush.xpose.msk.msrb.mxu1 %vm239_vm14, %v1956_v16 }
 0xea8   :  { %3961 = vmatmul.msk.f32.vlgmr.msrb.gmra.mxu1 %vm239_vm14, %v5129_v44 }
 0xef9   :  { %v2010_v13 = vpop.permute.xlu1 %2009 }
 0xefa   :  { %3964 = vmatpush.xpose.msk.msrb.mxu0 %vm239_vm14, %v2010_v13 }
 0xefd   :  { %3965 = vmatmul.msk.f32.vlgmr.msrb.gmra.mxu0 %vm239_vm14, %v5137_v45 }
 0xf01   :  { %v2141_v55 = vpop.permute.xlu1 %2140  ;;  %v2037_v31 = vpop.permute.xlu0 %2036 }
 0xf02   :  { %2161 = vmatpush.msra.mxu3 %v2141_v55  ;;  %3966 = vmatpush.xpose.msk.msra.mxu1 %vm239_vm14, %v2037_v31 }
 0xf05   :  { %3967 = vmatmul.msk.f32.vlgmr.msra.gmra.mxu1 %vm239_vm14, %v5141_v53 }
 0xf09   :  { %v2221_v9 = vpop.permute.xlu0 %2220 }
 0xf21   :  { %v2005_v28 = vpop.f32.mrf.mxu2 }
 0xf22   :  { %v2063_v36 = vmul.f32 0.35355338, %v2005_v28 }
 0xf24   :  { %v2067_v56 = vadd.f32 %v2063_v36, %v4682_v0 }
 0xf25   :  { %v1978_v42 = vpop.f32.mrf.mxu1 }
 0xf26   :  { %v2062_v29 = vmul.f32 0.35355338, %v1978_v42  ;;  %v2073_v32 = vsel %vm239_vm14, %v2067_v56, -inf }
 0xf27   :  { %2074 = vmax.xlane.f32.xlu0 %v2073_v32 }
 0xf28   :  { %v2066_v57 = vadd.f32 %v2062_v29, %v4672_v49 }
 0xf2a   :  { %v2070_v63 = vsel %vm239_vm14, %v2066_v57, -inf }
 0xf2b   :  { %2071 = vmax.xlane.f32.xlu2 %v2070_v63 }
 0xf43   :  { %2114 = vrot.lane.b32.xlu2 %v5129_v44, %s4429_s22 }
 0xf7a   :  { %v2032_v50 = vpop.f32.mrf.mxu0 }
 0xf7b   :  { %v2064_v46 = vmul.f32 0.35355338, %v2032_v50 }
 0xf7d   :  { %v2068_v60 = vadd.f32 %v2064_v46, %v4670_v47 }
 0xf7f   :  { %v2076_v27 = vsel %vm239_vm14, %v2068_v60, -inf }
 0xf80   :  { %2077 = vmax.xlane.f32.xlu1 %v2076_v27 }
 0xf82   :  { %v2059_v61 = vpop.f32.mrf.mxu1 }
 0xf83   :  { %v2065_v2 = vmul.f32 0.35355338, %v2059_v61 }
 0xf85   :  { %v2069_v10 = vadd.f32 %v2065_v2, %v4678_v58 }
 0xf87   :  { %v2079_v3 = vsel %vm239_vm14, %v2069_v10, -inf }
 0xf88   :  { %2080 = vmax.xlane.f32.xlu2 %v2079_v3 }
 0xf99   :  { %2246 = vrot.lane.b32.xlu1 %v5133_v8, %s4431_s24 }
 0xf9a   :  { %v2075_v17 = vpop.xlane.xlu0 %2074 }
 0xf9b   :  { %v2083_v19 = vsub.f32 %v2067_v56, %v2075_v17 }
 0xf9d   :  { %v2088_v48 = vmul.f32 1.442695, %v2083_v19 }
 0xf9e   :  { %v2072_v34 = vpop.xlane.xlu2 %2071 }
 0xf9f   :  { %v2082_v5 = vsub.f32 %v2066_v57, %v2072_v34 }
 0xfa0   :  { %2248 = vrot.lane.b32.xlu2 %v5133_v8, %s4430_s23 }
 0xfa1   :  { %v2086_v6 = vmul.f32 1.442695, %v2082_v5 }
 0xfa3   :  { %4231 = vpow2.f32 %v2086_v6 }
 0xfa4   :  { %4233 = vpow2.f32 %v2088_v48 }
 0xfa6   :  { %v2115_v4 = vpop.permute.xlu2 %2114 }
 0xfa7   :  { %2135 = vmatpush.msrb.mxu2 %v2115_v4 }
 0xfa9   :  { %3972 = vmatpush.xpose.msk.msra.mxu2 %vm239_vm14, %v2221_v9  ;;  %v4232_v15 = vpop.eup %4231 }
 0xfaa   :  { %v2094_v39 = vsel %vm239_vm14, %v4232_v15, 0.0  ;;  %v4234_v20 = vpop.eup %4233 }
 0xfab   :  { %2095 = vadd.xlane.f32.xlu0 %v2094_v39  ;;  %v2097_v22 = vsel %vm239_vm14, %v4234_v20, 0.0 }
 0xfbf   :  { %2218 = vrot.lane.b32.xlu0 %v5129_v44, %s4431_s24 }
 0xfc3   :  { %2098 = vadd.xlane.f32.xlu1 %v2097_v22 }
 0xfdc   :  { %2166 = vrot.lane.b32.xlu1 %v5137_v45, %s4429_s22 }
 0xfe4   :  { %2276 = vrot.lane.b32.xlu1 %v5137_v45, %s4430_s23 }
 0xfec   :  { %2192 = vrot.lane.b32.xlu1 %v5141_v53, %s4429_s22  ;;  %s5673_s22 = smov 112  }
 0xff3   :  { %v2078_v24 = vpop.xlane.xlu1 %2077 }
 0xff4   :  { %v2084_v25 = vsub.f32 %v2068_v60, %v2078_v24  ;;  %2274 = vrot.lane.b32.xlu1 %v5137_v45, %s4431_s24 }
 0xff6   :  { %v2090_v51 = vmul.f32 1.442695, %v2084_v25 }
 0xff8   :  { %4235 = vpow2.f32 %v2090_v51 }
 0xffb   :  { %v2081_v33 = vpop.xlane.xlu2 %2080 }
 0xffc   :  { %2304 = vrot.lane.b32.xlu1 %v5141_v53, %s4430_s23  ;;  %v2085_v26 = vsub.f32 %v2069_v10, %v2081_v33  ;;  %s5674_s23 = smov 48  }
 0xffe   :  { %v4236_v38 = vpop.eup %4235  ;;  %v2092_v7 = vmul.f32 1.442695, %v2085_v26 }
 0xfff   :  { %v2100_v30 = vsel %vm239_vm14, %v4236_v38, 0.0 }
0x1000   :  { %2101 = vadd.xlane.f32.xlu0 %v2100_v30  ;;  %4237 = vpow2.f32 %v2092_v7 }
0x1003   :  { %v2249_v21 = vpop.permute.xlu2 %2248 }
0x1004   :  { %3974 = vmatpush.xpose.msk.msrb.mxu3 %vm239_vm14, %v2249_v21 }
0x1006   :  { %v4238_v37 = vpop.eup %4237 }
0x1007   :  { %v2103_v1 = vsel %vm239_vm14, %v4238_v37, 0.0 }
0x1008   :  { %2104 = vadd.xlane.f32.xlu2 %v2103_v1 }
0x100b   :  { %v2247_v11 = vpop.permute.xlu1 %2246 }
0x1014   :  { %2302 = vrot.lane.b32.xlu0 %v5141_v53, %s4431_s24  ;;  %s5675_s24 = smov 72  }
0x101c   :  { %2516 = vrot.lane.b32.xlu0 %v5133_v8, %s5671_s5 }
0x101e   :  { %v2096_v40 = vpop.xlane.xlu0 %2095 }
0x101f   :  { %4239 = vrcp.f32 %v2096_v40 }
0x1020   :  { %4092 = vrot.lane.b32.xlu2 %v5199_v41, %s5672_s30 }
0x1025   :  { %v4240_v23 = vpop.eup %4239 }
0x1026   :  { %v2110_v12 = vmul.f32 %v4240_v23, %v4232_v15 }
0x1028   :  { %3968 = vmatmul.msk.f32.vlgmr.msrb.gmra.mxu2 %vm239_vm14, %v2110_v12 }
0x1031   :  { %v2219_v18 = vpop.permute.xlu0 %2218 }
0x1032   :  { %3973 = vmatmul.msk.f32.vlgmr.msra.gmra.mxu2 %vm239_vm14, %v2219_v18 }
0x1036   :  { %v2099_v52 = vpop.xlane.xlu1 %2098 }
0x1037   :  { %4241 = vrcp.f32 %v2099_v52 }
0x103d   :  { %v4242_v54 = vpop.eup %4241 }
0x103e   :  { %v2111_v16 = vmul.f32 %v4242_v54, %v4234_v20 }
0x1040   :  { %3969 = vmatmul.msk.f32.vlgmr.msra.gmra.mxu3 %vm239_vm14, %v2111_v16 }
0x1048   :  { %3975 = vmatmul.msk.f32.vlgmr.msrb.gmra.mxu3 %vm239_vm14, %v2247_v11 }
0x104e   :  { %v2167_v13 = vpop.permute.xlu1 %2166 }
0x104f   :  { %2187 = vmatpush.msra.mxu0 %v2167_v13 }
0x1056   :  { %v2277_v55 = vpop.permute.xlu1 %2276 }
0x1057   :  { %3976 = vmatpush.xpose.msk.msrb.mxu0 %vm239_vm14, %v2277_v55 }
0x105e   :  { %v2193_v31 = vpop.permute.xlu1 %2192 }
0x105f   :  { %2213 = vmatpush.msrb.mxu1 %v2193_v31 }
0x1066   :  { %v2275_v28 = vpop.permute.xlu1 %2274 }
0x106e   :  { %v2305_v36 = vpop.permute.xlu1 %2304 }
0x106f   :  { %3978 = vmatpush.xpose.msk.msra.mxu1 %vm239_vm14, %v2305_v36 }
0x1073   :  { %v2102_v56 = vpop.xlane.xlu0 %2101 }
0x1074   :  { %4243 = vrcp.f32 %v2102_v56 }
0x107a   :  { %v4244_v42 = vpop.eup %4243 }
0x107b   :  { %v2112_v29 = vmul.f32 %v4244_v42, %v4236_v38  ;;  %v2105_v32 = vpop.xlane.xlu2 %2104 }
0x107c   :  { %4245 = vrcp.f32 %v2105_v32 }
0x107d   :  { %3970 = vmatmul.msk.f32.vlgmr.msra.gmra.mxu0 %vm239_vm14, %v2112_v29 }
0x1082   :  { %v4246_v57 = vpop.eup %4245 }
0x1083   :  { %v2113_v63 = vmul.f32 %v4246_v57, %v4238_v37  ;;  %v4093_v50 = vpop.permute.xlu2 %4092 }
0x1084   :  { %v4095_v46 = vunpack.i.h.bf16 %v4093_v50  ;;  %v4094_v60 = vunpack.i.l.bf16 %v4093_v50 }
0x1085   :  { %3977 = vmatmul.msk.f32.vlgmr.msrb.gmra.mxu0 %vm239_vm14, %v2275_v28  ;;  %3971 = vmatmul.msk.f32.vlgmr.msrb.gmra.mxu1 %vm239_vm14, %v2113_v63 }
0x1086   :  { %v2303_v27 = vpop.permute.xlu0 %2302  ;;  %2403 = vmatpush.msrb.mxu2 %v4094_v60  ;;  %2429 = vmatpush.msra.mxu3 %v4095_v46 }
0x108d   :  { %3979 = vmatmul.msk.f32.vlgmr.msra.gmra.mxu1 %vm239_vm14, %v2303_v27 }
0x108e   :  { %v2517_v61 = vpop.permute.xlu0 %2516 }
0x108f   :  { %3986 = vmatpush.xpose.msk.msrb.mxu3 %vm239_vm14, %v2517_v61 }
0x10ab   :  { %v5214_v2 = vpop.f32.mrf.mxu2 }
0x10b5   :  { %v2243_v10 = vpop.f32.mrf.mxu2 }
0x10b6   :  { %v2330_v3 = vmul.f32 0.35355338, %v2243_v10 }
0x10b8   :  { %v2334_v34 = vadd.f32 %v2330_v3, %v4672_v49 }
0x10ba   :  { %v2338_v5 = vsel %vm239_vm14, %v2334_v34, -inf }
0x10bb   :  { %2339 = vmax.xlane.f32.xlu2 %v2338_v5 }
0x10c3   :  { %v5218_v6 = vpop.f32.mrf.mxu3 }
0x10cb   :  { %v2271_v9 = vpop.f32.mrf.mxu3 }
0x10cc   :  { %v2331_v4 = vmul.f32 0.35355338, %v2271_v9 }
0x10ce   :  { %v2335_v15 = vadd.f32 %v2331_v4, %v4682_v0 }
0x10d0   :  { %v2341_v39 = vsel %vm239_vm14, %v2335_v15, -inf }
0x10d1   :  { %2342 = vmax.xlane.f32.xlu1 %v2341_v39 }
0x10ea   :  { %2488 = vrot.lane.b32.xlu1 %v5129_v44, %s5671_s5 }
0x10fa   :  { %v5224_v17 = vpop.f32.mrf.mxu0 }
0x1102   :  { %v2299_v19 = vpop.f32.mrf.mxu0  ;;  %v5230_v33 = vpop.f32.mrf.mxu1 }
0x1103   :  { %v2332_v48 = vmul.f32 0.35355338, %v2299_v19 }
0x1105   :  { %v2336_v20 = vadd.f32 %v2332_v48, %v4670_v47 }
0x1107   :  { %v2344_v22 = vsel %vm239_vm14, %v2336_v20, -inf }
0x1108   :  { %2345 = vmax.xlane.f32.xlu2 %v2344_v22 }
0x110a   :  { %v2327_v7 = vpop.f32.mrf.mxu1 }
0x110b   :  { %v2333_v30 = vmul.f32 0.35355338, %v2327_v7 }
0x110d   :  { %v2337_v37 = vadd.f32 %v2333_v30, %v4678_v58 }
0x110f   :  { %v2347_v23 = vsel %vm239_vm14, %v2337_v37, -inf }
0x1120   :  { %2486 = vrot.lane.b32.xlu2 %v5129_v44, %s5673_s22 }
0x112e   :  { %v2340_v24 = vpop.xlane.xlu2 %2339 }
0x112f   :  { %v2350_v25 = vsub.f32 %v2334_v34, %v2340_v24 }
0x1131   :  { %v2354_v51 = vmul.f32 1.442695, %v2350_v25 }
0x1133   :  { %4247 = vpow2.f32 %v2354_v51 }
0x1139   :  { %v4248_v26 = vpop.eup %4247 }
0x113a   :  { %v2362_v38 = vsel %vm239_vm14, %v4248_v26, 0.0 }
0x113b   :  { %2363 = vadd.xlane.f32.xlu0 %v2362_v38 }
0x1144   :  { %v2343_v21 = vpop.xlane.xlu1 %2342 }
0x1145   :  { %v2351_v1 = vsub.f32 %v2335_v15, %v2343_v21 }
0x1147   :  { %v2356_v40 = vmul.f32 1.442695, %v2351_v1 }
0x1149   :  { %4249 = vpow2.f32 %v2356_v40  ;;  %2348 = vmax.xlane.f32.xlu2 %v2347_v23 }
0x114f   :  { %v4250_v12 = vpop.eup %4249  ;;  %2434 = vrot.lane.b32.xlu0 %v5137_v45, %s5672_s30 }
0x1150   :  { %v2365_v11 = vsel %vm239_vm14, %v4250_v12, 0.0 }
0x1151   :  { %2366 = vadd.xlane.f32.xlu2 %v2365_v11 }
0x1157   :  { %2544 = vrot.lane.b32.xlu0 %v5137_v45, %s5671_s5 }
0x115c   :  { %v2489_v18 = vpop.permute.xlu1 %2488 }
0x115d   :  { %3984 = vmatpush.xpose.msk.msra.mxu2 %vm239_vm14, %v2489_v18 }
0x115f   :  { %2460 = vrot.lane.b32.xlu0 %v5141_v53, %s5672_s30 }
0x1167   :  { %2542 = vrot.lane.b32.xlu0 %v5137_v45, %s5673_s22 }
0x1169   :  { %2514 = vrot.lane.b32.xlu2 %v5133_v8, %s5673_s22 }
0x117b   :  { %v2346_v52 = vpop.xlane.xlu2 %2345 }
0x117c   :  { %v2352_v54 = vsub.f32 %v2336_v20, %v2346_v52 }
0x117e   :  { %v2358_v16 = vmul.f32 1.442695, %v2352_v54 }
0x1180   :  { %4251 = vpow2.f32 %v2358_v16 }
0x1183   :  { %v2487_v28 = vpop.permute.xlu2 %2486 }
0x1186   :  { %v4252_v13 = vpop.eup %4251 }
0x1187   :  { %v2368_v55 = vsel %vm239_vm14, %v4252_v13, 0.0 }
0x1188   :  { %2369 = vadd.xlane.f32.xlu1 %v2368_v55 }
0x11a1   :  { %2572 = vrot.lane.b32.xlu1 %v5141_v53, %s5671_s5 }
0x11ae   :  { %v2364_v31 = vpop.xlane.xlu0 %2363 }
0x11af   :  { %4253 = vrcp.f32 %v2364_v31 }
0x11b5   :  { %v4254_v36 = vpop.eup %4253 }
0x11b6   :  { %v2378_v56 = vmul.f32 %v4254_v36, %v4248_v26 }
0x11b8   :  { %3980 = vmatmul.msk.f32.vlgmr.msrb.gmra.mxu2 %vm239_vm14, %v2378_v56 }
0x11bc   :  { %v2349_v42 = vpop.xlane.xlu2 %2348 }
0x11bd   :  { %v2353_v29 = vsub.f32 %v2337_v37, %v2349_v42 }
0x11bf   :  { %v2360_v32 = vmul.f32 1.442695, %v2353_v29 }
0x11c0   :  { %3985 = vmatmul.msk.f32.vlgmr.msra.gmra.mxu2 %vm239_vm14, %v2487_v28 }
0x11c1   :  { %4255 = vpow2.f32 %v2360_v32  ;;  %v2435_v57 = vpop.permute.xlu0 %2434 }
0x11c2   :  { %2455 = vmatpush.msra.mxu0 %v2435_v57 }
0x11c4   :  { %v2367_v63 = vpop.xlane.xlu2 %2366 }
0x11c5   :  { %4257 = vrcp.f32 %v2367_v63 }
0x11c7   :  { %v4256_v50 = vpop.eup %4255 }
0x11c8   :  { %v2371_v46 = vsel %vm239_vm14, %v4256_v50, 0.0 }
0x11c9   :  { %v2545_v60 = vpop.permute.xlu0 %2544  ;;  %2372 = vadd.xlane.f32.xlu2 %v2371_v46 }
0x11ca   :  { %3988 = vmatpush.xpose.msk.msrb.mxu0 %vm239_vm14, %v2545_v60 }
0x11cb   :  { %v4258_v27 = vpop.eup %4257 }
0x11cc   :  { %v2379_v61 = vmul.f32 %v4258_v27, %v4250_v12  ;;  %v2515_v3 = vpop.permute.xlu2 %2514 }
0x11ce   :  { %3981 = vmatmul.msk.f32.vlgmr.msra.gmra.mxu3 %vm239_vm14, %v2379_v61 }
0x11d1   :  { %v2461_v10 = vpop.permute.xlu0 %2460 }
0x11d2   :  { %2481 = vmatpush.msrb.mxu1 %v2461_v10 }
0x11d6   :  { %3987 = vmatmul.msk.f32.vlgmr.msrb.gmra.mxu3 %vm239_vm14, %v2515_v3 }
0x11d9   :  { %v2543_v4 = vpop.permute.xlu0 %2542 }
0x11e1   :  { %2570 = vrot.lane.b32.xlu2 %v5141_v53, %s5673_s22 }
0x11e9   :  { %4097 = vrot.lane.b32.xlu2 %v5199_v41, %s5674_s23 }
0x11fb   :  { %v2370_v34 = vpop.xlane.xlu1 %2369 }
0x11fc   :  { %4259 = vrcp.f32 %v2370_v34 }
0x1202   :  { %v4260_v5 = vpop.eup %4259 }
0x1203   :  { %v2380_v9 = vmul.f32 %v4260_v5, %v4252_v13 }
0x1205   :  { %3982 = vmatmul.msk.f32.vlgmr.msra.gmra.mxu0 %vm239_vm14, %v2380_v9 }
0x120d   :  { %3989 = vmatmul.msk.f32.vlgmr.msrb.gmra.mxu0 %vm239_vm14, %v2543_v4 }
0x1213   :  { %v2573_v15 = vpop.permute.xlu1 %2572 }
0x1214   :  { %3990 = vmatpush.xpose.msk.msra.mxu1 %vm239_vm14, %v2573_v15 }
0x123b   :  { %v5263_v39 = vpop.f32.mrf.mxu2 }
0x123c   :  { %v2373_v19 = vpop.xlane.xlu2 %2372 }
0x123d   :  { %4261 = vrcp.f32 %v2373_v19 }
0x1243   :  { %v4262_v48 = vpop.eup %4261  ;;  %v2511_v20 = vpop.f32.mrf.mxu2 }
0x1244   :  { %v2381_v22 = vmul.f32 %v4262_v48, %v4256_v50  ;;  %v2598_v24 = vmul.f32 0.35355338, %v2511_v20  ;;  %v2571_v25 = vpop.permute.xlu2 %2570 }
0x1246   :  { %v2602_v51 = vadd.f32 %v2598_v24, %v4672_v49  ;;  %3983 = vmatmul.msk.f32.vlgmr.msrb.gmra.mxu1 %vm239_vm14, %v2381_v22 }
0x1248   :  { %v2606_v26 = vsel %vm239_vm14, %v2602_v51, -inf }
0x1249   :  { %2607 = vmax.xlane.f32.xlu0 %v2606_v26 }
0x124c   :  { %v4098_v38 = vpop.permute.xlu2 %4097 }
0x124d   :  { %v4100_v7 = vunpack.i.h.bf16 %v4098_v38  ;;  %v4099_v30 = vunpack.i.l.bf16 %v4098_v38 }
0x124e   :  { %3991 = vmatmul.msk.f32.vlgmr.msra.gmra.mxu1 %vm239_vm14, %v2571_v25 }
0x124f   :  { %2671 = vmatpush.msrb.mxu2 %v4099_v30  ;;  %2697 = vmatpush.msra.mxu3 %v4100_v7 }
0x1251   :  { %v5269_v21 = vpop.f32.mrf.mxu3 }
0x1259   :  { %v2539_v37 = vpop.f32.mrf.mxu3 }
0x125a   :  { %v2599_v1 = vmul.f32 0.35355338, %v2539_v37 }
0x125c   :  { %v2603_v40 = vadd.f32 %v2599_v1, %v4682_v0 }
0x125e   :  { %v2609_v23 = vsel %vm239_vm14, %v2603_v40, -inf }
0x125f   :  { %2610 = vmax.xlane.f32.xlu1 %v2609_v23 }
0x1278   :  { %2756 = vrot.lane.b32.xlu1 %v5129_v44, %s5675_s24 }
0x1282   :  { %v5275_v12 = vpop.f32.mrf.mxu0 }
0x128a   :  { %v2567_v11 = vpop.f32.mrf.mxu0 }
0x128b   :  { %v2600_v18 = vmul.f32 0.35355338, %v2567_v11 }
0x128d   :  { %v2604_v52 = vadd.f32 %v2600_v18, %v4670_v47 }
0x128f   :  { %v2612_v54 = vsel %vm239_vm14, %v2604_v52, -inf }
0x1290   :  { %2613 = vmax.xlane.f32.xlu2 %v2612_v54 }
0x12a8   :  { %2782 = vrot.lane.b32.xlu2 %v5133_v8, %s5676_s21 }
0x12b0   :  { %2702 = vrot.lane.b32.xlu2 %v5137_v45, %s5674_s23 }
0x12b8   :  { %2812 = vrot.lane.b32.xlu2 %v5137_v45, %s5675_s24 }
0x12bc   :  { %v2608_v42 = vpop.xlane.xlu0 %2607 }
0x12bd   :  { %v2618_v29 = vsub.f32 %v2602_v51, %v2608_v42 }
0x12bf   :  { %v2622_v32 = vmul.f32 1.442695, %v2618_v29 }
0x12c0   :  { %2728 = vrot.lane.b32.xlu2 %v5141_v53, %s5674_s23  ;;  %s3847_s23 = sshll.u32 %s5640_s18, 4  ;;  %s4446_s18 = smov [#allocation6]   ;;  %s3848_s23 = int_to_ptr.hbm [resolvable:$true] %s3847_s23 }
0x12c1   :  { %4263 = vpow2.f32 %v2622_v32 }
0x12c3   :  { %v5287_v16 = vpop.f32.mrf.mxu1 }
0x12c7   :  { %v4264_v27 = vpop.eup %4263 }
0x12c8   :  { %2810 = vrot.lane.b32.xlu2 %v5137_v45, %s5676_s21  ;;  %v2630_v3 = vsel %vm239_vm14, %v4264_v27, 0.0 }
0x12cb   :  { %v2595_v13 = vpop.f32.mrf.mxu1 }
0x12cc   :  { %v2601_v55 = vmul.f32 0.35355338, %v2595_v13 }
0x12ce   :  { %v2605_v31 = vadd.f32 %v2601_v55, %v4678_v58 }
0x12d0   :  { %2840 = vrot.lane.b32.xlu2 %v5141_v53, %s5675_s24  ;;  %v2615_v28 = vsel %vm239_vm14, %v2605_v31, -inf }
0x12d1   :  { %2616 = vmax.xlane.f32.xlu0 %v2615_v28 }
0x12d2   :  { %v2611_v36 = vpop.xlane.xlu1 %2610 }
0x12d3   :  { %v2619_v50 = vsub.f32 %v2603_v40, %v2611_v36 }
0x12d5   :  { %v2624_v60 = vmul.f32 1.442695, %v2619_v50 }
0x12e5   :  { %2754 = vrot.lane.b32.xlu0 %v5129_v44, %s5676_s21 }
0x12ea   :  { %v2757_v56 = vpop.permute.xlu1 %2756 }
0x12eb   :  { %3996 = vmatpush.xpose.msk.msra.mxu2 %vm239_vm14, %v2757_v56 }
0x1303   :  { %v2614_v57 = vpop.xlane.xlu2 %2613 }
0x1304   :  { %v2620_v63 = vsub.f32 %v2604_v52, %v2614_v57 }
0x1306   :  { %v2626_v46 = vmul.f32 1.442695, %v2620_v63 }
0x1308   :  { %4265 = vpow2.f32 %v2626_v46 }
0x1309   :  { %4267 = vpow2.f32 %v2624_v60 }
0x130b   :  { %v2783_v61 = vpop.permute.xlu2 %2782 }
0x130e   :  { %v4266_v10 = vpop.eup %4265 }
0x130f   :  { %2631 = vadd.xlane.f32.xlu0 %v2630_v3  ;;  %v2636_v44 = vsel %vm239_vm14, %v4266_v10, 0.0  ;;  %v4268_v34 = vpop.eup %4267 }
0x1310   :  { %2637 = vadd.xlane.f32.xlu1 %v2636_v44  ;;  %v2633_v9 = vsel %vm239_vm14, %v4268_v34, 0.0 }
0x1313   :  { %v2703_v5 = vpop.permute.xlu2 %2702 }
0x1314   :  { %2723 = vmatpush.msra.mxu0 %v2703_v5 }
0x1317   :  { %2634 = vadd.xlane.f32.xlu0 %v2633_v9 }
0x131b   :  { %v2813_v4 = vpop.permute.xlu2 %2812 }
0x131c   :  { %4000 = vmatpush.xpose.msk.msrb.mxu0 %vm239_vm14, %v2813_v4 }
0x1323   :  { %v2729_v15 = vpop.permute.xlu2 %2728 }
0x1324   :  { %2749 = vmatpush.msrb.mxu1 %v2729_v15 }
0x1329   :  { %2838 = vrot.lane.b32.xlu1 %v5141_v53, %s5676_s21 }
0x132b   :  { %v2811_v19 = vpop.permute.xlu2 %2810  ;;  %2784 = vrot.lane.b32.xlu0 %v5133_v8, %s5675_s24  ;;  %s4444_s24 = smov [#allocation2]  }
0x132c   :  { %s3845_s21 = sshll.u32 %s4444_s24, 4  ;;  %s3846_s21 = int_to_ptr.vmem [resolvable:$true] %s3845_s21 }
0x1333   :  { %v2841_v48 = vpop.permute.xlu2 %2840 }
0x1334   :  { %4002 = vmatpush.xpose.msk.msra.mxu1 %vm239_vm14, %v2841_v48 }
0x1344   :  { %v2617_v20 = vpop.xlane.xlu0 %2616 }
0x1345   :  { %v2621_v22 = vsub.f32 %v2605_v31, %v2617_v20 }
0x1347   :  { %v2628_v24 = vmul.f32 1.442695, %v2621_v22 }
0x1349   :  { %4269 = vpow2.f32 %v2628_v24 }
0x134f   :  { %v4270_v25 = vpop.eup %4269 }
0x1350   :  { %v2639_v51 = vsel %vm239_vm14, %v4270_v25, 0.0 }
0x1355   :  { %2640 = vadd.xlane.f32.xlu0 %v2639_v51 }
0x1357   :  { %v2755_v26 = vpop.permute.xlu0 %2754 }
0x1382   :  { %v2632_v38 = vpop.xlane.xlu0 %2631 }
0x1383   :  { %4271 = vrcp.f32 %v2632_v38  ;;  %v2638_v7 = vpop.xlane.xlu1 %2637 }
0x1384   :  { %4273 = vrcp.f32 %v2638_v7 }
0x1389   :  { %v4272_v30 = vpop.eup %4271 }
0x138a   :  { %v4274_v37 = vpop.eup %4273  ;;  %v2646_v1 = vmul.f32 %v4272_v30, %v4264_v27  ;;  %v2635_v8 = vpop.xlane.xlu0 %2634 }
0x138b   :  { %v2648_v40 = vmul.f32 %v4274_v37, %v4266_v10  ;;  %4275 = vrcp.f32 %v2635_v8 }
0x138c   :  { %3992 = vmatmul.msk.f32.vlgmr.msrb.gmra.mxu2 %vm239_vm14, %v2646_v1 }
0x138d   :  { %3994 = vmatmul.msk.f32.vlgmr.msra.gmra.mxu0 %vm239_vm14, %v2648_v40 }
0x1391   :  { %v4276_v23 = vpop.eup %4275 }
0x1392   :  { %v2647_v11 = vmul.f32 %v4276_v23, %v4268_v34 }
0x1394   :  { %3993 = vmatmul.msk.f32.vlgmr.msra.gmra.mxu3 %vm239_vm14, %v2647_v11  ;;  %3997 = vmatmul.msk.f32.vlgmr.msra.gmra.mxu2 %vm239_vm14, %v2755_v26 }
0x1395   :  { %4001 = vmatmul.msk.f32.vlgmr.msrb.gmra.mxu0 %vm239_vm14, %v2811_v19 }
0x139b   :  { %v2839_v55 = vpop.permute.xlu1 %2838 }
0x139d   :  { %v2785_v18 = vpop.permute.xlu0 %2784 }
0x139e   :  { %3998 = vmatpush.xpose.msk.msrb.mxu3 %vm239_vm14, %v2785_v18 }
0x13a1   :  { %3999 = vmatmul.msk.f32.vlgmr.msrb.gmra.mxu3 %vm239_vm14, %v2783_v61 }
0x13c8   :  { %v2641_v52 = vpop.xlane.xlu0 %2640 }
0x13c9   :  { %4277 = vrcp.f32 %v2641_v52 }
0x13cf   :  { %v4278_v54 = vpop.eup %4277 }
0x13d0   :  { %v2649_v13 = vmul.f32 %v4278_v54, %v4270_v25 }
0x13d2   :  { %3995 = vmatmul.msk.f32.vlgmr.msrb.gmra.mxu1 %vm239_vm14, %v2649_v13 }
0x13da   :  { %4003 = vmatmul.msk.f32.vlgmr.msra.gmra.mxu1 %vm239_vm14, %v2839_v55 }
0x140a   :  { %v5317_v31 = vpop.f32.mrf.mxu0 }
0x140f   :  { %v2673_v28 = vpop.f32.mrf.mxu2 }
0x1412   :  { %v2835_v42 = vpop.f32.mrf.mxu0 }
0x1413   :  { %v2868_v32 = vmul.f32 0.35355338, %v2835_v42 }
0x1415   :  { %v2872_v50 = vadd.f32 %v2868_v32, %v4670_v47  ;;  %v4010_v32 = vld [vmem:[%s5628_s6 + $0x30] sm:$0xff] }
0x1417   :  { %v2779_v36 = vpop.f32.mrf.mxu2  ;;  %v2699_v57 = vpop.f32.mrf.mxu3  ;;  %v2880_v60 = vsel %vm239_vm14, %v2872_v50, -inf }
0x1418   :  { %v2866_v56 = vmul.f32 0.35355338, %v2779_v36 }
0x141a   :  { %v2870_v29 = vadd.f32 %v2866_v56, %v4672_v49 }
0x141c   :  { %v2874_v63 = vsel %vm239_vm14, %v2870_v29, -inf }
0x141d   :  { %2875 = vmax.xlane.f32.xlu0 %v2874_v63 }
0x1424   :  { %v2807_v46 = vpop.f32.mrf.mxu3 }
0x1425   :  { %v2867_v27 = vmul.f32 0.35355338, %v2807_v46  ;;  %2881 = vmax.xlane.f32.xlu0 %v2880_v60 }
0x1427   :  { %v2871_v61 = vadd.f32 %v2867_v27, %v4682_v0 }
0x1429   :  { %v2877_v10 = vsel %vm239_vm14, %v2871_v61, -inf }
0x142a   :  { %2878 = vmax.xlane.f32.xlu2 %v2877_v10 }
0x144f   :  { %v2751_v3 = vpop.f32.mrf.mxu1 }
0x1457   :  { %v2863_v44 = vpop.f32.mrf.mxu1 }
0x1458   :  { %v2869_v49 = vmul.f32 0.35355338, %v2863_v44 }
0x145a   :  { %v2873_v34 = vadd.f32 %v2869_v49, %v4678_v58 }
0x145c   :  { %v2883_v5 = vsel %vm239_vm14, %v2873_v34, -inf }
0x145d   :  { %2884 = vmax.xlane.f32.xlu0 %v2883_v5 }
0x1471   :  { %4102 = vrot.lane.b32.xlu0 %v5199_v41, %s5677_s2 }
0x1490   :  { %v2876_v47 = vpop.xlane.xlu0 %2875 }
0x1491   :  { %v2886_v9 = vsub.f32 %v2870_v29, %v2876_v47  ;;  %v4011_v29 = vld [vmem:[%s5628_s6 + $0x38] sm:$0xff] }
0x1493   :  { %v2890_v4 = vmul.f32 1.442695, %v2886_v9 }
0x1495   :  { %4279 = vpow2.f32 %v2890_v4 }
0x1498   :  { %v2882_v15 = vpop.xlane.xlu0 %2881 }
0x1499   :  { %v2888_v0 = vsub.f32 %v2872_v50, %v2882_v15  ;;  %v4008_v50 = vld [vmem:[%s5628_s6 + $0x20] sm:$0xff] }
0x149b   :  { %v4280_v19 = vpop.eup %4279  ;;  %v2894_v48 = vmul.f32 1.442695, %v2888_v0 }
0x149c   :  { %v2898_v20 = vsel %vm239_vm14, %v4280_v19, 0.0 }
0x149d   :  { %4281 = vpow2.f32 %v2894_v48  ;;  %v2879_v22 = vpop.xlane.xlu2 %2878  ;;  %2899 = vadd.xlane.f32.xlu1 %v2898_v20 }
0x149e   :  { %v2887_v58 = vsub.f32 %v2871_v61, %v2879_v22 }
0x14a0   :  { %v2892_v24 = vmul.f32 1.442695, %v2887_v58 }
0x14a2   :  { %4283 = vpow2.f32 %v2892_v24 }
0x14a3   :  { %v4282_v25 = vpop.eup %4281 }
0x14a4   :  { %v2904_v51 = vsel %vm239_vm14, %v4282_v25, 0.0 }
0x14a5   :  { %2905 = vadd.xlane.f32.xlu2 %v2904_v51 }
0x14a8   :  { %v4284_v41 = vpop.eup %4283 }
0x14a9   :  { %v2901_v26 = vsel %vm239_vm14, %v4284_v41, 0.0 }
0x14aa   :  { %2902 = vadd.xlane.f32.xlu0 %v2901_v26 }
0x14b6   :  { %3042 = vrot.lane.b32.xlu1 %v2673_v28, %s4439_s0 }
0x14be   :  { %2970 = vrot.lane.b32.xlu0 %v5137_v45, %s5677_s2  ;;  %3030 = vrot.lane.b32.xlu1 %v5275_v12, %s5678_s25 }
0x14c6   :  { %3026 = vrot.lane.b32.xlu0 %v5263_v39, %s5678_s25  ;;  %3032 = vrot.lane.b32.xlu1 %v5287_v16, %s5678_s25 }
0x14ce   :  { %3028 = vrot.lane.b32.xlu0 %v5269_v21, %s5678_s25 }
0x14d0   :  { %v2885_v38 = vpop.xlane.xlu0 %2884 }
0x14d1   :  { %v2889_v7 = vsub.f32 %v2873_v34, %v2885_v38 }
0x14d3   :  { %v2896_v30 = vmul.f32 1.442695, %v2889_v7 }
0x14d5   :  { %4285 = vpow2.f32 %v2896_v30 }
0x14db   :  { %v4286_v37 = vpop.eup %4285 }
0x14dc   :  { %v2907_v1 = vsel %vm239_vm14, %v4286_v37, 0.0 }
0x14dd   :  { %2908 = vadd.xlane.f32.xlu2 %v2907_v1 }
0x14e3   :  { %v4103_v45 = vpop.permute.xlu0 %4102 }
0x14e4   :  { %v4105_v8 = vunpack.i.h.bf16 %v4103_v45  ;;  %v4104_v12 = vunpack.i.l.bf16 %v4103_v45 }
0x14e6   :  { %2939 = vmatpush.msrb.mxu2 %v4104_v12  ;;  %2965 = vmatpush.msra.mxu3 %v4105_v8 }
0x14e8   :  { %3116 = vmatpush.msra.mxu2 %v4011_v29 }
0x14ea   :  { %3117 = vmatpush.msra.mxu2 %v4010_v32 }
0x14f5   :  { %2996 = vrot.lane.b32.xlu2 %v5141_v53, %s5677_s2 }
0x14fd   :  { %3044 = vrot.lane.b32.xlu2 %v2699_v57, %s4439_s0  ;;  %v4009_v57 = vld [vmem:[%s5628_s6 + $0x28] sm:$0xff] }
0x14fe   :  { %3118 = vmatpush.msra.mxu2 %v4009_v57 }
0x1500   :  { %3119 = vmatpush.msra.mxu2 %v4008_v50  ;;  %v4021_v50 = vld [vmem:[%s5632_s10 + $0x30] sm:$0xff] }
0x1505   :  { %3046 = vrot.lane.b32.xlu2 %v5317_v31, %s4439_s0 }
0x150d   :  { %3048 = vrot.lane.b32.xlu2 %v2751_v3, %s4439_s0 }
0x1510   :  { %v2900_v39 = vpop.xlane.xlu1 %2899 }
0x1511   :  { %4287 = vrcp.f32 %v2900_v39 }
0x1517   :  { %v4288_v21 = vpop.eup %4287 }
0x1518   :  { %v2914_v16 = vmul.f32 %v4288_v21, %v4280_v19  ;;  %v2906_v11 = vpop.xlane.xlu2 %2905 }
0x151a   :  { %4004 = vmatmul.msk.f32.vlgmr.msrb.gmra.mxu2 %vm239_vm14, %v2914_v16 }
0x151d   :  { %v2903_v40 = vpop.xlane.xlu0 %2902 }
0x151e   :  { %4289 = vrcp.f32 %v2903_v40 }
0x151f   :  { %4291 = vrcp.f32 %v2906_v11 }
0x1524   :  { %v4290_v23 = vpop.eup %4289 }
0x1525   :  { %v2915_v18 = vmul.f32 %v4290_v23, %v4284_v41  ;;  %v4292_v53 = vpop.eup %4291 }
0x1526   :  { %v2916_v52 = vmul.f32 %v4292_v53, %v4282_v25 }
0x1527   :  { %4005 = vmatmul.msk.f32.vlgmr.msra.gmra.mxu3 %vm239_vm14, %v2915_v18 }
0x1528   :  { %v3043_v61 = vpop.permute.xlu1 %3042 }
0x1530   :  { %v2971_v54 = vpop.permute.xlu0 %2970 }
0x1531   :  { %2991 = vmatpush.msra.mxu0 %v2971_v54 }
0x1532   :  { %4006 = vmatmul.msk.f32.vlgmr.msra.gmra.mxu0 %vm239_vm14, %v2916_v52 }
0x1538   :  { %v3027_v46 = vpop.permute.xlu0 %3026 }
0x1539   :  { %v3070_v27 = vsel %vm239_vm14, %v5214_v2, %v3027_v46  ;;  %v3031_v2 = vpop.permute.xlu1 %3030  ;;  %v4020_v46 = vld [vmem:[%s5632_s10 + $0x28] sm:$0xff] }
0x153a   :  { %v3074_v10 = vsel %vm1365_vm15, %v3070_v27, %v3043_v61  ;;  %v3072_v15 = vsel %vm239_vm14, %v5224_v17, %v3031_v2  ;;  %v4117_v17 = vld [vmem:[%s5629_s7 + $0x1] ss:$0 sm:$0xff]  ;;  %s3858_s7 = sshll.u32 %s5641_s19, 4  ;;  %s3867_s19 = sshll.u32 %s4446_s18, 4  ;;  %s3859_s7 = int_to_ptr.hbm [resolvable:$true] %s3858_s7  ;;  %s3868_s19 = int_to_ptr.vmem [resolvable:$true] %s3867_s19 }
0x1540   :  { %v3029_v60 = vpop.permute.xlu0 %3028 }
0x1541   :  { %v3071_v34 = vsel %vm239_vm14, %v5218_v6, %v3029_v60  ;;  %v3033_v6 = vpop.permute.xlu1 %3032  ;;  %v4019_v60 = vld [vmem:[%s5632_s10 + $0x20] sm:$0xff] }
0x1542   :  { %v3073_v22 = vsel %vm239_vm14, %v5230_v33, %v3033_v6 }
0x1550   :  { %v2909_v13 = vpop.xlane.xlu2 %2908 }
0x1551   :  { %4293 = vrcp.f32 %v2909_v13 }
0x1557   :  { %v4294_v55 = vpop.eup %4293 }
0x1558   :  { %v2917_v31 = vmul.f32 %v4294_v55, %v4286_v37  ;;  %v2997_v28 = vpop.permute.xlu2 %2996 }
0x1559   :  { %3017 = vmatpush.msrb.mxu1 %v2997_v28 }
0x155a   :  { %4007 = vmatmul.msk.f32.vlgmr.msrb.gmra.mxu1 %vm239_vm14, %v2917_v31 }
0x1560   :  { %v3045_v49 = vpop.permute.xlu2 %3044 }
0x1561   :  { %v3075_v5 = vsel %vm1365_vm15, %v3071_v34, %v3045_v49 }
0x1568   :  { %v3047_v4 = vpop.permute.xlu2 %3046 }
0x1569   :  { %v3076_v0 = vsel %vm1365_vm15, %v3072_v15, %v3047_v4  ;;  %v4118_v15 = vld [vmem:[%s5630_s8 + $0x1] ss:$0 sm:$0xff] }
0x1570   :  { %v3049_v20 = vpop.permute.xlu2 %3048 }
0x1571   :  { %v3077_v58 = vsel %vm1365_vm15, %v3073_v22, %v3049_v20  ;;  %v4119_v20 = vld [vmem:[%s5631_s9 + $0x1] ss:$0 sm:$0xff] }
0x159d   :  { %v2941_v36 = vpop.f32.mrf.mxu2 }
0x159e   :  { %3058 = vrot.lane.b32.xlu0 %v2941_v36, %s4441_s1 }
0x15aa   :  { %v2967_v56 = vpop.f32.mrf.mxu3 }
0x15ab   :  { %3060 = vrot.lane.b32.xlu0 %v2967_v56, %s4441_s1 }
0x15af   :  { %v2993_v42 = vpop.f32.mrf.mxu0 }
0x15b3   :  { %3062 = vrot.lane.b32.xlu0 %v2993_v42, %s4441_s1 }
0x15d7   :  { %v3019_v63 = vpop.f32.mrf.mxu1 }
0x15d8   :  { %3064 = vrot.lane.b32.xlu0 %v3019_v63, %s4441_s1  ;;  %v4022_v63 = vld [vmem:[%s5632_s10 + $0x38] sm:$0xff]  ;;  %s3869_s10 = sshll.u32 %s5642_s20, 4  ;;  %s3870_s10 = int_to_ptr.hbm [resolvable:$true] %s3869_s10 }
0x15d9   :  { %3277 = vmatpush.msrb.mxu3 %v4022_v63 }
0x15db   :  { %3278 = vmatpush.msrb.mxu3 %v4021_v50 }
0x15dd   :  { %3279 = vmatpush.msrb.mxu3 %v4020_v46  ;;  %v4035_v46 = vld [vmem:[%s5634_s12 + $0x78] sm:$0xff] }
0x15de   :  { %3488 = vmatpush.msrb.mxu0 %v4035_v46 }
0x15df   :  { %3280 = vmatpush.msrb.mxu3 %v4019_v60 }
0x1610   :  { %v3059_v3 = vpop.permute.xlu0 %3058 }
0x1611   :  { %v3078_v44 = vsel %vm1370_vm1, %v3074_v10, %v3059_v3 }
0x1612   :  { %4013 = vmatmul.msk.f32.vlgmr.msra.gmra.mxu2 %vm70_vm0, %v3078_v44 }
0x161d   :  { %v3061_v47 = vpop.permute.xlu0 %3060 }
0x161e   :  { %v3079_v9 = vsel %vm1370_vm1, %v3075_v5, %v3061_v47 }
0x161f   :  { %4014 = vmatmul.msk.f32.gmra.mxu2 %vm70_vm0, %v3079_v9 }
0x1625   :  { %v3063_v19 = vpop.permute.xlu0 %3062 }
0x1626   :  { %v3080_v48 = vsel %vm1370_vm1, %v3076_v0, %v3063_v19 }
0x1627   :  { %4015 = vmatmul.msk.f32.gmra.mxu2 %vm70_vm0, %v3080_v48 }
0x164a   :  { %v3065_v24 = vpop.permute.xlu0 %3064 }
0x164b   :  { %v3081_v25 = vsel %vm1370_vm1, %v3077_v58, %v3065_v24 }
0x164c   :  { %4016 = vmatmul.msk.f32.gmra.mxu2 %vm70_vm0, %v3081_v25 }
0x1695   :  { %v3121_v51 = vpop.f32.mrf.mxu2 }
0x1696   :  { %v3122_v41 = vadd.f32 %v4117_v17, %v3121_v51 }
0x1698   :  { %v3133_v26 = vadd.f32 %v3122_v41, %v5106_v59 }
0x169a   :  { %v3141_v38 = vsel %vm70_vm0, %v3133_v26, 0.0 }
0x169b   :  { %3142 = vadd.xlane.f32.xlu1 %v3141_v38 }
0x16a2   :  { %v3124_v7 = vpop.f32.mrf.mxu2 }
0x16a3   :  { %v3125_v33 = vadd.f32 %v4117_v17, %v3124_v7 }
0x16a5   :  { %v3134_v30 = vadd.f32 %v3125_v33, %v5110_v62 }
0x16a7   :  { %v3144_v37 = vsel %vm70_vm0, %v3134_v30, 0.0 }
0x16a8   :  { %3145 = vadd.xlane.f32.xlu2 %v3144_v37 }
0x16aa   :  { %v3127_v1 = vpop.f32.mrf.mxu2 }
0x16ab   :  { %v3128_v45 = vadd.f32 %v4117_v17, %v3127_v1 }
0x16ad   :  { %v3135_v8 = vadd.f32 %v3128_v45, %v5117_v35 }
0x16af   :  { %v3147_v12 = vsel %vm70_vm0, %v3135_v8, 0.0 }
0x16b0   :  { %3148 = vadd.xlane.f32.xlu0 %v3147_v12 }
0x16cf   :  { %v3130_v39 = vpop.f32.mrf.mxu2 }
0x16d0   :  { %v3131_v21 = vadd.f32 %v4117_v17, %v3130_v39 }
0x16d2   :  { %v3136_v59 = vadd.f32 %v3131_v21, %v5122_v43 }
0x16d4   :  { %v3150_v16 = vsel %vm70_vm0, %v3136_v59, 0.0 }
0x16d5   :  { %3151 = vadd.xlane.f32.xlu1 %v3150_v16 }
0x170e   :  { %v3143_v40 = vpop.xlane.xlu1 %3142 }
0x170f   :  { %v3153_v62 = vmul.f32 %v3143_v40, %v4568_v14 }
0x1711   :  { %v3157_v23 = vsub.f32 %v3133_v26, %v3153_v62 }
0x1713   :  { %v3161_v11 = vmul.f32 %v3157_v23, %v3157_v23 }
0x1715   :  { %v3165_v18 = vsel %vm70_vm0, %v3161_v11, 0.0 }
0x1716   :  { %3166 = vadd.xlane.f32.xlu2 %v3165_v18 }
0x171b   :  { %v3146_v53 = vpop.xlane.xlu2 %3145 }
0x171c   :  { %v3154_v35 = vmul.f32 %v3146_v53, %v4568_v14 }
0x171e   :  { %v5404_v52 = vsub.f32 %v3134_v30, %v3154_v35 }
0x1720   :  { %v3162_v54 = vmul.f32 %v5404_v52, %v5404_v52 }
0x1722   :  { %v3168_v43 = vsel %vm70_vm0, %v3162_v54, 0.0 }
0x1723   :  { %3169 = vadd.xlane.f32.xlu0 %v3168_v43  ;;  %v3149_v13 = vpop.xlane.xlu0 %3148 }
0x1724   :  { %v3155_v55 = vmul.f32 %v3149_v13, %v4568_v14 }
0x1726   :  { %v5410_v31 = vsub.f32 %v3135_v8, %v3155_v55 }
0x1728   :  { %v3163_v28 = vmul.f32 %v5410_v31, %v5410_v31 }
0x172a   :  { %v3171_v36 = vsel %vm70_vm0, %v3163_v28, 0.0 }
0x172b   :  { %3172 = vadd.xlane.f32.xlu1 %v3171_v36 }
0x1748   :  { %v3152_v56 = vpop.xlane.xlu1 %3151 }
0x1749   :  { %v3156_v42 = vmul.f32 %v3152_v56, %v4568_v14  ;;  %v5465_v56 = vld [vmem:[%s5633_s11 + $0x1] ss:$0 sm:$0xff] }
0x174b   :  { %v5416_v29 = vsub.f32 %v3136_v59, %v3156_v42 }
0x174d   :  { %v3164_v32 = vmul.f32 %v5416_v29, %v5416_v29 }
0x174f   :  { %v3174_v57 = vsel %vm70_vm0, %v3164_v32, 0.0 }
0x1750   :  { %3175 = vadd.xlane.f32.xlu2 %v3174_v57 }
0x1789   :  { %v3167_v27 = vpop.xlane.xlu2 %3166 }
0x178a   :  { %v3177_v61 = vmul.f32 %v3167_v27, %v4568_v14  ;;  %v4034_v27 = vld [vmem:[%s5634_s12 + $0x70] sm:$0xff] }
0x178b   :  { %3489 = vmatpush.msrb.mxu0 %v4034_v27 }
0x178c   :  { %v3181_v10 = vadd.f32 1e-12, %v3177_v61 }
0x178e   :  { %4295 = vrsqrt.f32 %v3181_v10  ;;  %vm3191_vm15 = vweird.f32 %v3181_v10 }
0x1794   :  { %v4296_v3 = vpop.eup %4295 }
0x1795   :  { %v3186_v44 = vmul.f32 %v4296_v3, %v3181_v10  ;;  %vm3192_vm14 = vweird.f32 %v4296_v3  ;;  %v4033_v10 = vld [vmem:[%s5634_s12 + $0x68] sm:$0xff] }
0x1796   :  { %v3170_v49 = vpop.xlane.xlu0 %3169  ;;  %vm3193_vm1 = vmor %vm3191_vm15, %vm3192_vm14  ;;  %3490 = vmatpush.msrb.mxu0 %v4033_v10 }
0x1797   :  { %v3187_v34 = vmul.f32 %v4296_v3, %v3186_v44  ;;  %v3178_v5 = vmul.f32 %v3170_v49, %v4568_v14  ;;  %v4032_v49 = vld [vmem:[%s5634_s12 + $0x60] sm:$0xff] }
0x1798   :  { %3491 = vmatpush.msrb.mxu0 %v4032_v49 }
0x1799   :  { %v3188_v47 = vmul.f32 0.5, %v3187_v34  ;;  %v3182_v9 = vadd.f32 1e-12, %v3178_v5 }
0x179b   :  { %v3189_v2 = vsub.f32 1.5, %v3188_v47  ;;  %4297 = vrsqrt.f32 %v3182_v9  ;;  %vm3201_vm2 = vweird.f32 %v3182_v9  ;;  %v4031_v47 = vld [vmem:[%s5634_s12 + $0x58] sm:$0xff] }
0x179c   :  { %3492 = vmatpush.msrb.mxu0 %v4031_v47 }
0x179d   :  { %v3190_v4 = vmul.f32 %v4296_v3, %v3189_v2 }
0x179e   :  { %v3173_v0 = vpop.xlane.xlu1 %3172 }
0x179f   :  { %v3194_v19 = vsel %vm3193_vm1, %v4296_v3, %v3190_v4  ;;  %v3179_v48 = vmul.f32 %v3173_v0, %v4568_v14 }
0x17a0   :  { %v3225_v6 = vmul.f32 %v3194_v19, %v3157_v23  ;;  %v4030_v19 = vld [vmem:[%s5634_s12 + $0x50] sm:$0xff] }
0x17a1   :  { %v4298_v22 = vpop.eup %4297  ;;  %v3183_v58 = vadd.f32 1e-12, %v3179_v48  ;;  %3493 = vmatpush.msrb.mxu0 %v4030_v19 }
0x17a2   :  { %v3232_v24 = vmul.f32 %v4118_v15, %v3225_v6  ;;  %v3196_v25 = vmul.f32 %v4298_v22, %v3182_v9  ;;  %vm3202_vm13 = vweird.f32 %v4298_v22 }
0x17a3   :  { %4299 = vrsqrt.f32 %v3183_v58  ;;  %vm3203_vm3 = vmor %vm3201_vm2, %vm3202_vm13  ;;  %vm3211_vm5 = vweird.f32 %v3183_v58 }
0x17a4   :  { %v3197_v17 = vmul.f32 %v4298_v22, %v3196_v25  ;;  %v5442_v51 = vadd.f32 %v4119_v20, %v3232_v24 }
0x17a6   :  { %v3198_v41 = vmul.f32 0.5, %v3197_v17  ;;  %4024 = vmatmul.msk.f32.vlgmr.msrb.gmra.mxu3 %vm70_vm0, %v5442_v51 }
0x17a8   :  { %v3199_v26 = vsub.f32 1.5, %v3198_v41 }
0x17a9   :  { %v4300_v38 = vpop.eup %4299 }
0x17aa   :  { %v3200_v7 = vmul.f32 %v4298_v22, %v3199_v26  ;;  %v3206_v33 = vmul.f32 %v4300_v38, %v3183_v58  ;;  %vm3212_vm4 = vweird.f32 %v4300_v38  ;;  %v4028_v58 = vld [vmem:[%s5634_s12 + $0x40] sm:$0xff] }
0x17ab   :  { %vm3213_vm6 = vmor %vm3211_vm5, %vm3212_vm4 }
0x17ac   :  { %v3204_v30 = vsel %vm3203_vm3, %v4298_v22, %v3200_v7  ;;  %v3207_v37 = vmul.f32 %v4300_v38, %v3206_v33  ;;  %v4029_v22 = vld [vmem:[%s5634_s12 + $0x48] sm:$0xff] }
0x17ad   :  { %v3226_v1 = vmul.f32 %v3204_v30, %v5404_v52  ;;  %3494 = vmatpush.msrb.mxu0 %v4029_v22 }
0x17ae   :  { %v3208_v45 = vmul.f32 0.5, %v3207_v37 }
0x17af   :  { %v3233_v8 = vmul.f32 %v4118_v15, %v3226_v1  ;;  %3495 = vmatpush.msrb.mxu0 %v4028_v58 }
0x17b0   :  { %v3209_v12 = vsub.f32 1.5, %v3208_v45 }
0x17b1   :  { %v5447_v39 = vadd.f32 %v4119_v20, %v3233_v8 }
0x17b2   :  { %v3210_v21 = vmul.f32 %v4300_v38, %v3209_v12 }
0x17b3   :  { %4025 = vmatmul.msk.f32.gmra.mxu3 %vm70_vm0, %v5447_v39 }
0x17b4   :  { %v3214_v59 = vsel %vm3213_vm6, %v4300_v38, %v3210_v21 }
0x17b5   :  { %v3227_v16 = vmul.f32 %v3214_v59, %v5410_v31 }
0x17b7   :  { %v3234_v40 = vmul.f32 %v4118_v15, %v3227_v16 }
0x17b9   :  { %v5452_v62 = vadd.f32 %v4119_v20, %v3234_v40 }
0x17bb   :  { %4026 = vmatmul.msk.f32.gmra.mxu3 %vm70_vm0, %v5452_v62 }
0x17c3   :  { %v3176_v23 = vpop.xlane.xlu2 %3175 }
0x17c4   :  { %v3180_v11 = vmul.f32 %v3176_v23, %v4568_v14 }
0x17c6   :  { %v3184_v18 = vadd.f32 1e-12, %v3180_v11 }
0x17c8   :  { %4301 = vrsqrt.f32 %v3184_v18  ;;  %vm3221_vm8 = vweird.f32 %v3184_v18 }
0x17ce   :  { %v4302_v53 = vpop.eup %4301 }
0x17cf   :  { %v3216_v35 = vmul.f32 %v4302_v53, %v3184_v18  ;;  %vm3222_vm7 = vweird.f32 %v4302_v53 }
0x17d0   :  { %vm3223_vm9 = vmor %vm3221_vm8, %vm3222_vm7 }
0x17d1   :  { %v3217_v52 = vmul.f32 %v4302_v53, %v3216_v35 }
0x17d3   :  { %v3218_v54 = vmul.f32 0.5, %v3217_v52 }
0x17d5   :  { %v3219_v43 = vsub.f32 1.5, %v3218_v54 }
0x17d7   :  { %v3220_v13 = vmul.f32 %v4302_v53, %v3219_v43 }
0x17d9   :  { %v3224_v55 = vsel %vm3223_vm9, %v4302_v53, %v3220_v13 }
0x17da   :  { %v3228_v31 = vmul.f32 %v3224_v55, %v5416_v29 }
0x17dc   :  { %v3235_v28 = vmul.f32 %v4118_v15, %v3228_v31 }
0x17de   :  { %v5458_v36 = vadd.f32 %v4119_v20, %v3235_v28 }
0x17e0   :  { %4027 = vmatmul.msk.f32.gmra.mxu3 %vm70_vm0, %v5458_v36 }
0x1829   :  { %v3282_v42 = vpop.f32.mrf.mxu3 }
0x182a   :  { %v5468_v32 = vadd.f32 %v5465_v56, %v3282_v42 }
0x182c   :  { %v5471_v57 = vmul.f32 0.70710677, %v5468_v32 }
0x182e   :  { %v3302_v29 = vand.u32 2147483647, %v5471_v57  ;;  %vm3434_vm8 = vcmp.ge.f32.partialorder %v5471_v57, 0.0 }
0x1830   :  { %v3306_v63 = vmul.f32 0.3275911, %v3302_v29  ;;  %v3410_v38 = vsub.f32 0.0, %v3302_v29 }
0x1832   :  { %v3310_v50 = vadd.f32 1.0, %v3306_v63  ;;  %v3414_v45 = vmul.f32 %v3410_v38, %v3302_v29  ;;  %v3294_v38 = vmul.f32 0.5, %v5468_v32 }
0x1834   :  { %4303 = vrcp.f32 %v3310_v50  ;;  %v3323_v4 = vand.u32 2147483647, %v3310_v50  ;;  %v3325_v15 = vand.u32 2147483648, %v3310_v50  ;;  %vm3319_vm12 = vweird.f32 %v3310_v50 }
0x1835   :  { %v3418_v23 = vmul.f32 1.442695, %v3414_v45 }
0x1836   :  { %v3285_v60 = vpop.f32.mrf.mxu3  ;;  %v3326_v25 = vor.u32 1.1754944e-38, %v3325_v15  ;;  %vm3324_vm15 = vcmp.eq.f32.partialorder %v3323_v4, 8.507059e+37 }
0x1837   :  { %v5481_v61 = vadd.f32 %v5465_v56, %v3285_v60 }
0x1839   :  { %v5487_v3 = vmul.f32 0.70710677, %v5481_v61 }
0x183a   :  { %v4304_v44 = vpop.eup %4303 }
0x183b   :  { %v3315_v34 = vmul.f32 %v4304_v44, %v3310_v50  ;;  %v5493_v5 = vand.u32 2147483647, %v5487_v3  ;;  %vm3320_vm10 = vweird.f32 %v4304_v44  ;;  %vm3435_vm9 = vcmp.ge.f32.partialorder %v5487_v3, 0.0 }
0x183c   :  { %vm3321_vm14 = vmor %vm3319_vm12, %vm3320_vm10 }
0x183d   :  { %v3316_v9 = vsub.f32 1.0, %v3315_v34  ;;  %v3307_v2 = vmul.f32 0.3275911, %v5493_v5  ;;  %v3411_v13 = vsub.f32 0.0, %v5493_v5 }
0x183e   :  { %v3288_v0 = vpop.f32.mrf.mxu3 }
0x183f   :  { %v3317_v48 = vmul.f32 %v4304_v44, %v3316_v9  ;;  %v3311_v6 = vadd.f32 1.0, %v3307_v2  ;;  %v5503_v20 = vadd.f32 %v5465_v56, %v3288_v0  ;;  %v3415_v46 = vmul.f32 %v3411_v13, %v5493_v5 }
0x1841   :  { %v3318_v24 = vadd.f32 %v4304_v44, %v3317_v48  ;;  %4305 = vrcp.f32 %v3311_v6  ;;  %v5512_v17 = vmul.f32 0.70710677, %v5503_v20  ;;  %v3340_v40 = vand.u32 2147483648, %v3311_v6 }
0x1842   :  { %v3338_v18 = vand.u32 2147483647, %v3311_v6  ;;  %vm3334_vm13 = vweird.f32 %v3311_v6  ;;  %v3420_v19 = vmul.f32 1.442695, %v3415_v46 }
0x1843   :  { %v3322_v41 = vsel %vm3321_vm14, %v4304_v44, %v3318_v24  ;;  %v5515_v7 = vand.u32 2147483647, %v5512_v17  ;;  %v3341_v54 = vor.u32 1.1754944e-38, %v3340_v40  ;;  %vm3436_vm10 = vcmp.ge.f32.partialorder %v5512_v17, 0.0 }
0x1844   :  { %v3327_v26 = vsel %vm3324_vm15, %v3326_v25, %v3322_v41  ;;  %vm3339_vm3 = vcmp.eq.f32.partialorder %v3338_v18, 8.507059e+37 }
0x1845   :  { %v3374_v33 = vmul.f32 1.0614054, %v3327_v26  ;;  %v3308_v30 = vmul.f32 0.3275911, %v5515_v7  ;;  %v3412_v5 = vsub.f32 0.0, %v5515_v7 }
0x1847   :  { %v4306_v37 = vpop.eup %4305  ;;  %v3378_v1 = vadd.f32 -1.4531521, %v3374_v33  ;;  %v3312_v12 = vadd.f32 1.0, %v3308_v30  ;;  %v3416_v30 = vmul.f32 %v3412_v5, %v5515_v7 }
0x1848   :  { %v3330_v8 = vmul.f32 %v4306_v37, %v3311_v6  ;;  %vm3335_vm1 = vweird.f32 %v4306_v37 }
0x1849   :  { %v3382_v21 = vmul.f32 %v3378_v1, %v3327_v26  ;;  %4307 = vrcp.f32 %v3312_v12  ;;  %vm3336_vm2 = vmor %vm3334_vm13, %vm3335_vm1  ;;  %v3355_v60 = vand.u32 2147483648, %v3312_v12  ;;  %v3353_v49 = vand.u32 2147483647, %v3312_v12 }
0x184a   :  { %v3331_v59 = vsub.f32 1.0, %v3330_v8  ;;  %4309 = vpow2.f32 %v3418_v23  ;;  %vm3349_vm5 = vweird.f32 %v3312_v12 }
0x184b   :  { %v3386_v16 = vadd.f32 1.4214138, %v3382_v21  ;;  %v3356_v4 = vor.u32 1.1754944e-38, %v3355_v60  ;;  %vm3354_vm7 = vcmp.eq.f32.partialorder %v3353_v49, 8.507059e+37  ;;  %4311 = vpow2.f32 %v3420_v19 }
0x184c   :  { %v3332_v11 = vmul.f32 %v4306_v37, %v3331_v59  ;;  %v3422_v21 = vmul.f32 1.442695, %v3416_v30 }
0x184d   :  { %v3390_v53 = vmul.f32 %v3386_v16, %v3327_v26 }
0x184e   :  { %v3333_v35 = vadd.f32 %v4306_v37, %v3332_v11  ;;  %4313 = vpow2.f32 %v3422_v21  ;;  %v4121_v21 = vld [vmem:[%s5635_s13 + $0x1] ss:$0 sm:$0xff] }
0x184f   :  { %v3394_v52 = vadd.f32 -0.28449672, %v3390_v53  ;;  %v4308_v43 = vpop.eup %4307 }
0x1850   :  { %v3337_v55 = vsel %vm3336_vm2, %v4306_v37, %v3333_v35  ;;  %v3345_v28 = vmul.f32 %v4308_v43, %v3312_v12  ;;  %vm3350_vm4 = vweird.f32 %v4308_v43  ;;  %v4310_v34 = vpop.eup %4309 }
0x1851   :  { %v3398_v31 = vmul.f32 %v3394_v52, %v3327_v26  ;;  %v3342_v42 = vsel %vm3339_vm3, %v3341_v54, %v3337_v55  ;;  %vm3351_vm6 = vmor %vm3349_vm5, %vm3350_vm4  ;;  %v4312_v16 = vpop.eup %4311  ;;  %v3295_v55 = vmul.f32 0.5, %v5481_v61 }
0x1852   :  { %v3375_v29 = vmul.f32 1.0614054, %v3342_v42  ;;  %v3346_v50 = vsub.f32 1.0, %v3345_v28 }
0x1853   :  { %v3402_v63 = vadd.f32 0.2548296, %v3398_v31 }
0x1854   :  { %v3379_v27 = vadd.f32 -1.4531521, %v3375_v29  ;;  %v3347_v44 = vmul.f32 %v4308_v43, %v3346_v50 }
0x1855   :  { %v3406_v10 = vmul.f32 %v3402_v63, %v3327_v26 }
0x1856   :  { %v3383_v47 = vmul.f32 %v3379_v27, %v3342_v42  ;;  %v3348_v2 = vadd.f32 %v4308_v43, %v3347_v44  ;;  %v3296_v27 = vmul.f32 0.5, %v5503_v20 }
0x1857   :  { %v3426_v9 = vmul.f32 %v4310_v34, %v3406_v10 }
0x1858   :  { %v3387_v15 = vadd.f32 1.4214138, %v3383_v47  ;;  %v3352_v48 = vsel %vm3351_vm6, %v4308_v43, %v3348_v2 }
0x1859   :  { %v3430_v0 = vsub.f32 1.0, %v3426_v9  ;;  %v3357_v22 = vsel %vm3354_vm7, %v3356_v4, %v3352_v48 }
0x185a   :  { %v3391_v6 = vmul.f32 %v3387_v15, %v3342_v42  ;;  %v3376_v24 = vmul.f32 1.0614054, %v3357_v22 }
0x185b   :  { %v3438_v58 = vsub.f32 0.0, %v3430_v0 }
0x185c   :  { %v3395_v25 = vadd.f32 -0.28449672, %v3391_v6  ;;  %v3380_v26 = vadd.f32 -1.4531521, %v3376_v24 }
0x185d   :  { %v3442_v41 = vsel %vm3434_vm8, %v3430_v0, %v3438_v58 }
0x185e   :  { %v3446_v33 = vadd.f32 1.0, %v3442_v41  ;;  %v3399_v37 = vmul.f32 %v3395_v25, %v3342_v42  ;;  %v3384_v1 = vmul.f32 %v3380_v26, %v3357_v22 }
0x1860   :  { %v3450_v45 = vmul.f32 %v3446_v33, %v3294_v38  ;;  %v3403_v8 = vadd.f32 0.2548296, %v3399_v37  ;;  %v3388_v12 = vadd.f32 1.4214138, %v3384_v1 }
0x1862   :  { %4037 = vmatmul.msk.f32.vlgmr.msrb.gmra.mxu0 %vm1753_vm11, %v3450_v45  ;;  %v3407_v59 = vmul.f32 %v3403_v8, %v3342_v42  ;;  %v3392_v40 = vmul.f32 %v3388_v12, %v3357_v22 }
0x1863   :  { %v3291_v57 = vpop.f32.mrf.mxu3 }
0x1864   :  { %v5526_v23 = vadd.f32 %v5465_v56, %v3291_v57  ;;  %v3427_v11 = vmul.f32 %v4312_v16, %v3407_v59  ;;  %v3396_v32 = vadd.f32 -0.28449672, %v3392_v40  ;;  %v4314_v56 = vpop.eup %4313 }
0x1866   :  { %v3301_v7 = vmul.f32 0.70710677, %v5526_v23  ;;  %v3431_v18 = vsub.f32 1.0, %v3427_v11  ;;  %v3400_v53 = vmul.f32 %v3396_v32, %v3357_v22  ;;  %v3297_v45 = vmul.f32 0.5, %v5526_v23 }
0x1868   :  { %v3305_v35 = vand.u32 2147483647, %v3301_v7  ;;  %v3439_v52 = vsub.f32 0.0, %v3431_v18  ;;  %v3404_v54 = vadd.f32 0.2548296, %v3400_v53  ;;  %vm3437_vm13 = vcmp.ge.f32.partialorder %v3301_v7, 0.0 }
0x186a   :  { %v3309_v43 = vmul.f32 0.3275911, %v3305_v35  ;;  %v3443_v13 = vsel %vm3435_vm9, %v3431_v18, %v3439_v52  ;;  %v3408_v28 = vmul.f32 %v3404_v54, %v3357_v22  ;;  %v3413_v17 = vsub.f32 0.0, %v3305_v35 }
0x186b   :  { %v3447_v31 = vadd.f32 1.0, %v3443_v13 }
0x186c   :  { %v3313_v42 = vadd.f32 1.0, %v3309_v43  ;;  %v3428_v63 = vmul.f32 %v4314_v56, %v3408_v28  ;;  %v3417_v48 = vmul.f32 %v3413_v17, %v3305_v35 }
0x186d   :  { %v3451_v29 = vmul.f32 %v3447_v31, %v3295_v55 }
0x186e   :  { %4315 = vrcp.f32 %v3313_v42  ;;  %v3432_v50 = vsub.f32 1.0, %v3428_v63  ;;  %v3370_v34 = vand.u32 2147483648, %v3313_v42  ;;  %v3368_v9 = vand.u32 2147483647, %v3313_v42 }
0x186f   :  { %4038 = vmatmul.msk.f32.gmra.mxu0 %vm1753_vm11, %v3451_v29  ;;  %vm3364_vm14 = vweird.f32 %v3313_v42  ;;  %v3424_v22 = vmul.f32 1.442695, %v3417_v48 }
0x1870   :  { %v3440_v46 = vsub.f32 0.0, %v3432_v50  ;;  %v3371_v4 = vor.u32 1.1754944e-38, %v3370_v34  ;;  %vm3369_vm1 = vcmp.eq.f32.partialorder %v3368_v9, 8.507059e+37 }
0x1871   :  { %4317 = vpow2.f32 %v3424_v22 }
0x1872   :  { %v3444_v60 = vsel %vm3436_vm10, %v3432_v50, %v3440_v46 }
0x1873   :  { %v3448_v10 = vadd.f32 1.0, %v3444_v60 }
0x1874   :  { %v4316_v3 = vpop.eup %4315 }
0x1875   :  { %v3360_v44 = vmul.f32 %v4316_v3, %v3313_v42  ;;  %v3452_v61 = vmul.f32 %v3448_v10, %v3296_v27  ;;  %vm3365_vm12 = vweird.f32 %v4316_v3 }
0x1876   :  { %vm3366_vm15 = vmor %vm3364_vm14, %vm3365_vm12 }
0x1877   :  { %v3361_v49 = vsub.f32 1.0, %v3360_v44  ;;  %4039 = vmatmul.msk.f32.gmra.mxu0 %vm1753_vm11, %v3452_v61  ;;  %v4318_v38 = vpop.eup %4317 }
0x1879   :  { %v3362_v47 = vmul.f32 %v4316_v3, %v3361_v49 }
0x187b   :  { %v3363_v2 = vadd.f32 %v4316_v3, %v3362_v47 }
0x187d   :  { %v3367_v15 = vsel %vm3366_vm15, %v4316_v3, %v3363_v2  ;;  %vm3632_vm15 = vcmask 1041409  }
0x187e   :  { %v3372_v0 = vsel %vm3369_vm1, %v3371_v4, %v3367_v15  ;;  %vm3635_vm1 = vcmask 1042434  }
0x187f   :  { %v3377_v19 = vmul.f32 1.0614054, %v3372_v0 }
0x1881   :  { %v3381_v20 = vadd.f32 -1.4531521, %v3377_v19 }
0x1883   :  { %v3385_v5 = vmul.f32 %v3381_v20, %v3372_v0 }
0x1885   :  { %v3389_v6 = vadd.f32 1.4214138, %v3385_v5 }
0x1887   :  { %v3393_v58 = vmul.f32 %v3389_v6, %v3372_v0 }
0x1889   :  { %v3397_v24 = vadd.f32 -0.28449672, %v3393_v58 }
0x188b   :  { %v3401_v25 = vmul.f32 %v3397_v24, %v3372_v0  ;;  %v3622_v24 = vld [vmem:[%s5638_s16 + $0x18] sm:$0xff] }
0x188c   :  { %3654 = vmatpush.msra.mxu1 %v3622_v24 }
0x188d   :  { %v3405_v41 = vadd.f32 0.2548296, %v3401_v25  ;;  %v3621_v25 = vld [vmem:[%s5638_s16 + $0x10] sm:$0xff] }
0x188e   :  { %3655 = vmatpush.msra.mxu1 %v3621_v25 }
0x188f   :  { %v3409_v26 = vmul.f32 %v3405_v41, %v3372_v0 }
0x1891   :  { %v3429_v33 = vmul.f32 %v4318_v38, %v3409_v26  ;;  %v3620_v38 = vld [vmem:[%s5638_s16 + $0x8] sm:$0xff] }
0x1892   :  { %3656 = vmatpush.msra.mxu1 %v3620_v38 }
0x1893   :  { %v3433_v30 = vsub.f32 1.0, %v3429_v33 }
0x1895   :  { %v3441_v37 = vsub.f32 0.0, %v3433_v30 }
0x1897   :  { %v3445_v1 = vsel %vm3437_vm13, %v3433_v30, %v3441_v37  ;;  %v3619_v30 = vld [vmem:[%s5638_s16] sm:$0xff]  ;;  %vm3638_vm13 = vcmask 1043459  }
0x1898   :  { %v3449_v8 = vadd.f32 1.0, %v3445_v1  ;;  %3657 = vmatpush.msra.mxu1 %v3619_v30 }
0x189a   :  { %v3453_v12 = vmul.f32 %v3449_v8, %v3297_v45 }
0x189c   :  { %4040 = vmatmul.msk.f32.gmra.mxu0 %vm1753_vm11, %v3453_v12 }
0x18df   :  { %v3497_v59 = vpop.f32.mrf.mxu0 }
0x18e0   :  { %v3498_v16 = vadd.f32 %v4121_v21, %v3497_v59 }
0x18e2   :  { %v3509_v57 = vadd.f32 %v3498_v16, %v5442_v51 }
0x18e4   :  { %v3517_v40 = vsel %vm70_vm0, %v3509_v57, 0.0 }
0x18e5   :  { %3518 = vadd.xlane.f32.xlu2 %v3517_v40 }
0x18ec   :  { %v3500_v11 = vpop.f32.mrf.mxu0 }
0x18ed   :  { %v3501_v32 = vadd.f32 %v4121_v21, %v3500_v11 }
0x18ef   :  { %v3510_v7 = vadd.f32 %v3501_v32, %v5447_v39 }
0x18f1   :  { %v3520_v23 = vsel %vm70_vm0, %v3510_v7, 0.0 }
0x18f2   :  { %3521 = vadd.xlane.f32.xlu0 %v3520_v23 }
0x18f4   :  { %v3503_v18 = vpop.f32.mrf.mxu0 }
0x18f5   :  { %v3504_v53 = vadd.f32 %v4121_v21, %v3503_v18 }
0x18f7   :  { %v3511_v35 = vadd.f32 %v3504_v53, %v5452_v62 }
0x18f9   :  { %v3523_v52 = vsel %vm70_vm0, %v3511_v35, 0.0 }
0x18fa   :  { %3524 = vadd.xlane.f32.xlu1 %v3523_v52 }
0x1919   :  { %v3506_v54 = vpop.f32.mrf.mxu0 }
0x191a   :  { %v3507_v43 = vadd.f32 %v4121_v21, %v3506_v54 }
0x191c   :  { %v3512_v51 = vadd.f32 %v3507_v43, %v5458_v36  ;;  %v4122_v43 = vld [vmem:[%s5636_s14 + $0x1] ss:$0 sm:$0xff] }
0x191e   :  { %v3526_v13 = vsel %vm70_vm0, %v3512_v51, 0.0 }
0x191f   :  { %3527 = vadd.xlane.f32.xlu0 %v3526_v13 }
0x1958   :  { %v3519_v55 = vpop.xlane.xlu2 %3518 }
0x1959   :  { %v3529_v39 = vmul.f32 %v3519_v55, %v4568_v14 }
0x195b   :  { %v5549_v31 = vsub.f32 %v3509_v57, %v3529_v39 }
0x195d   :  { %v3537_v28 = vmul.f32 %v5549_v31, %v5549_v31 }
0x195f   :  { %v3541_v62 = vsel %vm70_vm0, %v3537_v28, 0.0 }
0x1960   :  { %3542 = vadd.xlane.f32.xlu0 %v3541_v62  ;;  %v4123_v62 = vld [vmem:[%s5637_s15 + $0x1] ss:$0 sm:$0xff] }
0x1965   :  { %v3522_v56 = vpop.xlane.xlu0 %3521 }
0x1966   :  { %v3530_v42 = vmul.f32 %v3522_v56, %v4568_v14 }
0x1968   :  { %v5555_v29 = vsub.f32 %v3510_v7, %v3530_v42 }
0x196a   :  { %v3538_v36 = vmul.f32 %v5555_v29, %v5555_v29 }
0x196c   :  { %v3544_v63 = vsel %vm70_vm0, %v3538_v36, 0.0 }
0x196d   :  { %3545 = vadd.xlane.f32.xlu1 %v3544_v63  ;;  %v3525_v50 = vpop.xlane.xlu1 %3524 }
0x196e   :  { %v3531_v46 = vmul.f32 %v3525_v50, %v4568_v14 }
0x1970   :  { %v5561_v60 = vsub.f32 %v3511_v35, %v3531_v46 }
0x1972   :  { %v3539_v3 = vmul.f32 %v5561_v60, %v5561_v60 }
0x1974   :  { %v3547_v27 = vsel %vm70_vm0, %v3539_v3, 0.0 }
0x1975   :  { %3548 = vadd.xlane.f32.xlu2 %v3547_v27 }
0x1992   :  { %v3528_v10 = vpop.xlane.xlu0 %3527 }
0x1993   :  { %v3532_v44 = vmul.f32 %v3528_v10, %v4568_v14 }
0x1995   :  { %v5567_v61 = vsub.f32 %v3512_v51, %v3532_v44 }
0x1997   :  { %v3540_v49 = vmul.f32 %v5567_v61, %v5567_v61 }
0x1999   :  { %v3550_v34 = vsel %vm70_vm0, %v3540_v49, 0.0 }
0x199a   :  { %3551 = vadd.xlane.f32.xlu1 %v3550_v34 }
0x19d3   :  { %v3543_v15 = vpop.xlane.xlu0 %3542 }
0x19d4   :  { %v3553_v19 = vmul.f32 %v3543_v15, %v4568_v14 }
0x19d6   :  { %v3557_v20 = vadd.f32 1e-12, %v3553_v19 }
0x19d8   :  { %vm3567_vm8 = vweird.f32 %v3557_v20 }
0x19e0   :  { %v3546_v47 = vpop.xlane.xlu1 %3545 }
0x19e1   :  { %v3554_v2 = vmul.f32 %v3546_v47, %v4568_v14 }
0x19e3   :  { %v3558_v17 = vadd.f32 1e-12, %v3554_v2 }
0x19e5   :  { %4319 = vrsqrt.f32 %v3558_v17  ;;  %vm3577_vm3 = vweird.f32 %v3558_v17 }
0x19e8   :  { %v3549_v9 = vpop.xlane.xlu2 %3548 }
0x19e9   :  { %v3555_v4 = vmul.f32 %v3549_v9, %v4568_v14  ;;  %v4124_v9 = vld [vmem:[%s5639_s17] ss:$0 sm:$0xff]  ;;  %s4443_s17 = smov [#allocation4]  }
0x19ea   :  { %s3856_s5 = sshll.u32 %s4443_s17, 4  ;;  %s3857_s5 = int_to_ptr.vmem [resolvable:$true] %s3856_s5 }
0x19eb   :  { %v3559_v0 = vadd.f32 1e-12, %v3555_v4  ;;  %v4320_v48 = vpop.eup %4319 }
0x19ec   :  { %v3572_v6 = vmul.f32 %v4320_v48, %v3558_v17  ;;  %vm3578_vm11 = vweird.f32 %v4320_v48 }
0x19ed   :  { %4321 = vrsqrt.f32 %v3559_v0  ;;  %vm3579_vm4 = vmor %vm3577_vm3, %vm3578_vm11  ;;  %vm3587_vm5 = vweird.f32 %v3559_v0  ;;  %vm3664_vm11 = vcmask 257024  }
0x19ee   :  { %4323 = vrsqrt.f32 %v3557_v20  ;;  %v3573_v41 = vmul.f32 %v4320_v48, %v3572_v6 }
0x19f0   :  { %v3574_v37 = vmul.f32 0.5, %v3573_v41 }
0x19f2   :  { %v3575_v21 = vsub.f32 1.5, %v3574_v37 }
0x19f3   :  { %v4322_v5 = vpop.eup %4321 }
0x19f4   :  { %v3582_v22 = vmul.f32 %v4322_v5, %v3559_v0  ;;  %v4324_v58 = vpop.eup %4323  ;;  %v3576_v40 = vmul.f32 %v4320_v48, %v3575_v21  ;;  %vm3588_vm2 = vweird.f32 %v4322_v5 }
0x19f5   :  { %v3562_v33 = vmul.f32 %v4324_v58, %v3557_v20  ;;  %vm3589_vm6 = vmor %vm3587_vm5, %vm3588_vm2  ;;  %vm3568_vm7 = vweird.f32 %v4324_v58 }
0x19f6   :  { %v3583_v26 = vmul.f32 %v4322_v5, %v3582_v22  ;;  %v3580_v7 = vsel %vm3579_vm4, %v4320_v48, %v3576_v40  ;;  %vm3569_vm9 = vmor %vm3567_vm8, %vm3568_vm7 }
0x19f7   :  { %v3563_v45 = vmul.f32 %v4324_v58, %v3562_v33  ;;  %v3602_v35 = vmul.f32 %v3580_v7, %v5555_v29 }
0x19f8   :  { %v3584_v1 = vmul.f32 0.5, %v3583_v26 }
0x19f9   :  { %v3564_v57 = vmul.f32 0.5, %v3563_v45  ;;  %v3609_v55 = vmul.f32 %v4122_v43, %v3602_v35 }
0x19fa   :  { %v3585_v59 = vsub.f32 1.5, %v3584_v1 }
0x19fb   :  { %v3565_v32 = vsub.f32 1.5, %v3564_v57  ;;  %v3616_v29 = vadd.f32 %v4123_v62, %v3609_v55  ;;  %v3745_v57 = vlaneseq }
0x19fc   :  { %v3586_v11 = vmul.f32 %v4322_v5, %v3585_v59 }
0x19fd   :  { %v3566_v53 = vmul.f32 %v4324_v58, %v3565_v32  ;;  %v3746_v40 = vshrl.u32 %v3745_v57, 7 }
0x19fe   :  { %v3590_v18 = vsel %vm3589_vm6, %v4322_v5, %v3586_v11 }
0x19ff   :  { %v3603_v52 = vmul.f32 %v3590_v18, %v5561_v60  ;;  %v3570_v51 = vsel %vm3569_vm9, %v4324_v58, %v3566_v53  ;;  %v3631_v60 = vrot.slane %v3616_v29, 7  ;;  %v3757_v11 = vand.u32 1, %v3746_v40 }
0x1a00   :  { %v3601_v56 = vmul.f32 %v3570_v51, %v5549_v31  ;;  %v3752_v32 = vadd.s32 1, %v3746_v40  ;;  %v4442_v53 = vmov 0.0  }
0x1a01   :  { %v3610_v39 = vmul.f32 %v4122_v43, %v3603_v52  ;;  %v3765_v7 = vmul.u32 2, %v3757_v11 }
0x1a02   :  { %v3608_v50 = vmul.f32 %v4122_v43, %v3601_v56 }
0x1a03   :  { %v3617_v63 = vadd.f32 %v4123_v62, %v3610_v39  ;;  %v3766_v18 = vsub.s32 %v3752_v32, %v3765_v7 }
0x1a04   :  { %v3615_v10 = vadd.f32 %v4123_v62, %v3608_v50 }
0x1a05   :  { %v3634_v27 = vrot.slane %v3617_v63, 6 }
0x1a06   :  { %v3633_v49 = vsel %vm3632_vm15, %v3631_v60, %v3615_v10 }
0x1a07   :  { %v3636_v31 = vsel %vm3635_vm1, %v3634_v27, %v3633_v49 }
0x1a0d   :  { %v3552_v8 = vpop.xlane.xlu1 %3551 }
0x1a0e   :  { %v3556_v12 = vmul.f32 %v3552_v8, %v4568_v14 }
0x1a10   :  { %v3560_v16 = vadd.f32 1e-12, %v3556_v12 }
0x1a12   :  { %4325 = vrsqrt.f32 %v3560_v16  ;;  %vm3597_vm12 = vweird.f32 %v3560_v16 }
0x1a18   :  { %v4326_v23 = vpop.eup %4325 }
0x1a19   :  { %v3592_v14 = vmul.f32 %v4326_v23, %v3560_v16  ;;  %vm3598_vm10 = vweird.f32 %v4326_v23 }
0x1a1a   :  { %vm3599_vm14 = vmor %vm3597_vm12, %vm3598_vm10  ;;  %vm3817_vm10 = vcmask 3072  }
0x1a1b   :  { %v3593_v54 = vmul.f32 %v4326_v23, %v3592_v14 }
0x1a1d   :  { %v3594_v13 = vmul.f32 0.5, %v3593_v54 }
0x1a1f   :  { %v3595_v28 = vsub.f32 1.5, %v3594_v13 }
0x1a21   :  { %v3596_v42 = vmul.f32 %v4326_v23, %v3595_v28 }
0x1a23   :  { %v3600_v36 = vsel %vm3599_vm14, %v4326_v23, %v3596_v42  ;;  %v3748_v23 = vand.u32 127, %v3745_v57 }
0x1a24   :  { %v3604_v46 = vmul.f32 %v3600_v36, %v5567_v61 }
0x1a25   :  { %vm3749_vm8 = vcmp.eq.s32.totalorder %v3746_v40, %v3748_v23  ;;  %vm3767_vm9 = vcmp.eq.s32.totalorder %v3748_v23, %v3766_v18 }
0x1a26   :  { %v3611_v3 = vmul.f32 %v4122_v43, %v3604_v46  ;;  %v4046_v14 = vsel %vm3749_vm8, 1.0, %v4442_v53  ;;  %v4047_v35 = vsel %vm3767_vm9, 1.0, %v4442_v53 }
0x1a27   :  { %v3770_v52 = vmul.f32 1e+12, %v4046_v14  ;;  %v3773_v54 = vmul.f32 2.0, %v4047_v35  ;;  %v3778_v43 = vsub.f32 1.0, %v4047_v35  ;;  %v4445_v14 = vmov 4.0  }
0x1a28   :  { %v3618_v44 = vadd.f32 %v4123_v62, %v3611_v3  ;;  %v3776_v62 = vmul.f32 1e+12, %v4047_v35 }
0x1a29   :  { %v3774_v55 = vsub.f32 1.0, %v3773_v54  ;;  %v3779_v28 = vmul.f32 1e+12, %v3778_v43 }
0x1a2a   :  { %v3637_v34 = vrot.slane %v3618_v44, 5 }
0x1a2c   :  { %v3639_v47 = vsel %vm3638_vm13, %v3637_v34, %v3636_v31 }
0x1a2d   :  { %4043 = vmatmul.msk.f32.vlgmr.msra.gmra.mxu1 %vm70_vm0, %v3639_v47 }
0x1aaa   :  { %v3659_v2 = vpop.f32.mrf.mxu1 }
0x1aab   :  { %v3660_v61 = vadd.f32 %v4124_v9, %v3659_v2 }
0x1aad   :  { %4327 = vtanh.f32 %v3660_v61 }
0x1ab3   :  { %v4328_v4 = vpop.eup %4327 }
0x1ab4   :  { %v3663_v15 = vmul.f32 %v4328_v4, %v4328_v4 }
0x1ab6   :  { %v3665_v17 = vsel %vm3664_vm11, %v3663_v15, 0.0 }
0x1ab7   :  { %3666 = vadd.xlane.f32.xlu2 %v3665_v17 }
0x1b2a   :  { %v3667_v0 = vpop.xlane.xlu2 %3666 }
0x1b2b   :  { %4329 = vrsqrt.f32 %v3667_v0  ;;  %vm3675_vm2 = vcmp.eq.f32.partialorder %v3667_v0, inf  ;;  %v3678_v24 = vand.u32 2147483648, %v3667_v0  ;;  %vm3677_vm3 = vcmp.eq.f32.partialorder %v3667_v0, 0.0 }
0x1b31   :  { %v4330_v19 = vpop.eup %4329 }
0x1b32   :  { %v3669_v20 = vmul.f32 %v4330_v19, %v3667_v0 }
0x1b34   :  { %v3670_v48 = vmul.f32 %v4330_v19, %v3669_v20 }
0x1b36   :  { %v3671_v5 = vmul.f32 0.5, %v3670_v48 }
0x1b38   :  { %v3672_v6 = vsub.f32 1.5, %v3671_v5 }
0x1b3a   :  { %v3673_v22 = vmul.f32 %v4330_v19, %v3672_v6 }
0x1b3c   :  { %v3674_v58 = vmul.f32 %v3673_v22, %v3667_v0 }
0x1b3e   :  { %v3676_v25 = vsel %vm3675_vm2, %v3667_v0, %v3674_v58 }
0x1b3f   :  { %v3679_v41 = vsel %vm3677_vm3, %v3678_v24, %v3676_v25 }
0x1b40   :  { %v3680_v26 = vadd.f32 1e-08, %v3679_v41 }
0x1b42   :  { %4331 = vrcp.f32 %v3680_v26  ;;  %v3692_v37 = vand.u32 2147483648, %v3680_v26  ;;  %v3690_v45 = vand.u32 2147483647, %v3680_v26  ;;  %vm3686_vm5 = vweird.f32 %v3680_v26 }
0x1b44   :  { %v3693_v12 = vor.u32 1.1754944e-38, %v3692_v37  ;;  %vm3691_vm7 = vcmp.eq.f32.partialorder %v3690_v45, 8.507059e+37 }
0x1b48   :  { %v4332_v38 = vpop.eup %4331 }
0x1b49   :  { %v3682_v33 = vmul.f32 %v4332_v38, %v3680_v26  ;;  %vm3687_vm4 = vweird.f32 %v4332_v38 }
0x1b4a   :  { %vm3688_vm6 = vmor %vm3686_vm5, %vm3687_vm4 }
0x1b4b   :  { %v3683_v30 = vsub.f32 1.0, %v3682_v33 }
0x1b4d   :  { %v3684_v1 = vmul.f32 %v4332_v38, %v3683_v30 }
0x1b4f   :  { %v3685_v8 = vadd.f32 %v4332_v38, %v3684_v1 }
0x1b51   :  { %v3689_v21 = vsel %vm3688_vm6, %v4332_v38, %v3685_v8 }
0x1b52   :  { %v3694_v59 = vsel %vm3691_vm7, %v3693_v12, %v3689_v21 }
0x1b53   :  { %v3695_v16 = vmul.f32 %v4328_v4, %v3694_v59 }
0x1b55   :  { %4044 = vmatpush.xpose.msk.msrb.mxu1 %vm70_vm0, %v3695_v16  ;;  %3696 = vst.msk [vmem:[#allocation2] sm:$0xf] %vm3664_vm11, %v3695_v16  ;;  %v3697_v50 = vsel %vm3664_vm11, %v3695_v16, -inf }
0x1b56   :  { %3850 = dma.vmem_to_hbm [thread:$0]  %s3846_s21, 64, %s3848_s23, [#allocation3]  }
0x1b58   :  { %4045 = vmatmul.msk.f32.vlgmr.msrb.gmra.mxu1 %vm70_vm0, %v3695_v16  ;;  %vm3781_vm0 = vcmask 27648  }
0x1bd5   :  { %v3742_v51 = vpop.f32.mrf.mxu1 }
0x1bd6   :  { %v3771_v13 = vsub.f32 %v3742_v51, %v3770_v52 }
0x1bd8   :  { %v3772_v39 = vmul.f32 20.0, %v3771_v13 }
0x1bda   :  { %v3775_v56 = vmul.f32 %v3774_v55, %v3772_v39 }
0x1bdc   :  { %v3780_v42 = vsub.f32 %v3775_v56, %v3779_v28  ;;  %v3777_v29 = vsub.f32 %v3775_v56, %v3776_v62 }
0x1bde   :  { %v3799_v36 = vsel %vm3781_vm0, %v3780_v42, -inf  ;;  %v3782_v63 = vsel %vm3781_vm0, %v3777_v29, -inf }
0x1bdf   :  { %3800 = vmax.xlane.f32.xlu1 %v3799_v36  ;;  %3783 = vmax.xlane.f32.xlu0 %v3782_v63 }
0x1be7   :  { %3698 = vmax.xlane.f32.xlu1 %v3697_v50 }
0x1c52   :  { %v3801_v46 = vpop.xlane.xlu1 %3800  ;;  %v3784_v60 = vpop.xlane.xlu0 %3783 }
0x1c53   :  { %v3802_v3 = vmax.f32 %v3801_v46, 0.0  ;;  %v3785_v27 = vmax.f32 %v3784_v60, 0.0 }
0x1c55   :  { %v3803_v10 = vsub.f32 %v3780_v42, %v3802_v3  ;;  %v3786_v44 = vsub.f32 %v3777_v29, %v3785_v27  ;;  %v3809_v19 = vsub.f32 0.0, %v3802_v3  ;;  %v3792_v20 = vsub.f32 0.0, %v3785_v27 }
0x1c57   :  { %v3804_v49 = vmul.f32 1.442695, %v3803_v10  ;;  %v3787_v34 = vmul.f32 1.442695, %v3786_v44  ;;  %v3810_v48 = vmul.f32 1.442695, %v3809_v19 }
0x1c58   :  { %v3793_v5 = vmul.f32 1.442695, %v3792_v20 }
0x1c59   :  { %4333 = vpow2.f32 %v3804_v49 }
0x1c5a   :  { %v3699_v31 = vpop.xlane.xlu1 %3698  ;;  %4335 = vpow2.f32 %v3787_v34 }
0x1c5b   :  { %v3700_v47 = vsub.f32 %v3695_v16, %v3699_v31 }
0x1c5d   :  { %v3701_v9 = vmul.f32 1.442695, %v3700_v47 }
0x1c5f   :  { %v4334_v2 = vpop.eup %4333  ;;  %4337 = vpow2.f32 %v3701_v9 }
0x1c60   :  { %v3806_v61 = vsel %vm3781_vm0, %v4334_v2, 0.0  ;;  %v4336_v4 = vpop.eup %4335  ;;  %4339 = vpow2.f32 %v3810_v48 }
0x1c61   :  { %3807 = vadd.xlane.f32.xlu0 %v3806_v61  ;;  %v3789_v15 = vsel %vm3781_vm0, %v4336_v4, 0.0  ;;  %4341 = vpow2.f32 %v3793_v5 }
0x1c62   :  { %3790 = vadd.xlane.f32.xlu2 %v3789_v15 }
0x1c65   :  { %v4338_v17 = vpop.eup %4337 }
0x1c66   :  { %v3703_v0 = vsel %vm3664_vm11, %v4338_v17, 0.0  ;;  %v4340_v6 = vpop.eup %4339 }
0x1c67   :  { %v4342_v24 = vpop.eup %4341 }
0x1c69   :  { %3704 = vadd.xlane.f32.xlu0 %v3703_v0 }
0x1cd4   :  { %v3808_v22 = vpop.xlane.xlu0 %3807 }
0x1cd5   :  { %v3812_v58 = vadd.f32 %v4340_v6, %v3808_v22  ;;  %v3791_v25 = vpop.xlane.xlu2 %3790 }
0x1cd6   :  { %v3795_v41 = vadd.f32 %v4342_v24, %v3791_v25 }
0x1cd7   :  { %4343 = vlog2.f32 %v3812_v58 }
0x1cd8   :  { %4345 = vlog2.f32 %v3795_v41 }
0x1cdc   :  { %v3705_v26 = vpop.xlane.xlu0 %3704 }
0x1cdd   :  { %v4344_v38 = vpop.eup %4343  ;;  %4347 = vrcp.f32 %v3705_v26  ;;  %v3717_v57 = vand.u32 2147483648, %v3705_v26  ;;  %v3715_v11 = vand.u32 2147483647, %v3705_v26  ;;  %vm3711_vm14 = vweird.f32 %v3705_v26 }
0x1cde   :  { %v3814_v33 = vmul.f32 0.6931472, %v4344_v38  ;;  %v4346_v30 = vpop.eup %4345  ;;  %4349 = vrcp.f32 %v4445_v14 }
0x1cdf   :  { %v3797_v37 = vmul.f32 0.6931472, %v4346_v30  ;;  %v3718_v7 = vor.u32 1.1754944e-38, %v3717_v57  ;;  %vm3716_vm1 = vcmp.eq.f32.partialorder %v3715_v11, 8.507059e+37 }
0x1ce0   :  { %v3815_v1 = vadd.f32 %v3814_v33, %v3802_v3 }
0x1ce1   :  { %v3798_v45 = vadd.f32 %v3797_v37, %v3785_v27 }
0x1ce3   :  { %v4348_v8 = vpop.eup %4347  ;;  %v3816_v21 = vadd.f32 %v3815_v1, %v3798_v45 }
0x1ce4   :  { %v3707_v12 = vmul.f32 %v4348_v8, %v3705_v26  ;;  %vm3712_vm12 = vweird.f32 %v4348_v8  ;;  %v4350_v35 = vpop.eup %4349 }
0x1ce5   :  { %v3818_v16 = vsel %vm3817_vm10, %v3816_v21, 0.0  ;;  %vm3713_vm15 = vmor %vm3711_vm14, %vm3712_vm12  ;;  %v3829_v52 = vmul.f32 4.0, %v4350_v35  ;;  %vm3833_vm13 = vweird.f32 %v4350_v35 }
0x1ce6   :  { %v3708_v59 = vsub.f32 1.0, %v3707_v12  ;;  %3819 = vadd.xlane.f32.xlu2 %v3818_v16 }
0x1ce7   :  { %v3830_v54 = vsub.f32 1.0, %v3829_v52 }
0x1ce8   :  { %v3709_v40 = vmul.f32 %v4348_v8, %v3708_v59 }
0x1ce9   :  { %v3831_v55 = vmul.f32 %v4350_v35, %v3830_v54 }
0x1cea   :  { %v3710_v32 = vadd.f32 %v4348_v8, %v3709_v40 }
0x1ceb   :  { %v3832_v62 = vadd.f32 %v4350_v35, %v3831_v55 }
0x1cec   :  { %v3714_v23 = vsel %vm3713_vm15, %v4348_v8, %v3710_v32 }
0x1ced   :  { %v3719_v18 = vsel %vm3716_vm1, %v3718_v7, %v3714_v23  ;;  %v3834_v29 = vsel %vm3833_vm13, %v4350_v35, %v3832_v62 }
0x1cee   :  { %v3720_v53 = vmul.f32 %v4338_v17, %v3719_v18 }
0x1cf0   :  { %3721 = vst.msk [vmem:[#allocation4] sm:$0xf] %vm3664_vm11, %v3720_v53  ;;  %vm3838_vm11 = vcmask 0  }
0x1cf1   :  { %3861 = dma.vmem_to_hbm [thread:$0]  %s3857_s5, 64, %s3859_s7, [#allocation5]  }
0x1d59   :  { %v3820_v43 = vpop.xlane.xlu2 %3819 }
0x1d5a   :  { %v3821_v51 = vrot.slane %v3820_v43, 4 }
0x1d5c   :  { %v3822_v13 = vadd.f32 %v3821_v51, %v3820_v43 }
0x1d5e   :  { %v3823_v39 = vrot.slane %v3822_v13, 2 }
0x1d60   :  { %v3824_v28 = vadd.f32 %v3823_v39, %v3822_v13 }
0x1d62   :  { %v3825_v56 = vrot.slane %v3824_v28, 1 }
0x1d64   :  { %v3826_v42 = vadd.f32 %v3825_v56, %v3824_v28 }
0x1d66   :  { %4052 = vpush %v3826_v42 }
0x1d67   :  { %4054 = vpush %v3834_v29 }
0x1d97   :  { %s4053_s2 = spop %4052 }
0x1d98   :  { %s4055_s13 = spop %4054 }
0x1d99   :  { %s3836_s0 = smul.f32 %s4055_s13, %s4053_s2 }
0x1d9b   :  { %v3837_v36 = vstv %s3836_s0 }
0x1d9c   :  { %3839 = vst.msk [vmem:[#allocation6] sm:$0x1] %vm3838_vm11, %v3837_v36 }
0x1d9d   :  { %3872 = dma.vmem_to_hbm [thread:$0]  %s3868_s19, 16, %s3870_s10, [#allocation5]  }
0x1d9e   :  { %4423 = dma.done.wait [#allocation3], 64  }
0x1d9f   :  { %4424 = vsyncadd [#allocation3], 4294967232 }
0x1da0   :  { %4425 = dma.done.wait [#allocation5], 80  }
0x1da1   :  { %4426 = vsyncadd [#allocation5], 4294967216 }
0x1da2   :  { %3885 = vsyncpa [#allocation3], 1 }
0x1da3   :  { %3886 = vsyncpa [#allocation5], 1 }

</bundles_post_ra>
